<compile_context>
chip_gen: v7x
topology: tpu7x:2x2x1
jax: 0.10.0
libtpu: 0.0.40
codegen_flags: <defaults>
</compile_context>

<pallas_src>
import functools

import jax
import jax.numpy as jnp
import numpy as np
from jax.experimental import pallas as pl
from jax.experimental.pallas import tpu as pltpu


BN_EPS = 1e-5

# Above this contraction depth we switch from one fused K=9*C matmul (lane
# concat of the 9 taps) to 9 shifted-tap matmuls with K=C.
_CONCAT_MAX_K = 512


# --------------------------------------------------------------------------
# Fused Pallas kernel: conv1(3x3)+bias+ReLU -> conv2(3x3)+bias+ReLU -> +alpha*x
# Grid: (batch, row_tiles).  The row-tile axis is sequential ("arbitrary") so
# the whole-image padded x scratch staged at t == 0 stays valid for all tiles
# of that image; the batch axis is "parallel" (feeds both v7x TensorCores).
# --------------------------------------------------------------------------
def _bottlerep_kernel(x_ref, w1_ref, b1_ref, w2_ref, b2_ref, o_ref, xp, yp,
                      *, tile_h, shortcut, alpha, mm_dtype):
    # x_ref : (H, W, Cin)   f32      whole input image (batch dim squeezed);
    #                                resident across the row-tile axis.
    # w1_ref: (9*Cin, Cout) mm_dtype fused conv1 weights, rows = (dy*3+dx)*Cin+i
    # b1_ref: (1, Cout)     f32
    # w2_ref: (9*Cout, Cout) mm_dtype
    # b2_ref: (1, Cout)     f32
    # o_ref : (TH*W, Cout)           output row tile in flattened matmul layout
    # xp    : VMEM (H+4, W+2, Cin)  mm_dtype  padded whole image (2-row halo)
    # yp    : VMEM (TH+2, W+2, Cout) mm_dtype padded conv1 tile (1-row halo)
    H, W, Cin = x_ref.shape
    Cout = o_ref.shape[-1]
    TH = tile_h
    rows1 = TH + 2                      # conv1 rows computed per tile (y halo)
    t = pl.program_id(1)
    T = pl.num_programs(1)
    r0 = pl.multiple_of(t * TH, TH)     # first output row of this tile

    # ---- once per image: stage x into the padded matmul-dtype scratch.
    # The x block's index_map is constant in t, so this copy happens once per
    # batch element (amortized over all row tiles) and doubles as the single
    # f32 -> matmul-dtype cast point.  Halos stay zero.
    @pl.when(t == 0)
    def _stage():
        xp[0:2, :, :] = jnp.zeros((2, W + 2, Cin), mm_dtype)
        xp[H + 2:H + 4, :, :] = jnp.zeros((2, W + 2, Cin), mm_dtype)
        xp[:, 0:1, :] = jnp.zeros((H + 4, 1, Cin), mm_dtype)
        xp[:, W + 1:W + 2, :] = jnp.zeros((H + 4, 1, Cin), mm_dtype)
        xp[2:H + 2, 1:W + 1, :] = x_ref[...].astype(mm_dtype)
        # yp's column halo is never written elsewhere -> zero it once.
        yp[:, 0:1, :] = jnp.zeros((TH + 2, 1, Cout), mm_dtype)
        yp[:, W + 1:W + 2, :] = jnp.zeros((TH + 2, 1, Cout), mm_dtype)

    def conv3x3(read_tap, c_in, rows, w_ref, b_ref):
        # read_tap(dy, dx) -> (rows*W, c_in) operand slab in mm_dtype.
        if 9 * c_in <= _CONCAT_MAX_K:
            # Tiny-channel case: one MXU matmul with K = 9*c_in.
            lhs = jnp.concatenate(
                [read_tap(dy, dx) for dy in range(3) for dx in range(3)],
                axis=-1)
            acc = jnp.dot(lhs, w_ref[...], preferred_element_type=jnp.float32)
        else:
            # Production case: 9 shifted-tap matmuls with K = c_in.  No 9x
            # im2col temporary, no lane-axis concatenate; K >= 128/256 keeps
            # the MXU fully efficient.
            acc = None
            for dy in range(3):
                for dx in range(3):
                    tap = dy * 3 + dx
                    d = jnp.dot(read_tap(dy, dx),
                                w_ref[tap * c_in:(tap + 1) * c_in, :],
                                preferred_element_type=jnp.float32)
                    acc = d if acc is None else acc + d
        return jnp.maximum(acc + b_ref[...], 0.0)   # bias + ReLU in f32

    # ---- conv1 over TH+2 rows (1-row halo of y on each side); y never leaves
    # VMEM.  xp row = x row + 2, xp col = x col + 1.
    def x_tap(dy, dx):
        sl = xp[pl.ds(r0 + dy, rows1), pl.ds(dx, W), :]
        return sl.reshape(rows1 * W, Cin)

    y = conv3x3(x_tap, Cin, rows1, w1_ref, b1_ref)            # f32
    yp[0:rows1, 1:W + 1, :] = y.reshape(rows1, W, Cout).astype(mm_dtype)

    # y rows outside the image are not valid conv outputs; conv2 must see zeros
    # there (SAME padding), so blank the halo rows at the image boundaries.
    @pl.when(t == 0)
    def _zero_top():
        yp[0:1, 1:W + 1, :] = jnp.zeros((1, W, Cout), mm_dtype)

    @pl.when(t == T - 1)
    def _zero_bottom():
        yp[rows1 - 1:rows1, 1:W + 1, :] = jnp.zeros((1, W, Cout), mm_dtype)

    # ---- conv2 over the TH output rows of this tile.  yp row j = y row r0-1+j.
    def y_tap(dy, dx):
        sl = yp[pl.ds(dy, TH), pl.ds(dx, W), :]
        return sl.reshape(TH * W, Cout)

    z = conv3x3(y_tap, Cout, TH, w2_ref, b2_ref)              # f32

    if shortcut:
        # Residual straight from the resident f32 input block (exact, and no
        # im2col taps kept alive across conv2).
        res = x_ref[pl.ds(r0, TH), :, :].astype(jnp.float32).reshape(TH * W, Cin)
        if alpha != 1.0:
            res = res * jnp.float32(alpha)
        z = z + res

    o_ref[...] = z.astype(o_ref.dtype)


# --------------------------------------------------------------------------
# VMEM budgeting + tile selection (generation-aware, no silent 64 MiB clamp)
# --------------------------------------------------------------------------
def _vmem_cap_bytes():
    """~85% of this chip generation's physical per-core VMEM."""
    try:
        cap = int(pltpu.get_tpu_info().vmem_capacity_bytes)
    except Exception:
        cap = 64 << 20   # conservative (v7x-sized) fallback
    return int(cap * 0.85)


def _vmem_need_bytes(H, W, Cin, Cout, tile_h, mm_bytes):
    f32 = 4
    rows = tile_h + 2
    x_block = 2 * H * W * Cin * f32                    # double-buffered x block
    out_block = 2 * tile_h * W * Cout * f32            # double-buffered out block
    weights = 2 * 9 * (Cin + Cout) * Cout * mm_bytes + 4 * Cout * f32
    xp = (H + 4) * (W + 2) * Cin * mm_bytes            # padded whole-image x
    yp = rows * (W + 2) * Cout * mm_bytes              # padded conv1 tile
    k1 = 9 * Cin if 9 * Cin <= _CONCAT_MAX_K else Cin
    k2 = 9 * Cout if 9 * Cout <= _CONCAT_MAX_K else Cout
    temps = (rows * W * (2 * Cout * f32 + k1 * mm_bytes)
             + tile_h * W * (2 * Cout * f32 + k2 * mm_bytes + Cin * f32))
    return x_block + out_block + weights + xp + yp + temps + (4 << 20)


def _pick_tile_h(H, W, Cin, Cout, mm_bytes, cap):
    # Largest multiple-of-8 divisor of H (<= 64 rows) whose working set fits
    # the VMEM budget; "need > cap" shrinks the tile instead of being clamped.
    cands = [d for d in range(min(H, 64), 7, -1) if H % d == 0 and d % 8 == 0]
    if not cands:
        cands = [H]
    for th in cands:
        if _vmem_need_bytes(H, W, Cin, Cout, th, mm_bytes) <= cap:
            return th
    # Even the smallest row tile exceeds the budget (very large W*C); use it
    # anyway.  A production version would additionally tile W / Cout here.
    return cands[-1]


# --------------------------------------------------------------------------
# Wrapper
# --------------------------------------------------------------------------
def bottlerep_pallas(x_nhwc, k1_oihw, b1, k2_oihw, b2, *, shortcut, alpha=1.0,
                     matmul_dtype=jnp.bfloat16, tile_h=None):
    """Fused BottleRep: relu(conv2(relu(conv1(x)+b1))+b2) [+ alpha*x].

    matmul_dtype controls the MXU operand dtype (bf16 by default on v5e/v6e/v7x;
    accumulation, bias/ReLU and the residual stay f32).
    """
    N, H, W, Cin = x_nhwc.shape
    Cout = k1_oihw.shape[0]
    assert k2_oihw.shape == (Cout, Cout, 3, 3)
    if shortcut:
        assert Cin == Cout

    mm_bytes = np.dtype(matmul_dtype).itemsize
    cap = _vmem_cap_bytes()
    if tile_h is None:
        tile_h = _pick_tile_h(H, W, Cin, Cout, mm_bytes, cap)
    assert H % tile_h == 0, (H, tile_h)
    T = H // tile_h
    need = _vmem_need_bytes(H, W, Cin, Cout, tile_h, mm_bytes)
    vmem_limit = int(min(max(need, 32 << 20), cap))

    # (O, I, 3, 3) -> (3, 3, I, O) -> (9*I, O); row order matches the kernel's
    # tap order ((dy*3 + dx)*I + i).  Cast once here (weights are tiny).
    w1 = jnp.transpose(k1_oihw, (2, 3, 1, 0)).reshape(9 * Cin, Cout).astype(matmul_dtype)
    w2 = jnp.transpose(k2_oihw, (2, 3, 1, 0)).reshape(9 * Cout, Cout).astype(matmul_dtype)
    b1_2d = b1.reshape(1, Cout).astype(jnp.float32)
    b2_2d = b2.reshape(1, Cout).astype(jnp.float32)

    kernel = functools.partial(_bottlerep_kernel, tile_h=tile_h,
                               shortcut=bool(shortcut), alpha=float(alpha),
                               mm_dtype=matmul_dtype)

    # NOTE: the row-tile axis must stay "arbitrary" (sequential per image)
    # because xp is staged once per image at t == 0; the batch axis feeds both
    # v7x TensorCores.  For N == 1 inference, making tiles fully independent
    # (per-tile halo staging) would let t be "parallel" as well.
    out_flat = pl.pallas_call(
        kernel,
        out_shape=jax.ShapeDtypeStruct((N, H * W, Cout), x_nhwc.dtype),
        grid=(N, T),
        in_specs=[
            pl.BlockSpec((None, H, W, Cin), lambda n, t: (n, 0, 0, 0)),
            pl.BlockSpec((9 * Cin, Cout), lambda n, t: (0, 0)),
            pl.BlockSpec((1, Cout), lambda n, t: (0, 0)),
            pl.BlockSpec((9 * Cout, Cout), lambda n, t: (0, 0)),
            pl.BlockSpec((1, Cout), lambda n, t: (0, 0)),
        ],
        out_specs=pl.BlockSpec((None, tile_h * W, Cout), lambda n, t: (n, t, 0)),
        scratch_shapes=[
            pltpu.VMEM((H + 4, W + 2, Cin), matmul_dtype),        # padded x
            pltpu.VMEM((tile_h + 2, W + 2, Cout), matmul_dtype),  # padded y tile
        ],
        compiler_params=pltpu.CompilerParams(
            dimension_semantics=("parallel", "arbitrary"),
            vmem_limit_bytes=vmem_limit,
        ),
    )(x_nhwc, w1, b1_2d, w2, b2_2d)

    return out_flat.reshape(N, H, W, Cout)


# --------------------------------------------------------------------------
# Parameter construction + BN folding (plain-JAX glue, mirrors
# RepVGGBlock._fuse_bn_tensor / get_equivalent_kernel_bias).
# --------------------------------------------------------------------------
def make_repvgg_params(key, cin, cout):
    ks = jax.random.split(key, 5)

    def bn_params(k, c):
        kg, kb, km, kv = jax.random.split(k, 4)
        return (jax.random.uniform(kg, (c,), minval=0.5, maxval=1.5),  # gamma
                0.1 * jax.random.normal(kb, (c,)),                     # beta
                0.1 * jax.random.normal(km, (c,)),                     # running_mean
                jax.random.uniform(kv, (c,), minval=0.5, maxval=1.5))  # running_var

    p = {
        "w3": 0.3 * jax.random.normal(ks[0], (cout, cin, 3, 3), jnp.float32),
        "bn3": bn_params(ks[1], cout),
        "w1": 0.3 * jax.random.normal(ks[2], (cout, cin, 1, 1), jnp.float32),
        "bn1": bn_params(ks[3], cout),
    }
    if cin == cout:
        p["bnid"] = bn_params(ks[4], cin)
    return p


def fuse_conv_bn(w, bn):
    gamma, beta, mean, var = bn
    std = jnp.sqrt(var + BN_EPS)
    k = w * (gamma / std)[:, None, None, None]
    b = beta - mean * gamma / std
    return k, b


def fuse_repvgg(params, cin, cout):
    k3, b3 = fuse_conv_bn(params["w3"], params["bn3"])
    k1, b1 = fuse_conv_bn(params["w1"], params["bn1"])
    k1 = jnp.pad(k1, ((0, 0), (0, 0), (1, 1), (1, 1)))   # 1x1 -> centered 3x3
    k, b = k3 + k1, b3 + b1
    if cin == cout:
        idx = jnp.arange(cin)
        id_k = jnp.zeros((cin, cin, 3, 3), jnp.float32).at[idx, idx, 1, 1].set(1.0)
        kid, bid = fuse_conv_bn(id_k, params["bnid"])
        k, b = k + kid, b + bid
    return k, b


# --------------------------------------------------------------------------
# BottleRep forward (NCHW in / NCHW out, like the PyTorch module)
# --------------------------------------------------------------------------
@functools.partial(jax.jit, static_argnums=(3, 4, 5, 6))
def bottlerep_forward(x_nchw, params1, params2, in_channels, out_channels,
                      matmul_dtype=jnp.bfloat16, tile_h=None):
    shortcut = in_channels == out_channels
    alpha = 1.0  # weight=False -> self.alpha = 1.0

    x = jnp.transpose(x_nchw, (0, 2, 3, 1))  # NCHW -> NHWC

    k1, b1 = fuse_repvgg(params1, in_channels, out_channels)
    k2, b2 = fuse_repvgg(params2, out_channels, out_channels)

    z = bottlerep_pallas(x, k1, b1, k2, b2, shortcut=shortcut, alpha=alpha,
                         matmul_dtype=matmul_dtype, tile_h=tile_h)
    return jnp.transpose(z, (0, 3, 1, 2))    # NHWC -> NCHW


# --------------------------------------------------------------------------
# Pure-JAX reference for verification (matmul_dtype mirrors the kernel's
# operand dtype; accumulation / bias / ReLU / residual stay f32).
# --------------------------------------------------------------------------
def _conv3x3_ref(x_nhwc, k_oihw, bias):
    w_hwio = jnp.transpose(k_oihw, (2, 3, 1, 0))
    y = jax.lax.conv_general_dilated(
        x_nhwc, w_hwio, (1, 1), "SAME",
        dimension_numbers=("NHWC", "HWIO", "NHWC"),
        preferred_element_type=jnp.float32,
        precision=jax.lax.Precision.HIGHEST)
    return jnp.maximum(y + bias, 0.0)


def bottlerep_ref(x_nchw, params1, params2, cin, cout, matmul_dtype=jnp.float32):
    x = jnp.transpose(x_nchw, (0, 2, 3, 1)).astype(jnp.float32)
    k1, b1 = fuse_repvgg(params1, cin, cout)
    k2, b2 = fuse_repvgg(params2, cout, cout)
    y = _conv3x3_ref(x.astype(matmul_dtype), k1.astype(matmul_dtype), b1)
    z = _conv3x3_ref(y.astype(matmul_dtype), k2.astype(matmul_dtype), b2)
    if cin == cout:
        z = z + x                     # residual in f32, like the kernel
    return jnp.transpose(z, (0, 3, 1, 2))


if __name__ == "__main__":
    key = jax.random.PRNGKey(0)
    k_x, k_p1, k_p2, k_x2, k_q1, k_q2, k_x3, k_r1, k_r2 = jax.random.split(key, 9)

    # Case 1: shortcut path (Cin == Cout), tiny channels -> fused K=9*C matmul,
    # f32 MXU operands, auto tile (single row tile).
    N, C, H, W = 2, 4, 16, 16
    x = jax.random.normal(k_x, (N, C, H, W), jnp.float32)
    p1 = make_repvgg_params(k_p1, C, C)
    p2 = make_repvgg_params(k_p2, C, C)

    out = jax.block_until_ready(bottlerep_forward(x, p1, p2, C, C, jnp.float32, None))
    ref = bottlerep_ref(x, p1, p2, C, C, jnp.float32)
    assert out.shape == (N, C, H, W)
    err = float(jnp.abs(out - ref).max())
    assert jnp.allclose(out, ref, atol=2e-3, rtol=2e-3), ("f32", err)

    # Case 2: bf16 MXU operands (default fast path) + forced row tiling
    # (tile_h=8 -> two row tiles per image), compared against a bf16 reference.
    out_bf = jax.block_until_ready(bottlerep_forward(x, p1, p2, C, C, jnp.bfloat16, 8))
    ref_bf = bottlerep_ref(x, p1, p2, C, C, jnp.bfloat16)
    err_bf = float(jnp.abs(out_bf - ref_bf).max())
    assert jnp.allclose(out_bf, ref_bf, atol=2e-2, rtol=2e-2), ("bf16", err_bf)

    # Case 3: larger channel count -> shifted-tap (K=C) accumulation path,
    # row-tiled, f32 operands.
    C3 = 64
    x3 = jax.random.normal(k_x2, (1, C3, H, W), jnp.float32)
    q1 = make_repvgg_params(k_q1, C3, C3)
    q2 = make_repvgg_params(k_q2, C3, C3)
    out3 = jax.block_until_ready(bottlerep_forward(x3, q1, q2, C3, C3, jnp.float32, 8))
    ref3 = bottlerep_ref(x3, q1, q2, C3, C3, jnp.float32)
    err3 = float(jnp.abs(out3 - ref3).max())
    assert jnp.allclose(out3, ref3, atol=5e-3, rtol=5e-3), ("per-tap", err3)

    # Case 4: Cin != Cout -> no shortcut branch.
    Cin4, Cout4 = 4, 8
    x4 = jax.random.normal(k_x3, (1, Cin4, H, W), jnp.float32)
    r1 = make_repvgg_params(k_r1, Cin4, Cout4)
    r2 = make_repvgg_params(k_r2, Cout4, Cout4)
    out4 = jax.block_until_ready(bottlerep_forward(x4, r1, r2, Cin4, Cout4,
                                                   jnp.float32, None))
    ref4 = bottlerep_ref(x4, r1, r2, Cin4, Cout4, jnp.float32)
    err4 = float(jnp.abs(out4 - ref4).max())
    assert jnp.allclose(out4, ref4, atol=2e-3, rtol=2e-3), ("no-shortcut", err4)

    print("KERNEL_OK")
</pallas_src>

<mosaic_0001>
module attributes {stable_mosaic.version = 11 : i64} {
  func.func @_bottlerep_kernel(%arg0: i32, %arg1: i32, %arg2: memref<1x16x16x4xf32, #tpu.memory_space<vmem>>, %arg3: memref<36x4xf32, #tpu.memory_space<vmem>>, %arg4: memref<1x4xf32, #tpu.memory_space<vmem>>, %arg5: memref<36x4xf32, #tpu.memory_space<vmem>>, %arg6: memref<1x4xf32, #tpu.memory_space<vmem>>, %arg7: memref<1x256x4xf32, #tpu.memory_space<vmem>>, %arg8: memref<20x18x4xf32, #tpu.memory_space<vmem>>, %arg9: memref<18x18x4xf32, #tpu.memory_space<vmem>>) attributes {dimension_semantics = [#tpu.dimension_semantics<parallel>, #tpu.dimension_semantics<arbitrary>], iteration_bounds = array<i64: 2, 1>, scalar_prefetch = 0 : i64, scratch_operands = 2 : i64, tpu.core_type = #tpu.core_type<tc>, window_params = [{transform_indices = @transform_0, window_bounds = array<i64: 1, 16, 16, 4>}, {pipeline_mode = #tpu.pipeline_mode<synchronous>, transform_indices = @transform_1, window_bounds = array<i64: 36, 4>}, {pipeline_mode = #tpu.pipeline_mode<synchronous>, transform_indices = @transform_2, window_bounds = array<i64: 1, 4>}, {pipeline_mode = #tpu.pipeline_mode<synchronous>, transform_indices = @transform_3, window_bounds = array<i64: 36, 4>}, {pipeline_mode = #tpu.pipeline_mode<synchronous>, transform_indices = @transform_4, window_bounds = array<i64: 1, 4>}, {transform_indices = @transform_5, window_bounds = array<i64: 1, 256, 4>}]} {
    %c16_i32 = arith.constant 16 : i32
    %0 = arith.muli %arg1, %c16_i32 : i32
    %1 = tpu.assume_multiple %0, 16 : i32
    %c0_i32 = arith.constant 0 : i32
    %2 = arith.cmpi eq, %arg1, %c0_i32 : i32
    %3 = arith.extui %2 : i1 to i32
    %c0_i32_0 = arith.constant 0 : i32
    %4 = arith.cmpi ne, %3, %c0_i32_0 : i32
    scf.if %4 {
      %cst_74 = arith.constant 0.000000e+00 : f32
      %91 = vector.broadcast %cst_74 : f32 to vector<2x18x4xf32>
      %c0_75 = arith.constant 0 : index
      %c0_76 = arith.constant 0 : index
      %c0_77 = arith.constant 0 : index
      %92 = vector.load %arg8[%c0_75, %c0_76, %c0_77] : memref<20x18x4xf32, #tpu.memory_space<vmem>>, vector<2x18x4xf32>
      tpu.vector_store %arg8[%c0_75, %c0_76, %c0_77], %91 {strides = array<i32>} : memref<20x18x4xf32, #tpu.memory_space<vmem>>, vector<2x18x4xf32>,
      %cst_78 = arith.constant 0.000000e+00 : f32
      %93 = vector.broadcast %cst_78 : f32 to vector<2x18x4xf32>
      %c18 = arith.constant 18 : index
      %c0_79 = arith.constant 0 : index
      %c0_80 = arith.constant 0 : index
      %94 = vector.load %arg8[%c18, %c0_79, %c0_80] : memref<20x18x4xf32, #tpu.memory_space<vmem>>, vector<2x18x4xf32>
      tpu.vector_store %arg8[%c18, %c0_79, %c0_80], %93 {strides = array<i32>} : memref<20x18x4xf32, #tpu.memory_space<vmem>>, vector<2x18x4xf32>,
      %cst_81 = arith.constant 0.000000e+00 : f32
      %95 = vector.broadcast %cst_81 : f32 to vector<20x1x4xf32>
      %c0_82 = arith.constant 0 : index
      %c0_83 = arith.constant 0 : index
      %c0_84 = arith.constant 0 : index
      %96 = vector.load %arg8[%c0_82, %c0_83, %c0_84] : memref<20x18x4xf32, #tpu.memory_space<vmem>>, vector<20x1x4xf32>
      tpu.vector_store %arg8[%c0_82, %c0_83, %c0_84], %95 {strides = array<i32>} : memref<20x18x4xf32, #tpu.memory_space<vmem>>, vector<20x1x4xf32>,
      %cst_85 = arith.constant 0.000000e+00 : f32
      %97 = vector.broadcast %cst_85 : f32 to vector<20x1x4xf32>
      %c0_86 = arith.constant 0 : index
      %c17 = arith.constant 17 : index
      %c0_87 = arith.constant 0 : index
      %98 = vector.load %arg8[%c0_86, %c17, %c0_87] : memref<20x18x4xf32, #tpu.memory_space<vmem>>, vector<20x1x4xf32>
      tpu.vector_store %arg8[%c0_86, %c17, %c0_87], %97 {strides = array<i32>} : memref<20x18x4xf32, #tpu.memory_space<vmem>>, vector<20x1x4xf32>,
      %c0_88 = arith.constant 0 : index
      %c0_89 = arith.constant 0 : index
      %c0_90 = arith.constant 0 : index
      %c0_91 = arith.constant 0 : index
      %99 = vector.load %arg2[%c0_88, %c0_89, %c0_90, %c0_91] : memref<1x16x16x4xf32, #tpu.memory_space<vmem>>, vector<1x16x16x4xf32>
      %100 = vector.shape_cast %99 : vector<1x16x16x4xf32> to vector<16x16x4xf32>
      %c2_92 = arith.constant 2 : index
      %c1_93 = arith.constant 1 : index
      %c0_94 = arith.constant 0 : index
      %101 = vector.load %arg8[%c2_92, %c1_93, %c0_94] : memref<20x18x4xf32, #tpu.memory_space<vmem>>, vector<16x16x4xf32>
      tpu.vector_store %arg8[%c2_92, %c1_93, %c0_94], %100 {strides = array<i32>} : memref<20x18x4xf32, #tpu.memory_space<vmem>>, vector<16x16x4xf32>,
      %cst_95 = arith.constant 0.000000e+00 : f32
      %102 = vector.broadcast %cst_95 : f32 to vector<18x1x4xf32>
      %c0_96 = arith.constant 0 : index
      %c0_97 = arith.constant 0 : index
      %c0_98 = arith.constant 0 : index
      %103 = vector.load %arg9[%c0_96, %c0_97, %c0_98] : memref<18x18x4xf32, #tpu.memory_space<vmem>>, vector<18x1x4xf32>
      tpu.vector_store %arg9[%c0_96, %c0_97, %c0_98], %102 {strides = array<i32>} : memref<18x18x4xf32, #tpu.memory_space<vmem>>, vector<18x1x4xf32>,
      %cst_99 = arith.constant 0.000000e+00 : f32
      %104 = vector.broadcast %cst_99 : f32 to vector<18x1x4xf32>
      %c0_100 = arith.constant 0 : index
      %c17_101 = arith.constant 17 : index
      %c0_102 = arith.constant 0 : index
      %105 = vector.load %arg9[%c0_100, %c17_101, %c0_102] : memref<18x18x4xf32, #tpu.memory_space<vmem>>, vector<18x1x4xf32>
      tpu.vector_store %arg9[%c0_100, %c17_101, %c0_102], %104 {strides = array<i32>} : memref<18x18x4xf32, #tpu.memory_space<vmem>>, vector<18x1x4xf32>,
    } else {
    }
    %c0_i32_1 = arith.constant 0 : i32
    %5 = arith.addi %1, %c0_i32_1 : i32
    %6 = arith.index_cast %5 : i32 to index
    %c0 = arith.constant 0 : index
    %c0_2 = arith.constant 0 : index
    %7 = vector.load %arg8[%6, %c0, %c0_2] : memref<20x18x4xf32, #tpu.memory_space<vmem>>, vector<18x16x4xf32>
    %8 = vector.shape_cast %7 : vector<18x16x4xf32> to vector<288x4xf32>
    %c0_i32_3 = arith.constant 0 : i32
    %9 = arith.addi %1, %c0_i32_3 : i32
    %10 = arith.index_cast %9 : i32 to index
    %c1 = arith.constant 1 : index
    %c0_4 = arith.constant 0 : index
    %11 = vector.load %arg8[%10, %c1, %c0_4] : memref<20x18x4xf32, #tpu.memory_space<vmem>>, vector<18x16x4xf32>
    %12 = vector.shape_cast %11 : vector<18x16x4xf32> to vector<288x4xf32>
    %c0_i32_5 = arith.constant 0 : i32
    %13 = arith.addi %1, %c0_i32_5 : i32
    %14 = arith.index_cast %13 : i32 to index
    %c2 = arith.constant 2 : index
    %c0_6 = arith.constant 0 : index
    %15 = vector.load %arg8[%14, %c2, %c0_6] : memref<20x18x4xf32, #tpu.memory_space<vmem>>, vector<18x16x4xf32>
    %16 = vector.shape_cast %15 : vector<18x16x4xf32> to vector<288x4xf32>
    %c1_i32 = arith.constant 1 : i32
    %17 = arith.addi %1, %c1_i32 : i32
    %18 = arith.index_cast %17 : i32 to index
    %c0_7 = arith.constant 0 : index
    %c0_8 = arith.constant 0 : index
    %19 = vector.load %arg8[%18, %c0_7, %c0_8] : memref<20x18x4xf32, #tpu.memory_space<vmem>>, vector<18x16x4xf32>
    %20 = vector.shape_cast %19 : vector<18x16x4xf32> to vector<288x4xf32>
    %c1_i32_9 = arith.constant 1 : i32
    %21 = arith.addi %1, %c1_i32_9 : i32
    %22 = arith.index_cast %21 : i32 to index
    %c1_10 = arith.constant 1 : index
    %c0_11 = arith.constant 0 : index
    %23 = vector.load %arg8[%22, %c1_10, %c0_11] : memref<20x18x4xf32, #tpu.memory_space<vmem>>, vector<18x16x4xf32>
    %24 = vector.shape_cast %23 : vector<18x16x4xf32> to vector<288x4xf32>
    %c1_i32_12 = arith.constant 1 : i32
    %25 = arith.addi %1, %c1_i32_12 : i32
    %26 = arith.index_cast %25 : i32 to index
    %c2_13 = arith.constant 2 : index
    %c0_14 = arith.constant 0 : index
    %27 = vector.load %arg8[%26, %c2_13, %c0_14] : memref<20x18x4xf32, #tpu.memory_space<vmem>>, vector<18x16x4xf32>
    %28 = vector.shape_cast %27 : vector<18x16x4xf32> to vector<288x4xf32>
    %c2_i32 = arith.constant 2 : i32
    %29 = arith.addi %1, %c2_i32 : i32
    %30 = arith.index_cast %29 : i32 to index
    %c0_15 = arith.constant 0 : index
    %c0_16 = arith.constant 0 : index
    %31 = vector.load %arg8[%30, %c0_15, %c0_16] : memref<20x18x4xf32, #tpu.memory_space<vmem>>, vector<18x16x4xf32>
    %32 = vector.shape_cast %31 : vector<18x16x4xf32> to vector<288x4xf32>
    %c2_i32_17 = arith.constant 2 : i32
    %33 = arith.addi %1, %c2_i32_17 : i32
    %34 = arith.index_cast %33 : i32 to index
    %c1_18 = arith.constant 1 : index
    %c0_19 = arith.constant 0 : index
    %35 = vector.load %arg8[%34, %c1_18, %c0_19] : memref<20x18x4xf32, #tpu.memory_space<vmem>>, vector<18x16x4xf32>
    %36 = vector.shape_cast %35 : vector<18x16x4xf32> to vector<288x4xf32>
    %c2_i32_20 = arith.constant 2 : i32
    %37 = arith.addi %1, %c2_i32_20 : i32
    %38 = arith.index_cast %37 : i32 to index
    %c2_21 = arith.constant 2 : index
    %c0_22 = arith.constant 0 : index
    %39 = vector.load %arg8[%38, %c2_21, %c0_22] : memref<20x18x4xf32, #tpu.memory_space<vmem>>, vector<18x16x4xf32>
    %40 = vector.shape_cast %39 : vector<18x16x4xf32> to vector<288x4xf32>
    %41 = tpu.concatenate %8, %12, %16, %20, %24, %28, %32, %36, %40 in 1 : vector<288x4xf32>, vector<288x4xf32>, vector<288x4xf32>, vector<288x4xf32>, vector<288x4xf32>, vector<288x4xf32>, vector<288x4xf32>, vector<288x4xf32>, vector<288x4xf32> -> vector<288x36xf32>
    %c0_23 = arith.constant 0 : index
    %c0_24 = arith.constant 0 : index
    %42 = vector.load %arg3[%c0_23, %c0_24] : memref<36x4xf32, #tpu.memory_space<vmem>>, vector<36x4xf32>
    %cst = arith.constant dense<0.000000e+00> : vector<288x4xf32>
    %43 = tpu.matmul %41, %42, %cst {dimension_numbers = #tpu.dot_dimension_numbers<[1], [0], [0], [1], [0, 0, 1, 1], [], []>} : vector<288x36xf32>, vector<36x4xf32>, vector<288x4xf32> -> vector<288x4xf32>
    %c0_25 = arith.constant 0 : index
    %c0_26 = arith.constant 0 : index
    %44 = vector.load %arg4[%c0_25, %c0_26] : memref<1x4xf32, #tpu.memory_space<vmem>>, vector<1x4xf32>
    %45 = vector.broadcast %44 : vector<1x4xf32> to vector<288x4xf32>
    %46 = arith.addf %43, %45 : vector<288x4xf32>
    %cst_27 = arith.constant 0.000000e+00 : f32
    %47 = vector.broadcast %cst_27 : f32 to vector<288x4xf32>
    %48 = arith.maximumf %46, %47 : vector<288x4xf32>
    %49 = vector.shape_cast %48 : vector<288x4xf32> to vector<18x16x4xf32>
    %c0_28 = arith.constant 0 : index
    %c1_29 = arith.constant 1 : index
    %c0_30 = arith.constant 0 : index
    %50 = vector.load %arg9[%c0_28, %c1_29, %c0_30] : memref<18x18x4xf32, #tpu.memory_space<vmem>>, vector<18x16x4xf32>
    tpu.vector_store %arg9[%c0_28, %c1_29, %c0_30], %49 {strides = array<i32>} : memref<18x18x4xf32, #tpu.memory_space<vmem>>, vector<18x16x4xf32>,
    %c0_i32_31 = arith.constant 0 : i32
    %51 = arith.cmpi eq, %arg1, %c0_i32_31 : i32
    %52 = arith.extui %51 : i1 to i32
    %c0_i32_32 = arith.constant 0 : i32
    %53 = arith.cmpi ne, %52, %c0_i32_32 : i32
    scf.if %53 {
      %cst_74 = arith.constant 0.000000e+00 : f32
      %91 = vector.broadcast %cst_74 : f32 to vector<1x16x4xf32>
      %c0_75 = arith.constant 0 : index
      %c1_76 = arith.constant 1 : index
      %c0_77 = arith.constant 0 : index
      %92 = vector.load %arg9[%c0_75, %c1_76, %c0_77] : memref<18x18x4xf32, #tpu.memory_space<vmem>>, vector<1x16x4xf32>
      tpu.vector_store %arg9[%c0_75, %c1_76, %c0_77], %91 {strides = array<i32>} : memref<18x18x4xf32, #tpu.memory_space<vmem>>, vector<1x16x4xf32>,
    } else {
    }
    %c0_i32_33 = arith.constant 0 : i32
    %54 = arith.cmpi eq, %arg1, %c0_i32_33 : i32
    %55 = arith.extui %54 : i1 to i32
    %c0_i32_34 = arith.constant 0 : i32
    %56 = arith.cmpi ne, %55, %c0_i32_34 : i32
    scf.if %56 {
      %cst_74 = arith.constant 0.000000e+00 : f32
      %91 = vector.broadcast %cst_74 : f32 to vector<1x16x4xf32>
      %c17 = arith.constant 17 : index
      %c1_75 = arith.constant 1 : index
      %c0_76 = arith.constant 0 : index
      %92 = vector.load %arg9[%c17, %c1_75, %c0_76] : memref<18x18x4xf32, #tpu.memory_space<vmem>>, vector<1x16x4xf32>
      tpu.vector_store %arg9[%c17, %c1_75, %c0_76], %91 {strides = array<i32>} : memref<18x18x4xf32, #tpu.memory_space<vmem>>, vector<1x16x4xf32>,
    } else {
    }
    %c0_35 = arith.constant 0 : index
    %c0_36 = arith.constant 0 : index
    %c0_37 = arith.constant 0 : index
    %57 = vector.load %arg9[%c0_35, %c0_36, %c0_37] : memref<18x18x4xf32, #tpu.memory_space<vmem>>, vector<16x16x4xf32>
    %58 = vector.shape_cast %57 : vector<16x16x4xf32> to vector<256x4xf32>
    %c0_38 = arith.constant 0 : index
    %c1_39 = arith.constant 1 : index
    %c0_40 = arith.constant 0 : index
    %59 = vector.load %arg9[%c0_38, %c1_39, %c0_40] : memref<18x18x4xf32, #tpu.memory_space<vmem>>, vector<16x16x4xf32>
    %60 = vector.shape_cast %59 : vector<16x16x4xf32> to vector<256x4xf32>
    %c0_41 = arith.constant 0 : index
    %c2_42 = arith.constant 2 : index
    %c0_43 = arith.constant 0 : index
    %61 = vector.load %arg9[%c0_41, %c2_42, %c0_43] : memref<18x18x4xf32, #tpu.memory_space<vmem>>, vector<16x16x4xf32>
    %62 = vector.shape_cast %61 : vector<16x16x4xf32> to vector<256x4xf32>
    %c1_44 = arith.constant 1 : index
    %c0_45 = arith.constant 0 : index
    %c0_46 = arith.constant 0 : index
    %63 = vector.load %arg9[%c1_44, %c0_45, %c0_46] : memref<18x18x4xf32, #tpu.memory_space<vmem>>, vector<16x16x4xf32>
    %64 = vector.shape_cast %63 : vector<16x16x4xf32> to vector<256x4xf32>
    %c1_47 = arith.constant 1 : index
    %c1_48 = arith.constant 1 : index
    %c0_49 = arith.constant 0 : index
    %65 = vector.load %arg9[%c1_47, %c1_48, %c0_49] : memref<18x18x4xf32, #tpu.memory_space<vmem>>, vector<16x16x4xf32>
    %66 = vector.shape_cast %65 : vector<16x16x4xf32> to vector<256x4xf32>
    %c1_50 = arith.constant 1 : index
    %c2_51 = arith.constant 2 : index
    %c0_52 = arith.constant 0 : index
    %67 = vector.load %arg9[%c1_50, %c2_51, %c0_52] : memref<18x18x4xf32, #tpu.memory_space<vmem>>, vector<16x16x4xf32>
    %68 = vector.shape_cast %67 : vector<16x16x4xf32> to vector<256x4xf32>
    %c2_53 = arith.constant 2 : index
    %c0_54 = arith.constant 0 : index
    %c0_55 = arith.constant 0 : index
    %69 = vector.load %arg9[%c2_53, %c0_54, %c0_55] : memref<18x18x4xf32, #tpu.memory_space<vmem>>, vector<16x16x4xf32>
    %70 = vector.shape_cast %69 : vector<16x16x4xf32> to vector<256x4xf32>
    %c2_56 = arith.constant 2 : index
    %c1_57 = arith.constant 1 : index
    %c0_58 = arith.constant 0 : index
    %71 = vector.load %arg9[%c2_56, %c1_57, %c0_58] : memref<18x18x4xf32, #tpu.memory_space<vmem>>, vector<16x16x4xf32>
    %72 = vector.shape_cast %71 : vector<16x16x4xf32> to vector<256x4xf32>
    %c2_59 = arith.constant 2 : index
    %c2_60 = arith.constant 2 : index
    %c0_61 = arith.constant 0 : index
    %73 = vector.load %arg9[%c2_59, %c2_60, %c0_61] : memref<18x18x4xf32, #tpu.memory_space<vmem>>, vector<16x16x4xf32>
    %74 = vector.shape_cast %73 : vector<16x16x4xf32> to vector<256x4xf32>
    %75 = tpu.concatenate %58, %60, %62, %64, %66, %68, %70, %72, %74 in 1 : vector<256x4xf32>, vector<256x4xf32>, vector<256x4xf32>, vector<256x4xf32>, vector<256x4xf32>, vector<256x4xf32>, vector<256x4xf32>, vector<256x4xf32>, vector<256x4xf32> -> vector<256x36xf32>
    %c0_62 = arith.constant 0 : index
    %c0_63 = arith.constant 0 : index
    %76 = vector.load %arg5[%c0_62, %c0_63] : memref<36x4xf32, #tpu.memory_space<vmem>>, vector<36x4xf32>
    %cst_64 = arith.constant dense<0.000000e+00> : vector<256x4xf32>
    %77 = tpu.matmul %75, %76, %cst_64 {dimension_numbers = #tpu.dot_dimension_numbers<[1], [0], [0], [1], [0, 0, 1, 1], [], []>} : vector<256x36xf32>, vector<36x4xf32>, vector<256x4xf32> -> vector<256x4xf32>
    %c0_65 = arith.constant 0 : index
    %c0_66 = arith.constant 0 : index
    %78 = vector.load %arg6[%c0_65, %c0_66] : memref<1x4xf32, #tpu.memory_space<vmem>>, vector<1x4xf32>
    %79 = vector.broadcast %78 : vector<1x4xf32> to vector<256x4xf32>
    %80 = arith.addf %77, %79 : vector<256x4xf32>
    %cst_67 = arith.constant 0.000000e+00 : f32
    %81 = vector.broadcast %cst_67 : f32 to vector<256x4xf32>
    %82 = arith.maximumf %80, %81 : vector<256x4xf32>
    %c0_68 = arith.constant 0 : index
    %83 = arith.index_cast %1 : i32 to index
    %c0_69 = arith.constant 0 : index
    %c0_70 = arith.constant 0 : index
    %84 = vector.load %arg2[%c0_68, %83, %c0_69, %c0_70] : memref<1x16x16x4xf32, #tpu.memory_space<vmem>>, vector<1x16x16x4xf32>
    %85 = vector.shape_cast %84 : vector<1x16x16x4xf32> to vector<16x16x4xf32>
    %86 = vector.shape_cast %85 : vector<16x16x4xf32> to vector<256x4xf32>
    %87 = arith.addf %82, %86 : vector<256x4xf32>
    %c0_71 = arith.constant 0 : index
    %c0_72 = arith.constant 0 : index
    %c0_73 = arith.constant 0 : index
    %88 = vector.load %arg7[%c0_71, %c0_72, %c0_73] : memref<1x256x4xf32, #tpu.memory_space<vmem>>, vector<1x256x4xf32>
    %89 = vector.shape_cast %88 : vector<1x256x4xf32> to vector<256x4xf32>
    %90 = vector.shape_cast %87 : vector<256x4xf32> to vector<1x256x4xf32>
    tpu.vector_store %arg7[%c0_71, %c0_72, %c0_73], %90 {strides = array<i32>} : memref<1x256x4xf32, #tpu.memory_space<vmem>>, vector<1x256x4xf32>,
    return
  }
  func.func @transform_0(%arg0: i32, %arg1: i32) -> (i32, i32, i32, i32) {
    %c0_i32 = arith.constant 0 : i32
    %c0_i32_0 = arith.constant 0 : i32
    %c0_i32_1 = arith.constant 0 : i32
    %c0_i32_2 = arith.constant 0 : i32
    return %arg0, %c0_i32, %c0_i32_0, %c0_i32_1 : i32, i32, i32, i32
  }
  func.func @transform_1(%arg0: i32, %arg1: i32) -> (i32, i32) {
    %c0_i32 = arith.constant 0 : i32
    %c0_i32_0 = arith.constant 0 : i32
    %c0_i32_1 = arith.constant 0 : i32
    return %c0_i32, %c0_i32_0 : i32, i32
  }
  func.func @transform_2(%arg0: i32, %arg1: i32) -> (i32, i32) {
    %c0_i32 = arith.constant 0 : i32
    %c0_i32_0 = arith.constant 0 : i32
    %c0_i32_1 = arith.constant 0 : i32
    return %c0_i32, %c0_i32_0 : i32, i32
  }
  func.func @transform_3(%arg0: i32, %arg1: i32) -> (i32, i32) {
    %c0_i32 = arith.constant 0 : i32
    %c0_i32_0 = arith.constant 0 : i32
    %c0_i32_1 = arith.constant 0 : i32
    return %c0_i32, %c0_i32_0 : i32, i32
  }
  func.func @transform_4(%arg0: i32, %arg1: i32) -> (i32, i32) {
    %c0_i32 = arith.constant 0 : i32
    %c0_i32_0 = arith.constant 0 : i32
    %c0_i32_1 = arith.constant 0 : i32
    return %c0_i32, %c0_i32_0 : i32, i32
  }
  func.func @transform_5(%arg0: i32, %arg1: i32) -> (i32, i32, i32) {
    %c0_i32 = arith.constant 0 : i32
    %c0_i32_0 = arith.constant 0 : i32
    return %arg0, %arg1, %c0_i32 : i32, i32, i32
  }
}

</mosaic_0001>

<bundles_post_ra>
// kernel: bottlerep_forward.1
= control target key start
LH: loop header
LB: loop body
LE: loop exit
PB: predicated region body
PF: predicated region fallthrough
CT: control target
= control target key end

     0   :  { %s5421_s18 = smov 0   ;;  %s5423_s19 = smov 0   ;;  %s8736_s0 = inlined_call_operand.vmem [shape: f32[2,16,16,4], index: 0, kind: input, shape index: {}]   ;;  %s8737_s1 = inlined_call_operand.vmem [shape: f32[36,4], index: 1, kind: input, shape index: {}]   ;;  %s8738_s2 = inlined_call_operand.vmem [shape: f32[1,4], index: 2, kind: input, shape index: {}]   ;;  %s8739_s3 = inlined_call_operand.vmem [shape: f32[36,4], index: 3, kind: input, shape index: {}]   ;;  %s8740_s4 = inlined_call_operand.vmem [shape: f32[1,4], index: 4, kind: input, shape index: {}]   ;;  %s8741_s5 = inlined_call_operand.vmem [shape: f32[2,256,4], index: 5, kind: output, shape index: {}]  }
   0x1   :  { %s5425_s20 = smov 0  }
   0x2 LB: > { %s27_s21 = sadd.s32 1, %s5376_s19  ;;  %p4773_p0 = scmp.ge.s32.totalorder %s5380_s20, 1  ;;  %s5380_s20 = sphi %s5425_s20, %s15_s20   ;;  %s5376_s19 = sphi %s5423_s19, %s9355_s19   ;;  %s5372_s18 = sphi %s5421_s18, %s9354_s18  }
   0x3   : > { %p29_p1 = scmp.ge.s32.totalorder %s27_s21, 2  ;;  %p201_p2 = scmp.lt.s32.totalorder %s5380_s20, 3 }
   0x5   : > { %s9357_s21 = smov (%p29_p1, %s27_s21), 0  ;;  %p202_p3 = pnand %p4773_p0, %p201_p2 }
   0x7   : > { %205 = sbr.rel (%p202_p3) target bundleno = 1742 (0x6ce), region = 40 }
   0xe   : > { %vm253_vm0 = vcmask 31744   ;;  %vm256_vm1 = vcmask 25600   ;;  %p233_p4 = scmp.lt.s32.totalorder %s5372_s18, 1  ;;  %vm268_vm2 = vcmask 24576   ;;  %v8742_v0 = vmov 0.0   ;;  %s5383_s26 = smov 4  }
   0xf   : > { %258 = vst.msk [vmem:[#allocation2 + $0x18] sm:$0xff] %vm253_vm0, %v8742_v0  ;;  %259 = vst.msk [vmem:[#allocation2 + $0x20] sm:$0xff] %vm253_vm0, %v8742_v0  ;;  %s5384_s27 = smov 8   ;;  %s5385_s28 = smov 12   ;;  %vm2311_vm3 = vcmask 1043456   ;;  %vm1931_vm4 = vcmask 64512  }
  0x10   : > { %254 = vst.msk [vmem:[#allocation2] sm:$0xff] %vm253_vm0, %v8742_v0  ;;  %255 = vst.msk [vmem:[#allocation2 + $0x8] sm:$0xff] %vm253_vm0, %v8742_v0  ;;  %s9359_s18 = smov (!%p233_p4, %s5372_s18), 1  ;;  %s5386_s29 = smov 16   ;;  %vm1968_vm5 = vcmask 97280   ;;  %vm2005_vm6 = vcmask 130048  }
  0x11   : > { %262 = vst.msk [vmem:[#allocation2 + $0x1b0] sm:$0xff] %vm253_vm0, %v8742_v0  ;;  %263 = vst.msk [vmem:[#allocation2 + $0x1b8] sm:$0xff] %vm253_vm0, %v8742_v0  ;;  %s5068_s22 = sshll.u32 %s9359_s18, 8  ;;  %s5387_s30 = smov 20   ;;  %vm2042_vm7 = vcmask 162816   ;;  %vm2079_vm8 = vcmask 195584  }
  0x12   : > { %265 = vst.msk [vmem:[#allocation2 + $0x1c8] sm:$0xff] %vm253_vm0, %v8742_v0  ;;  %266 = vst.msk [vmem:[#allocation2 + $0x1d0] sm:$0xff] %vm253_vm0, %v8742_v0  ;;  %s5625_s25 = scalar_lea.vmem %s8736_s0, %s5068_s22  ;;  %s5388_s6 = smov 24   ;;  %vm2116_vm9 = vcmask 228352   ;;  %vm2153_vm10 = vcmask 261120   ;;  %vm2202_vm11 = vcmask 293888  }
  0x13   : > { %260 = vst.msk [vmem:[#allocation2 + $0x28] sm:$0x3] %vm256_vm1, %v8742_v0  ;;  %257 = vst.msk [vmem:[#allocation2 + $0x10] sm:$0x3] %vm256_vm1, %v8742_v0  ;;  %v310_v1 = vld [vmem:[%s5625_s25 + $0x8] sm:$0xff]  ;;  %v309_v2 = vld [vmem:[%s5625_s25] sm:$0xff] }
  0x14   : > { %264 = vst.msk [vmem:[#allocation2 + $0x1c0] sm:$0x3] %vm256_vm1, %v8742_v0  ;;  %267 = vst.msk [vmem:[#allocation2 + $0x1d8] sm:$0x3] %vm256_vm1, %v8742_v0  ;;  %v312_v3 = vld [vmem:[%s5625_s25 + $0x18] sm:$0xff]  ;;  %v311_v4 = vld [vmem:[%s5625_s25 + $0x10] sm:$0xff] }
  0x15   : > { %271 = vst.msk [vmem:[#allocation2 + $0x30] sm:$0x1] %vm268_vm2, %v8742_v0  ;;  %272 = vst.msk [vmem:[#allocation2 + $0x48] sm:$0x1] %vm268_vm2, %v8742_v0  ;;  %v314_v5 = vld [vmem:[%s5625_s25 + $0x28] sm:$0xff]  ;;  %v313_v6 = vld [vmem:[%s5625_s25 + $0x20] sm:$0xff] }
  0x16   : > { %273 = vst.msk [vmem:[#allocation2 + $0x60] sm:$0x1] %vm268_vm2, %v8742_v0  ;;  %274 = vst.msk [vmem:[#allocation2 + $0x78] sm:$0x1] %vm268_vm2, %v8742_v0  ;;  %v450_v7 = vld [vmem:[#allocation2 + $0x19] sm:$0xff]  ;;  %v315_v12 = vld [vmem:[%s5625_s25 + $0x30] sm:$0xff] }
  0x17   : > { %275 = vst.msk [vmem:[#allocation2 + $0x90] sm:$0x1] %vm268_vm2, %v8742_v0  ;;  %276 = vst.msk [vmem:[#allocation2 + $0xa8] sm:$0x1] %vm268_vm2, %v8742_v0  ;;  %v448_v8 = vld [vmem:[#allocation2 + $0x1] sm:$0xff]  ;;  %782 = vrot.lane.b32.xlu1 %v450_v7, %s5383_s26  ;;  %v316_v11 = vld [vmem:[%s5625_s25 + $0x38] sm:$0xff] }
  0x18   : > { %277 = vst.msk [vmem:[#allocation2 + $0xc0] sm:$0x1] %vm268_vm2, %v8742_v0  ;;  %278 = vst.msk [vmem:[#allocation2 + $0xd8] sm:$0x1] %vm268_vm2, %v8742_v0  ;;  %778 = vrot.lane.b32.xlu0 %v448_v8, %s5383_s26  ;;  %v318_v13 = vld [vmem:[%s5625_s25 + $0x48] sm:$0xff]  ;;  %v317_v14 = vld [vmem:[%s5625_s25 + $0x40] sm:$0xff] }
  0x19   : > { %279 = vst.msk [vmem:[#allocation2 + $0xf0] sm:$0x1] %vm268_vm2, %v8742_v0  ;;  %280 = vst.msk [vmem:[#allocation2 + $0x108] sm:$0x1] %vm268_vm2, %v8742_v0  ;;  %v320_v15 = vld [vmem:[%s5625_s25 + $0x58] sm:$0xff]  ;;  %v319_v16 = vld [vmem:[%s5625_s25 + $0x50] sm:$0xff] }
  0x1a   : > { %281 = vst.msk [vmem:[#allocation2 + $0x120] sm:$0x1] %vm268_vm2, %v8742_v0  ;;  %282 = vst.msk [vmem:[#allocation2 + $0x138] sm:$0x1] %vm268_vm2, %v8742_v0  ;;  %v5636_v9 = vld [vmem:[#allocation2 + $0x21] sm:$0xff]  ;;  %v449_v10 = vld [vmem:[#allocation2 + $0x9] sm:$0xff] }
  0x1b   : > { %283 = vst.msk [vmem:[#allocation2 + $0x150] sm:$0x1] %vm268_vm2, %v8742_v0  ;;  %284 = vst.msk [vmem:[#allocation2 + $0x168] sm:$0x1] %vm268_vm2, %v8742_v0  ;;  %v322_v17 = vld [vmem:[%s5625_s25 + $0x68] sm:$0xff]  ;;  %v321_v18 = vld [vmem:[%s5625_s25 + $0x60] sm:$0xff]  ;;  %784 = vrot.lane.b32.xlu1 %v5636_v9, %s5383_s26 }
  0x1c   : > { %285 = vst.msk [vmem:[#allocation2 + $0x180] sm:$0x1] %vm268_vm2, %v8742_v0  ;;  %286 = vst.msk [vmem:[#allocation2 + $0x198] sm:$0x1] %vm268_vm2, %v8742_v0  ;;  %v324_v19 = vld [vmem:[%s5625_s25 + $0x78] sm:$0xff]  ;;  %v323_v20 = vld [vmem:[%s5625_s25 + $0x70] sm:$0xff]  ;;  %780 = vrot.lane.b32.xlu0 %v449_v10, %s5383_s26 }
  0x1d   : > { %291 = vst.msk [vmem:[#allocation2 + $0x41] sm:$0x1] %vm268_vm2, %v8742_v0  ;;  %292 = vst.msk [vmem:[#allocation2 + $0x59] sm:$0x1] %vm268_vm2, %v8742_v0  ;;  %v326_v21 = vld [vmem:[%s5625_s25 + $0x88] sm:$0xff]  ;;  %v325_v22 = vld [vmem:[%s5625_s25 + $0x80] sm:$0xff] }
  0x1e   : > { %293 = vst.msk [vmem:[#allocation2 + $0x71] sm:$0x1] %vm268_vm2, %v8742_v0  ;;  %294 = vst.msk [vmem:[#allocation2 + $0x89] sm:$0x1] %vm268_vm2, %v8742_v0  ;;  %v328_v23 = vld [vmem:[%s5625_s25 + $0x98] sm:$0xff]  ;;  %v327_v26 = vld [vmem:[%s5625_s25 + $0x90] sm:$0xff] }
  0x1f   : > { %295 = vst.msk [vmem:[#allocation2 + $0xa1] sm:$0x1] %vm268_vm2, %v8742_v0  ;;  %296 = vst.msk [vmem:[#allocation2 + $0xb9] sm:$0x1] %vm268_vm2, %v8742_v0  ;;  %v330_v27 = vld [vmem:[%s5625_s25 + $0xa8] sm:$0xff]  ;;  %v329_v28 = vld [vmem:[%s5625_s25 + $0xa0] sm:$0xff] }
  0x20   : > { %297 = vst.msk [vmem:[#allocation2 + $0xd1] sm:$0x1] %vm268_vm2, %v8742_v0  ;;  %298 = vst.msk [vmem:[#allocation2 + $0xe9] sm:$0x1] %vm268_vm2, %v8742_v0  ;;  %v332_v29 = vld [vmem:[%s5625_s25 + $0xb8] sm:$0xff]  ;;  %v331_v34 = vld [vmem:[%s5625_s25 + $0xb0] sm:$0xff] }
  0x21   : > { %299 = vst.msk [vmem:[#allocation2 + $0x101] sm:$0x1] %vm268_vm2, %v8742_v0  ;;  %300 = vst.msk [vmem:[#allocation2 + $0x119] sm:$0x1] %vm268_vm2, %v8742_v0  ;;  %v334_v35 = vld [vmem:[%s5625_s25 + $0xc8] sm:$0xff]  ;;  %v333_v36 = vld [vmem:[%s5625_s25 + $0xc0] sm:$0xff] }
  0x22   : > { %301 = vst.msk [vmem:[#allocation2 + $0x131] sm:$0x1] %vm268_vm2, %v8742_v0  ;;  %302 = vst.msk [vmem:[#allocation2 + $0x149] sm:$0x1] %vm268_vm2, %v8742_v0  ;;  %v336_v37 = vld [vmem:[%s5625_s25 + $0xd8] sm:$0xff]  ;;  %v335_v38 = vld [vmem:[%s5625_s25 + $0xd0] sm:$0xff] }
  0x23   : > { %303 = vst.msk [vmem:[#allocation2 + $0x161] sm:$0x1] %vm268_vm2, %v8742_v0  ;;  %304 = vst.msk [vmem:[#allocation2 + $0x179] sm:$0x1] %vm268_vm2, %v8742_v0  ;;  %v338_v39 = vld [vmem:[%s5625_s25 + $0xe8] sm:$0xff]  ;;  %v337_v40 = vld [vmem:[%s5625_s25 + $0xe0] sm:$0xff] }
  0x24   : > { %305 = vst.msk [vmem:[#allocation2 + $0x191] sm:$0x1] %vm268_vm2, %v8742_v0  ;;  %306 = vst.msk [vmem:[#allocation2 + $0x1a9] sm:$0x1] %vm268_vm2, %v8742_v0  ;;  %v340_v41 = vld [vmem:[%s5625_s25 + $0xf8] sm:$0xff]  ;;  %v339_v42 = vld [vmem:[%s5625_s25 + $0xf0] sm:$0xff] }
  0x25   : > { %374 = vst.msk [vmem:[#allocation3] sm:$0x1] %vm268_vm2, %v8742_v0  ;;  %375 = vst.msk [vmem:[#allocation3 + $0x18] sm:$0x1] %vm268_vm2, %v8742_v0  ;;  %v484_v7 = vld [vmem:[#allocation2 + $0x2] sm:$0xff]  ;;  %v5830_v10 = vld [vmem:[#allocation2 + $0x1a] sm:$0xff] }
  0x26   : > { %376 = vst.msk [vmem:[#allocation3 + $0x30] sm:$0x1] %vm268_vm2, %v8742_v0  ;;  %377 = vst.msk [vmem:[#allocation3 + $0x48] sm:$0x1] %vm268_vm2, %v8742_v0  ;;  %s5389_s9 = smov 28   ;;  %s5390_s23 = smov 32  }
  0x27   : > { %378 = vst.msk [vmem:[#allocation3 + $0x60] sm:$0x1] %vm268_vm2, %v8742_v0  ;;  %379 = vst.msk [vmem:[#allocation3 + $0x78] sm:$0x1] %vm268_vm2, %v8742_v0 }
  0x28   : > { %380 = vst.msk [vmem:[#allocation3 + $0x90] sm:$0x1] %vm268_vm2, %v8742_v0  ;;  %381 = vst.msk [vmem:[#allocation3 + $0xa8] sm:$0x1] %vm268_vm2, %v8742_v0 }
  0x29   : > { %382 = vst.msk [vmem:[#allocation3 + $0xc0] sm:$0x1] %vm268_vm2, %v8742_v0  ;;  %383 = vst.msk [vmem:[#allocation3 + $0xd8] sm:$0x1] %vm268_vm2, %v8742_v0 }
  0x2a   : > { %384 = vst.msk [vmem:[#allocation3 + $0xf0] sm:$0x1] %vm268_vm2, %v8742_v0  ;;  %385 = vst.msk [vmem:[#allocation3 + $0x108] sm:$0x1] %vm268_vm2, %v8742_v0 }
  0x2b   : > { %386 = vst.msk [vmem:[#allocation3 + $0x120] sm:$0x1] %vm268_vm2, %v8742_v0  ;;  %387 = vst.msk [vmem:[#allocation3 + $0x138] sm:$0x1] %vm268_vm2, %v8742_v0 }
  0x2c   : > { %388 = vst.msk [vmem:[#allocation3 + $0x150] sm:$0x1] %vm268_vm2, %v8742_v0  ;;  %389 = vst.msk [vmem:[#allocation3 + $0x168] sm:$0x1] %vm268_vm2, %v8742_v0 }
  0x2d   : > { %390 = vst.msk [vmem:[#allocation3 + $0x180] sm:$0x1] %vm268_vm2, %v8742_v0  ;;  %391 = vst.msk [vmem:[#allocation3 + $0x198] sm:$0x1] %vm268_vm2, %v8742_v0 }
  0x2e   : > { %392 = vst.msk [vmem:[#allocation3 + $0x11] sm:$0x1] %vm268_vm2, %v8742_v0  ;;  %393 = vst.msk [vmem:[#allocation3 + $0x29] sm:$0x1] %vm268_vm2, %v8742_v0 }
  0x2f   : > { %394 = vst.msk [vmem:[#allocation3 + $0x41] sm:$0x1] %vm268_vm2, %v8742_v0  ;;  %395 = vst.msk [vmem:[#allocation3 + $0x59] sm:$0x1] %vm268_vm2, %v8742_v0 }
  0x30   : > { %396 = vst.msk [vmem:[#allocation3 + $0x71] sm:$0x1] %vm268_vm2, %v8742_v0  ;;  %397 = vst.msk [vmem:[#allocation3 + $0x89] sm:$0x1] %vm268_vm2, %v8742_v0 }
  0x31   : > { %398 = vst.msk [vmem:[#allocation3 + $0xa1] sm:$0x1] %vm268_vm2, %v8742_v0  ;;  %399 = vst.msk [vmem:[#allocation3 + $0xb9] sm:$0x1] %vm268_vm2, %v8742_v0 }
  0x32   : > { %400 = vst.msk [vmem:[#allocation3 + $0xd1] sm:$0x1] %vm268_vm2, %v8742_v0  ;;  %401 = vst.msk [vmem:[#allocation3 + $0xe9] sm:$0x1] %vm268_vm2, %v8742_v0 }
  0x33   : > { %402 = vst.msk [vmem:[#allocation3 + $0x101] sm:$0x1] %vm268_vm2, %v8742_v0  ;;  %403 = vst.msk [vmem:[#allocation3 + $0x119] sm:$0x1] %vm268_vm2, %v8742_v0 }
  0x34   : > { %404 = vst.msk [vmem:[#allocation3 + $0x131] sm:$0x1] %vm268_vm2, %v8742_v0  ;;  %405 = vst.msk [vmem:[#allocation3 + $0x149] sm:$0x1] %vm268_vm2, %v8742_v0 }
  0x35   : > { %406 = vst.msk [vmem:[#allocation3 + $0x161] sm:$0x1] %vm268_vm2, %v8742_v0  ;;  %407 = vst.msk [vmem:[#allocation3 + $0x179] sm:$0x1] %vm268_vm2, %v8742_v0 }
  0x36   : > { %408 = vst.msk [vmem:[#allocation3 + $0x191] sm:$0x1] %vm268_vm2, %v8742_v0  ;;  %409 = vst.msk [vmem:[#allocation3 + $0x1a9] sm:$0x1] %vm268_vm2, %v8742_v0 }
  0x37   : > { %289 = vst.msk [vmem:[#allocation2 + $0x11] sm:$0x1] %vm268_vm2, %v8742_v0  ;;  %269 = vst.msk [vmem:[#allocation2] sm:$0x1] %vm268_vm2, %v8742_v0 }
  0x38   : > { %270 = vst.msk [vmem:[#allocation2 + $0x18] sm:$0x1] %vm268_vm2, %v8742_v0  ;;  %287 = vst.msk [vmem:[#allocation2 + $0x1b0] sm:$0x1] %vm268_vm2, %v8742_v0 }
  0x39   : > { %288 = vst.msk [vmem:[#allocation2 + $0x1c8] sm:$0x1] %vm268_vm2, %v8742_v0  ;;  %290 = vst.msk [vmem:[#allocation2 + $0x29] sm:$0x1] %vm268_vm2, %v8742_v0 }
  0x3a   : > { %307 = vst.msk [vmem:[#allocation2 + $0x1c1] sm:$0x1] %vm268_vm2, %v8742_v0  ;;  %308 = vst.msk [vmem:[#allocation2 + $0x1d9] sm:$0x1] %vm268_vm2, %v8742_v0 }
  0x3b   : > { %343 = vst.msk [vmem:[#allocation2 + $0x39] sm:$0xff] %vm253_vm0, %v310_v1  ;;  %342 = vst.msk [vmem:[#allocation2 + $0x31] sm:$0xff] %vm253_vm0, %v309_v2 }
  0x3c   : > { %345 = vst.msk [vmem:[#allocation2 + $0x51] sm:$0xff] %vm253_vm0, %v312_v3  ;;  %344 = vst.msk [vmem:[#allocation2 + $0x49] sm:$0xff] %vm253_vm0, %v311_v4 }
  0x3d   : > { %347 = vst.msk [vmem:[#allocation2 + $0x69] sm:$0xff] %vm253_vm0, %v314_v5  ;;  %346 = vst.msk [vmem:[#allocation2 + $0x61] sm:$0xff] %vm253_vm0, %v313_v6 }
  0x3e   : > { %349 = vst.msk [vmem:[#allocation2 + $0x81] sm:$0xff] %vm253_vm0, %v316_v11  ;;  %348 = vst.msk [vmem:[#allocation2 + $0x79] sm:$0xff] %vm253_vm0, %v315_v12  ;;  %v485_v6 = vld [vmem:[#allocation2 + $0xa] sm:$0xff] }
  0x3f   : > { %351 = vst.msk [vmem:[#allocation2 + $0x99] sm:$0xff] %vm253_vm0, %v318_v13  ;;  %350 = vst.msk [vmem:[#allocation2 + $0x91] sm:$0xff] %vm253_vm0, %v317_v14 }
  0x40   : > { %353 = vst.msk [vmem:[#allocation2 + $0xb1] sm:$0xff] %vm253_vm0, %v320_v15  ;;  %352 = vst.msk [vmem:[#allocation2 + $0xa9] sm:$0xff] %vm253_vm0, %v319_v16  ;;  %v5828_v8 = vld [vmem:[#allocation2 + $0x22] sm:$0xff] }
  0x41   : > { %355 = vst.msk [vmem:[#allocation2 + $0xc9] sm:$0xff] %vm253_vm0, %v322_v17  ;;  %354 = vst.msk [vmem:[#allocation2 + $0xc1] sm:$0xff] %vm253_vm0, %v321_v18 }
  0x42   : > { %357 = vst.msk [vmem:[#allocation2 + $0xe1] sm:$0xff] %vm253_vm0, %v324_v19  ;;  %356 = vst.msk [vmem:[#allocation2 + $0xd9] sm:$0xff] %vm253_vm0, %v323_v20  ;;  %v5670_v24 = vld [vmem:[#allocation2 + $0x39] sm:$0xff]  ;;  %v5672_v25 = vld [vmem:[#allocation2 + $0x31] sm:$0xff] }
  0x43   : > { %359 = vst.msk [vmem:[#allocation2 + $0xf9] sm:$0xff] %vm253_vm0, %v326_v21  ;;  %358 = vst.msk [vmem:[#allocation2 + $0xf1] sm:$0xff] %vm253_vm0, %v325_v22  ;;  %788 = vrot.lane.b32.xlu1 %v5670_v24, %s5383_s26  ;;  %786 = vrot.lane.b32.xlu0 %v5672_v25, %s5383_s26  ;;  %v5687_v30 = vld [vmem:[#allocation2 + $0x51] sm:$0xff]  ;;  %v5689_v31 = vld [vmem:[#allocation2 + $0x49] sm:$0xff] }
  0x44   : > { %361 = vst.msk [vmem:[#allocation2 + $0x111] sm:$0xff] %vm253_vm0, %v328_v23  ;;  %360 = vst.msk [vmem:[#allocation2 + $0x109] sm:$0xff] %vm253_vm0, %v327_v26  ;;  %v5696_v32 = vld [vmem:[#allocation2 + $0x69] sm:$0xff]  ;;  %v5698_v33 = vld [vmem:[#allocation2 + $0x61] sm:$0xff] }
  0x45   : > { %363 = vst.msk [vmem:[#allocation2 + $0x129] sm:$0xff] %vm253_vm0, %v330_v27  ;;  %362 = vst.msk [vmem:[#allocation2 + $0x121] sm:$0xff] %vm253_vm0, %v329_v28  ;;  %v5720_v43 = vld [vmem:[#allocation2 + $0x81] sm:$0xff]  ;;  %v5722_v44 = vld [vmem:[#allocation2 + $0x79] sm:$0xff] }
  0x46   : > { %365 = vst.msk [vmem:[#allocation2 + $0x141] sm:$0xff] %vm253_vm0, %v332_v29  ;;  %364 = vst.msk [vmem:[#allocation2 + $0x139] sm:$0xff] %vm253_vm0, %v331_v34  ;;  %v5730_v45 = vld [vmem:[#allocation2 + $0x99] sm:$0xff]  ;;  %v5732_v46 = vld [vmem:[#allocation2 + $0x91] sm:$0xff] }
  0x47   : > { %792 = vrot.lane.b32.xlu1 %v5687_v30, %s5383_s26  ;;  %790 = vrot.lane.b32.xlu0 %v5689_v31, %s5383_s26  ;;  %367 = vst.msk [vmem:[#allocation2 + $0x159] sm:$0xff] %vm253_vm0, %v334_v35  ;;  %366 = vst.msk [vmem:[#allocation2 + $0x151] sm:$0xff] %vm253_vm0, %v333_v36  ;;  %v5738_v47 = vld [vmem:[#allocation2 + $0xb1] sm:$0xff]  ;;  %v5740_v48 = vld [vmem:[#allocation2 + $0xa9] sm:$0xff] }
  0x48   : > { %369 = vst.msk [vmem:[#allocation2 + $0x171] sm:$0xff] %vm253_vm0, %v336_v37  ;;  %368 = vst.msk [vmem:[#allocation2 + $0x169] sm:$0xff] %vm253_vm0, %v335_v38  ;;  %v5746_v49 = vld [vmem:[#allocation2 + $0xc9] sm:$0xff]  ;;  %v5748_v50 = vld [vmem:[#allocation2 + $0xc1] sm:$0xff] }
  0x49   : > { %371 = vst.msk [vmem:[#allocation2 + $0x189] sm:$0xff] %vm253_vm0, %v338_v39  ;;  %370 = vst.msk [vmem:[#allocation2 + $0x181] sm:$0xff] %vm253_vm0, %v337_v40  ;;  %v5754_v51 = vld [vmem:[#allocation2 + $0xe1] sm:$0xff]  ;;  %v5756_v52 = vld [vmem:[#allocation2 + $0xd9] sm:$0xff] }
  0x4a   : > { %373 = vst.msk [vmem:[#allocation2 + $0x1a1] sm:$0xff] %vm253_vm0, %v340_v41  ;;  %372 = vst.msk [vmem:[#allocation2 + $0x199] sm:$0xff] %vm253_vm0, %v339_v42  ;;  %v5762_v53 = vld [vmem:[#allocation2 + $0xf9] sm:$0xff]  ;;  %v5764_v54 = vld [vmem:[#allocation2 + $0xf1] sm:$0xff] }
  0x4b   : > { %796 = vrot.lane.b32.xlu1 %v5696_v32, %s5383_s26  ;;  %794 = vrot.lane.b32.xlu0 %v5698_v33, %s5383_s26  ;;  %v5770_v55 = vld [vmem:[#allocation2 + $0x111] sm:$0xff]  ;;  %v5772_v56 = vld [vmem:[#allocation2 + $0x109] sm:$0xff]  ;;  %v5836_v11 = vld [vmem:[#allocation2 + $0x3a] sm:$0xff] }
  0x4c   : > { %v5778_v57 = vld [vmem:[#allocation2 + $0x129] sm:$0xff]  ;;  %v5780_v58 = vld [vmem:[#allocation2 + $0x121] sm:$0xff]  ;;  %v5838_v12 = vld [vmem:[#allocation2 + $0x32] sm:$0xff] }
  0x4d   : > { %v5786_v59 = vld [vmem:[#allocation2 + $0x141] sm:$0xff]  ;;  %v5788_v60 = vld [vmem:[#allocation2 + $0x139] sm:$0xff]  ;;  %v5846_v14 = vld [vmem:[#allocation2 + $0x4a] sm:$0xff] }
  0x4e   : > { %v5794_v61 = vld [vmem:[#allocation2 + $0x159] sm:$0xff]  ;;  %v5796_v62 = vld [vmem:[#allocation2 + $0x151] sm:$0xff]  ;;  %v5854_v16 = vld [vmem:[#allocation2 + $0x62] sm:$0xff] }
  0x4f   : > { %800 = vrot.lane.b32.xlu1 %v5720_v43, %s5383_s26  ;;  %798 = vrot.lane.b32.xlu0 %v5722_v44, %s5383_s26  ;;  %v5802_v63 = vld [vmem:[#allocation2 + $0x171] sm:$0xff]  ;;  %v5804_v1 = vld [vmem:[#allocation2 + $0x169] sm:$0xff]  ;;  %v5862_v18 = vld [vmem:[#allocation2 + $0x7a] sm:$0xff] }
  0x50   : > { %v5810_v2 = vld [vmem:[#allocation2 + $0x189] sm:$0xff]  ;;  %v5812_v3 = vld [vmem:[#allocation2 + $0x181] sm:$0xff]  ;;  %v5844_v13 = vld [vmem:[#allocation2 + $0x52] sm:$0xff] }
  0x51   : > { %v5818_v4 = vld [vmem:[#allocation2 + $0x1a1] sm:$0xff]  ;;  %v5820_v5 = vld [vmem:[#allocation2 + $0x199] sm:$0xff]  ;;  %v5852_v15 = vld [vmem:[#allocation2 + $0x6a] sm:$0xff] }
  0x52   : > { %v5860_v17 = vld [vmem:[#allocation2 + $0x82] sm:$0xff]  ;;  %v5868_v19 = vld [vmem:[#allocation2 + $0x9a] sm:$0xff]  ;;  %v5870_v20 = vld [vmem:[#allocation2 + $0x92] sm:$0xff] }
  0x53   : > { %804 = vrot.lane.b32.xlu1 %v5730_v45, %s5383_s26  ;;  %802 = vrot.lane.b32.xlu0 %v5732_v46, %s5383_s26  ;;  %v5876_v21 = vld [vmem:[#allocation2 + $0xb2] sm:$0xff]  ;;  %v5878_v22 = vld [vmem:[#allocation2 + $0xaa] sm:$0xff]  ;;  %v5886_v26 = vld [vmem:[#allocation2 + $0xc2] sm:$0xff] }
  0x54   : > { %v5884_v23 = vld [vmem:[#allocation2 + $0xca] sm:$0xff]  ;;  %v5892_v27 = vld [vmem:[#allocation2 + $0xe2] sm:$0xff]  ;;  %v5894_v28 = vld [vmem:[#allocation2 + $0xda] sm:$0xff] }
  0x55   : > { %v5900_v29 = vld [vmem:[#allocation2 + $0xfa] sm:$0xff]  ;;  %v5902_v34 = vld [vmem:[#allocation2 + $0xf2] sm:$0xff]  ;;  %v5910_v36 = vld [vmem:[#allocation2 + $0x10a] sm:$0xff] }
  0x56   : > { %v5908_v35 = vld [vmem:[#allocation2 + $0x112] sm:$0xff]  ;;  %8791 = vst [vmem:[#allocation4_spill] sm:$0xff] %v5910_v36  ;;  %v5920_v39 = vld [vmem:[#allocation2 + $0x12a] sm:$0xff]  ;;  %v5922_v40 = vld [vmem:[#allocation2 + $0x122] sm:$0xff] }
  0x57   : > { %808 = vrot.lane.b32.xlu1 %v5738_v47, %s5383_s26  ;;  %806 = vrot.lane.b32.xlu0 %v5740_v48, %s5383_s26  ;;  %8794 = vst [vmem:[#allocation7_spill] sm:$0xff] %v5920_v39  ;;  %8795 = vst [vmem:[#allocation8_spill] sm:$0xff] %v5922_v40 }
  0x5b   : > { %812 = vrot.lane.b32.xlu1 %v5746_v49, %s5383_s26  ;;  %810 = vrot.lane.b32.xlu0 %v5748_v50, %s5383_s26 }
  0x5f   : > { %816 = vrot.lane.b32.xlu1 %v5754_v51, %s5383_s26  ;;  %814 = vrot.lane.b32.xlu0 %v5756_v52, %s5383_s26 }
  0x63   : > { %820 = vrot.lane.b32.xlu1 %v5762_v53, %s5383_s26  ;;  %818 = vrot.lane.b32.xlu0 %v5764_v54, %s5383_s26 }
  0x67   : > { %824 = vrot.lane.b32.xlu1 %v5770_v55, %s5383_s26  ;;  %822 = vrot.lane.b32.xlu0 %v5772_v56, %s5383_s26 }
  0x6b   : > { %828 = vrot.lane.b32.xlu1 %v5778_v57, %s5383_s26  ;;  %826 = vrot.lane.b32.xlu0 %v5780_v58, %s5383_s26 }
  0x6f   : > { %832 = vrot.lane.b32.xlu1 %v5786_v59, %s5383_s26  ;;  %830 = vrot.lane.b32.xlu0 %v5788_v60, %s5383_s26 }
  0x73   : > { %836 = vrot.lane.b32.xlu1 %v5794_v61, %s5383_s26  ;;  %834 = vrot.lane.b32.xlu0 %v5796_v62, %s5383_s26 }
  0x77   : > { %840 = vrot.lane.b32.xlu1 %v5802_v63, %s5383_s26  ;;  %838 = vrot.lane.b32.xlu0 %v5804_v1, %s5383_s26 }
  0x7b   : > { %844 = vrot.lane.b32.xlu1 %v5810_v2, %s5383_s26  ;;  %842 = vrot.lane.b32.xlu0 %v5812_v3, %s5383_s26 }
  0x7f   : > { %848 = vrot.lane.b32.xlu1 %v5818_v4, %s5383_s26  ;;  %846 = vrot.lane.b32.xlu0 %v5820_v5, %s5383_s26 }
  0x83   : > { %924 = vrot.lane.b32.xlu1 %v485_v6, %s5384_s27  ;;  %922 = vrot.lane.b32.xlu0 %v484_v7, %s5384_s27  ;;  %v5932_v6 = vld [vmem:[#allocation2 + $0x142] sm:$0xff]  ;;  %v5934_v7 = vld [vmem:[#allocation2 + $0x13a] sm:$0xff] }
  0x84   : > { %8798 = vst [vmem:[#allocation11_spill] sm:$0xff] %v5932_v6  ;;  %8799 = vst [vmem:[#allocation12_spill] sm:$0xff] %v5934_v7 }
  0x87   : > { %928 = vrot.lane.b32.xlu1 %v5828_v8, %s5384_s27  ;;  %926 = vrot.lane.b32.xlu0 %v5830_v10, %s5384_s27 }
  0x89   : > { %v5912_v37 = vpop.permute.xlu1 %782 }
  0x8a   : > { %8792 = vst [vmem:[#allocation5_spill] sm:$0xff] %v5912_v37  ;;  %v5914_v38 = vpop.permute.xlu0 %778 }
  0x8b   : > { %932 = vrot.lane.b32.xlu1 %v5836_v11, %s5384_s27  ;;  %930 = vrot.lane.b32.xlu0 %v5838_v12, %s5384_s27  ;;  %8793 = vst [vmem:[#allocation6_spill] sm:$0xff] %v5914_v38 }
  0x8d   : > { %v5924_v41 = vpop.permute.xlu1 %784 }
  0x8e   : > { %8796 = vst [vmem:[#allocation9_spill] sm:$0xff] %v5924_v41  ;;  %v5926_v42 = vpop.permute.xlu0 %780  ;;  %v5944_v41 = vld [vmem:[#allocation2 + $0x15a] sm:$0xff] }
  0x8f   : > { %936 = vrot.lane.b32.xlu1 %v5844_v13, %s5384_s27  ;;  %934 = vrot.lane.b32.xlu0 %v5846_v14, %s5384_s27  ;;  %8797 = vst [vmem:[#allocation10_spill] sm:$0xff] %v5926_v42  ;;  %8802 = vst [vmem:[#allocation15_spill] sm:$0xff] %v5944_v41  ;;  %v5946_v42 = vld [vmem:[#allocation2 + $0x152] sm:$0xff] }
  0x90   : > { %8803 = vst [vmem:[#allocation16_spill] sm:$0xff] %v5946_v42 }
  0x93   : > { %940 = vrot.lane.b32.xlu1 %v5852_v15, %s5384_s27  ;;  %938 = vrot.lane.b32.xlu0 %v5854_v16, %s5384_s27 }
  0x97   : > { %944 = vrot.lane.b32.xlu1 %v5860_v17, %s5384_s27  ;;  %942 = vrot.lane.b32.xlu0 %v5862_v18, %s5384_s27 }
  0x9b   : > { %948 = vrot.lane.b32.xlu1 %v5868_v19, %s5384_s27  ;;  %946 = vrot.lane.b32.xlu0 %v5870_v20, %s5384_s27 }
  0x9f   : > { %952 = vrot.lane.b32.xlu1 %v5876_v21, %s5384_s27  ;;  %950 = vrot.lane.b32.xlu0 %v5878_v22, %s5384_s27 }
  0xa3   : > { %956 = vrot.lane.b32.xlu1 %v5884_v23, %s5384_s27  ;;  %954 = vrot.lane.b32.xlu0 %v5886_v26, %s5384_s27 }
  0xa7   : > { %960 = vrot.lane.b32.xlu1 %v5892_v27, %s5384_s27  ;;  %958 = vrot.lane.b32.xlu0 %v5894_v28, %s5384_s27 }
  0xab   : > { %964 = vrot.lane.b32.xlu1 %v5900_v29, %s5384_s27  ;;  %962 = vrot.lane.b32.xlu0 %v5902_v34, %s5384_s27 }
  0xaf   : > { %968 = vrot.lane.b32.xlu1 %v5908_v35, %s5384_s27  ;;  %966 = vrot.lane.b32.xlu0 %v5910_v36, %s5384_s27  ;;  %v6008_v36 = vld [vmem:[#allocation2 + $0x48] sm:$0xff] }
  0xb3   : > { %972 = vrot.lane.b32.xlu1 %v5920_v39, %s5384_s27  ;;  %970 = vrot.lane.b32.xlu0 %v5922_v40, %s5384_s27  ;;  %v417_v39 = vld [vmem:[#allocation2 + $0x38] sm:$0xff] }
  0xb5   : > { %v5936_v0 = vpop.permute.xlu1 %788  ;;  %v5938_v37 = vpop.permute.xlu0 %786 }
  0xb6   : > { %8800 = vst [vmem:[#allocation13_spill] sm:$0xff] %v5936_v0  ;;  %8801 = vst [vmem:[#allocation14_spill] sm:$0xff] %v5938_v37  ;;  %v5956_v37 = vld [vmem:[#allocation2 + $0x172] sm:$0xff]  ;;  %v5958_v0 = vld [vmem:[#allocation2 + $0x16a] sm:$0xff] }
  0xb7   : > { %976 = vrot.lane.b32.xlu1 %v5932_v6, %s5384_s27  ;;  %974 = vrot.lane.b32.xlu0 %v5934_v7, %s5384_s27  ;;  %8806 = vst [vmem:[#allocation19_spill] sm:$0xff] %v5956_v37  ;;  %8807 = vst [vmem:[#allocation20_spill] sm:$0xff] %v5958_v0 }
  0xb9   : > { %v5948_v38 = vpop.permute.xlu1 %792  ;;  %v5950_v40 = vpop.permute.xlu0 %790 }
  0xba   : > { %8804 = vst [vmem:[#allocation17_spill] sm:$0xff] %v5948_v38  ;;  %8805 = vst [vmem:[#allocation18_spill] sm:$0xff] %v5950_v40  ;;  %v5968_v38 = vld [vmem:[#allocation2 + $0x18a] sm:$0xff]  ;;  %v5970_v40 = vld [vmem:[#allocation2 + $0x182] sm:$0xff] }
  0xbb   : > { %980 = vrot.lane.b32.xlu1 %v5944_v41, %s5384_s27  ;;  %978 = vrot.lane.b32.xlu0 %v5946_v42, %s5384_s27  ;;  %8810 = vst [vmem:[#allocation23_spill] sm:$0xff] %v5968_v38  ;;  %8811 = vst [vmem:[#allocation24_spill] sm:$0xff] %v5970_v40 }
  0xbd   : > { %v5960_v6 = vpop.permute.xlu1 %796  ;;  %v5962_v7 = vpop.permute.xlu0 %794 }
  0xbe   : > { %8808 = vst [vmem:[#allocation21_spill] sm:$0xff] %v5960_v6  ;;  %8809 = vst [vmem:[#allocation22_spill] sm:$0xff] %v5962_v7  ;;  %v5980_v6 = vld [vmem:[#allocation2 + $0x1a2] sm:$0xff]  ;;  %v5982_v7 = vld [vmem:[#allocation2 + $0x19a] sm:$0xff] }
  0xbf   : > { %984 = vrot.lane.b32.xlu1 %v5956_v37, %s5384_s27  ;;  %982 = vrot.lane.b32.xlu0 %v5958_v0, %s5384_s27  ;;  %8814 = vst [vmem:[#allocation27_spill] sm:$0xff] %v5980_v6  ;;  %8815 = vst [vmem:[#allocation28_spill] sm:$0xff] %v5982_v7 }
  0xc1   : > { %v5972_v41 = vpop.permute.xlu1 %800  ;;  %v5974_v42 = vpop.permute.xlu0 %798 }
  0xc2   : > { %8812 = vst [vmem:[#allocation25_spill] sm:$0xff] %v5972_v41  ;;  %8813 = vst [vmem:[#allocation26_spill] sm:$0xff] %v5974_v42 }
  0xc3   : > { %988 = vrot.lane.b32.xlu1 %v5968_v38, %s5384_s27  ;;  %986 = vrot.lane.b32.xlu0 %v5970_v40, %s5384_s27  ;;  %v414_v38 = vld [vmem:[#allocation2 + $0x18] sm:$0xff]  ;;  %v415_v40 = vld [vmem:[#allocation2 + $0x20] sm:$0xff] }
  0xc5   : > { %v5984_v37 = vpop.permute.xlu1 %804  ;;  %v5986_v0 = vpop.permute.xlu0 %802 }
  0xc6   : > { %8816 = vst [vmem:[#allocation29_spill] sm:$0xff] %v5984_v37  ;;  %8817 = vst [vmem:[#allocation30_spill] sm:$0xff] %v5986_v0 }
  0xc7   : > { %992 = vrot.lane.b32.xlu1 %v5980_v6, %s5384_s27  ;;  %990 = vrot.lane.b32.xlu0 %v5982_v7, %s5384_s27  ;;  %v416_v6 = vld [vmem:[#allocation2 + $0x30] sm:$0xff] }
  0xc8   : > { %v419_v7 = vld [vmem:[#allocation2 + $0x50] sm:$0xff] }
  0xc9   : > { %v5992_v42 = vpop.permute.xlu1 %808  ;;  %v5994_v41 = vpop.permute.xlu0 %806 }
  0xca   : > { %8818 = vst [vmem:[#allocation31_spill] sm:$0xff] %v5992_v42  ;;  %8819 = vst [vmem:[#allocation32_spill] sm:$0xff] %v5994_v41 }
  0xcb   : > { %1068 = vrot.lane.b32.xlu1 %v415_v40, %s5385_s28  ;;  %1066 = vrot.lane.b32.xlu0 %v414_v38, %s5385_s28 }
  0xcd   : > { %v5998_v37 = vpop.permute.xlu1 %812  ;;  %v6000_v0 = vpop.permute.xlu0 %810 }
  0xce   : > { %8820 = vst [vmem:[#allocation33_spill] sm:$0xff] %v5998_v37  ;;  %8821 = vst [vmem:[#allocation34_spill] sm:$0xff] %v6000_v0  ;;  %v6017_v0 = vld [vmem:[#allocation2 + $0x68] sm:$0xff]  ;;  %v6041_v37 = vld [vmem:[#allocation2 + $0x98] sm:$0xff] }
  0xcf   : > { %1072 = vrot.lane.b32.xlu1 %v417_v39, %s5385_s28  ;;  %1070 = vrot.lane.b32.xlu0 %v416_v6, %s5385_s28  ;;  %v6019_v39 = vld [vmem:[#allocation2 + $0x60] sm:$0xff]  ;;  %8833 = vst [vmem:[#allocation46_spill] sm:$0xff] %v6041_v37 }
  0xd0   : > { %8826 = vst [vmem:[#allocation39_spill] sm:$0xff] %v6019_v39 }
  0xd1   : > { %v6004_v42 = vpop.permute.xlu1 %816  ;;  %v6006_v41 = vpop.permute.xlu0 %814 }
  0xd2   : > { %8822 = vst [vmem:[#allocation35_spill] sm:$0xff] %v6004_v42  ;;  %8823 = vst [vmem:[#allocation36_spill] sm:$0xff] %v6006_v41  ;;  %v6029_v41 = vld [vmem:[#allocation2 + $0x80] sm:$0xff]  ;;  %v6031_v42 = vld [vmem:[#allocation2 + $0x78] sm:$0xff] }
  0xd3   : > { %1076 = vrot.lane.b32.xlu1 %v419_v7, %s5385_s28  ;;  %1074 = vrot.lane.b32.xlu0 %v6008_v36, %s5385_s28  ;;  %8829 = vst [vmem:[#allocation42_spill] sm:$0xff] %v6029_v41  ;;  %8830 = vst [vmem:[#allocation43_spill] sm:$0xff] %v6031_v42 }
  0xd5   : > { %v6013_v38 = vpop.permute.xlu1 %820  ;;  %v6015_v40 = vpop.permute.xlu0 %818 }
  0xd6   : > { %8824 = vst [vmem:[#allocation37_spill] sm:$0xff] %v6013_v38  ;;  %8825 = vst [vmem:[#allocation38_spill] sm:$0xff] %v6015_v40 }
  0xd7   : > { %1080 = vrot.lane.b32.xlu1 %v6017_v0, %s5385_s28  ;;  %1078 = vrot.lane.b32.xlu0 %v6019_v39, %s5385_s28  ;;  %v6043_v39 = vld [vmem:[#allocation2 + $0x90] sm:$0xff] }
  0xd8   : > { %8834 = vst [vmem:[#allocation47_spill] sm:$0xff] %v6043_v39 }
  0xd9   : > { %v6025_v6 = vpop.permute.xlu1 %824  ;;  %v6027_v7 = vpop.permute.xlu0 %822 }
  0xda   : > { %8827 = vst [vmem:[#allocation40_spill] sm:$0xff] %v6025_v6  ;;  %8828 = vst [vmem:[#allocation41_spill] sm:$0xff] %v6027_v7 }
  0xdb   : > { %1084 = vrot.lane.b32.xlu1 %v6029_v41, %s5385_s28  ;;  %1082 = vrot.lane.b32.xlu0 %v6031_v42, %s5385_s28  ;;  %v6053_v41 = vld [vmem:[#allocation2 + $0xb0] sm:$0xff]  ;;  %v6055_v42 = vld [vmem:[#allocation2 + $0xa8] sm:$0xff] }
  0xdc   : > { %8837 = vst [vmem:[#allocation50_spill] sm:$0xff] %v6053_v41  ;;  %8838 = vst [vmem:[#allocation51_spill] sm:$0xff] %v6055_v42 }
  0xdd   : > { %v6037_v40 = vpop.permute.xlu1 %828  ;;  %v6039_v38 = vpop.permute.xlu0 %826 }
  0xde   : > { %8831 = vst [vmem:[#allocation44_spill] sm:$0xff] %v6037_v40  ;;  %8832 = vst [vmem:[#allocation45_spill] sm:$0xff] %v6039_v38 }
  0xdf   : > { %1088 = vrot.lane.b32.xlu1 %v6041_v37, %s5385_s28  ;;  %1086 = vrot.lane.b32.xlu0 %v6043_v39, %s5385_s28  ;;  %v6065_v37 = vld [vmem:[#allocation2 + $0xc8] sm:$0xff]  ;;  %v6067_v39 = vld [vmem:[#allocation2 + $0xc0] sm:$0xff] }
  0xe0   : > { %8841 = vst [vmem:[#allocation54_spill] sm:$0xff] %v6065_v37  ;;  %8842 = vst [vmem:[#allocation55_spill] sm:$0xff] %v6067_v39 }
  0xe1   : > { %v6049_v7 = vpop.permute.xlu1 %832  ;;  %v6051_v6 = vpop.permute.xlu0 %830 }
  0xe2   : > { %8835 = vst [vmem:[#allocation48_spill] sm:$0xff] %v6049_v7  ;;  %8836 = vst [vmem:[#allocation49_spill] sm:$0xff] %v6051_v6 }
  0xe3   : > { %1092 = vrot.lane.b32.xlu1 %v6053_v41, %s5385_s28  ;;  %1090 = vrot.lane.b32.xlu0 %v6055_v42, %s5385_s28  ;;  %v6077_v41 = vld [vmem:[#allocation2 + $0xe0] sm:$0xff]  ;;  %v6079_v42 = vld [vmem:[#allocation2 + $0xd8] sm:$0xff] }
  0xe4   : > { %8845 = vst [vmem:[#allocation58_spill] sm:$0xff] %v6077_v41  ;;  %8846 = vst [vmem:[#allocation59_spill] sm:$0xff] %v6079_v42 }
  0xe5   : > { %v6061_v38 = vpop.permute.xlu1 %836  ;;  %v6063_v40 = vpop.permute.xlu0 %834 }
  0xe6   : > { %8839 = vst [vmem:[#allocation52_spill] sm:$0xff] %v6061_v38  ;;  %8840 = vst [vmem:[#allocation53_spill] sm:$0xff] %v6063_v40 }
  0xe7   : > { %1096 = vrot.lane.b32.xlu1 %v6065_v37, %s5385_s28  ;;  %1094 = vrot.lane.b32.xlu0 %v6067_v39, %s5385_s28  ;;  %v6089_v37 = vld [vmem:[#allocation2 + $0xf8] sm:$0xff]  ;;  %v6091_v39 = vld [vmem:[#allocation2 + $0xf0] sm:$0xff] }
  0xe8   : > { %8849 = vst [vmem:[#allocation62_spill] sm:$0xff] %v6089_v37  ;;  %8850 = vst [vmem:[#allocation63_spill] sm:$0xff] %v6091_v39 }
  0xe9   : > { %v6073_v6 = vpop.permute.xlu1 %840  ;;  %v6075_v7 = vpop.permute.xlu0 %838 }
  0xea   : > { %8843 = vst [vmem:[#allocation56_spill] sm:$0xff] %v6073_v6  ;;  %8844 = vst [vmem:[#allocation57_spill] sm:$0xff] %v6075_v7 }
  0xeb   : > { %1100 = vrot.lane.b32.xlu1 %v6077_v41, %s5385_s28  ;;  %1098 = vrot.lane.b32.xlu0 %v6079_v42, %s5385_s28  ;;  %v6101_v41 = vld [vmem:[#allocation2 + $0x110] sm:$0xff]  ;;  %v6103_v42 = vld [vmem:[#allocation2 + $0x108] sm:$0xff] }
  0xec   : > { %8853 = vst [vmem:[#allocation66_spill] sm:$0xff] %v6101_v41  ;;  %8854 = vst [vmem:[#allocation67_spill] sm:$0xff] %v6103_v42 }
  0xed   : > { %v6085_v40 = vpop.permute.xlu1 %844  ;;  %v6087_v38 = vpop.permute.xlu0 %842 }
  0xee   : > { %8847 = vst [vmem:[#allocation60_spill] sm:$0xff] %v6085_v40  ;;  %8848 = vst [vmem:[#allocation61_spill] sm:$0xff] %v6087_v38 }
  0xef   : > { %1104 = vrot.lane.b32.xlu1 %v6089_v37, %s5385_s28  ;;  %1102 = vrot.lane.b32.xlu0 %v6091_v39, %s5385_s28  ;;  %v6113_v37 = vld [vmem:[#allocation2 + $0x128] sm:$0xff]  ;;  %v6115_v39 = vld [vmem:[#allocation2 + $0x120] sm:$0xff] }
  0xf0   : > { %8857 = vst [vmem:[#allocation70_spill] sm:$0xff] %v6113_v37  ;;  %8858 = vst [vmem:[#allocation71_spill] sm:$0xff] %v6115_v39 }
  0xf1   : > { %v6097_v7 = vpop.permute.xlu1 %848  ;;  %v6099_v6 = vpop.permute.xlu0 %846 }
  0xf2   : > { %8851 = vst [vmem:[#allocation64_spill] sm:$0xff] %v6097_v7  ;;  %8852 = vst [vmem:[#allocation65_spill] sm:$0xff] %v6099_v6 }
  0xf3   : > { %1108 = vrot.lane.b32.xlu1 %v6101_v41, %s5385_s28  ;;  %1106 = vrot.lane.b32.xlu0 %v6103_v42, %s5385_s28  ;;  %v6125_v41 = vld [vmem:[#allocation2 + $0x140] sm:$0xff]  ;;  %v6127_v42 = vld [vmem:[#allocation2 + $0x138] sm:$0xff] }
  0xf4   : > { %8861 = vst [vmem:[#allocation74_spill] sm:$0xff] %v6125_v41  ;;  %8862 = vst [vmem:[#allocation75_spill] sm:$0xff] %v6127_v42 }
  0xf5   : > { %v6109_v38 = vpop.permute.xlu1 %924  ;;  %v6111_v40 = vpop.permute.xlu0 %922 }
  0xf6   : > { %8855 = vst [vmem:[#allocation68_spill] sm:$0xff] %v6109_v38  ;;  %8856 = vst [vmem:[#allocation69_spill] sm:$0xff] %v6111_v40 }
  0xf7   : > { %1112 = vrot.lane.b32.xlu1 %v6113_v37, %s5385_s28  ;;  %1110 = vrot.lane.b32.xlu0 %v6115_v39, %s5385_s28  ;;  %v6137_v37 = vld [vmem:[#allocation2 + $0x158] sm:$0xff]  ;;  %v6139_v39 = vld [vmem:[#allocation2 + $0x150] sm:$0xff] }
  0xf8   : > { %8865 = vst [vmem:[#allocation78_spill] sm:$0xff] %v6137_v37  ;;  %8866 = vst [vmem:[#allocation79_spill] sm:$0xff] %v6139_v39 }
  0xf9   : > { %v6121_v6 = vpop.permute.xlu1 %928  ;;  %v6123_v7 = vpop.permute.xlu0 %926 }
  0xfa   : > { %8859 = vst [vmem:[#allocation72_spill] sm:$0xff] %v6121_v6  ;;  %8860 = vst [vmem:[#allocation73_spill] sm:$0xff] %v6123_v7 }
  0xfb   : > { %1116 = vrot.lane.b32.xlu1 %v6125_v41, %s5385_s28  ;;  %1114 = vrot.lane.b32.xlu0 %v6127_v42, %s5385_s28  ;;  %v6149_v41 = vld [vmem:[#allocation2 + $0x170] sm:$0xff]  ;;  %v6151_v42 = vld [vmem:[#allocation2 + $0x168] sm:$0xff] }
  0xfc   : > { %8869 = vst [vmem:[#allocation82_spill] sm:$0xff] %v6149_v41  ;;  %8870 = vst [vmem:[#allocation83_spill] sm:$0xff] %v6151_v42 }
  0xfd   : > { %v6133_v38 = vpop.permute.xlu1 %932  ;;  %v6135_v40 = vpop.permute.xlu0 %930 }
  0xfe   : > { %8863 = vst [vmem:[#allocation76_spill] sm:$0xff] %v6133_v38  ;;  %8864 = vst [vmem:[#allocation77_spill] sm:$0xff] %v6135_v40 }
  0xff   : > { %1120 = vrot.lane.b32.xlu1 %v6137_v37, %s5385_s28  ;;  %1118 = vrot.lane.b32.xlu0 %v6139_v39, %s5385_s28  ;;  %v6161_v37 = vld [vmem:[#allocation2 + $0x188] sm:$0xff]  ;;  %v6163_v39 = vld [vmem:[#allocation2 + $0x180] sm:$0xff] }
 0x100   : > { %8873 = vst [vmem:[#allocation86_spill] sm:$0xff] %v6161_v37  ;;  %8874 = vst [vmem:[#allocation87_spill] sm:$0xff] %v6163_v39 }
 0x101   : > { %v6145_v6 = vpop.permute.xlu1 %936  ;;  %v6147_v7 = vpop.permute.xlu0 %934 }
 0x102   : > { %8867 = vst [vmem:[#allocation80_spill] sm:$0xff] %v6145_v6  ;;  %8868 = vst [vmem:[#allocation81_spill] sm:$0xff] %v6147_v7 }
 0x103   : > { %1124 = vrot.lane.b32.xlu1 %v6149_v41, %s5385_s28  ;;  %1122 = vrot.lane.b32.xlu0 %v6151_v42, %s5385_s28  ;;  %v6173_v41 = vld [vmem:[#allocation2 + $0x1a0] sm:$0xff]  ;;  %v6175_v42 = vld [vmem:[#allocation2 + $0x198] sm:$0xff] }
 0x104   : > { %8877 = vst [vmem:[#allocation90_spill] sm:$0xff] %v6173_v41 }
 0x105   : > { %v6157_v38 = vpop.permute.xlu1 %940  ;;  %v6159_v40 = vpop.permute.xlu0 %938 }
 0x106   : > { %8871 = vst [vmem:[#allocation84_spill] sm:$0xff] %v6157_v38  ;;  %8872 = vst [vmem:[#allocation85_spill] sm:$0xff] %v6159_v40  ;;  %v6181_v38 = vld [vmem:[#allocation2 + $0x1b8] sm:$0xff]  ;;  %v6183_v40 = vld [vmem:[#allocation2 + $0x1b0] sm:$0xff] }
 0x107   : > { %1128 = vrot.lane.b32.xlu1 %v6161_v37, %s5385_s28  ;;  %1126 = vrot.lane.b32.xlu0 %v6163_v39, %s5385_s28  ;;  %8878 = vst [vmem:[#allocation91_spill] sm:$0xff] %v6183_v40 }
 0x109   : > { %v6169_v6 = vpop.permute.xlu1 %944  ;;  %v6171_v7 = vpop.permute.xlu0 %942 }
 0x10a   : > { %8875 = vst [vmem:[#allocation88_spill] sm:$0xff] %v6169_v6  ;;  %8876 = vst [vmem:[#allocation89_spill] sm:$0xff] %v6171_v7  ;;  %v4814_v7 = vld [vmem:[#allocation2 + $0x19] sm:$0xff] }
 0x10b   : > { %1132 = vrot.lane.b32.xlu1 %v6173_v41, %s5385_s28  ;;  %1130 = vrot.lane.b32.xlu0 %v6175_v42, %s5385_s28 }
 0x10d   : > { %v6185_v37 = vpop.permute.xlu1 %948  ;;  %v6187_v39 = vpop.permute.xlu0 %946 }
 0x10e   : > { %8879 = vst [vmem:[#allocation92_spill] sm:$0xff] %v6185_v37  ;;  %8880 = vst [vmem:[#allocation93_spill] sm:$0xff] %v6187_v39 }
 0x10f   : > { %1136 = vrot.lane.b32.xlu1 %v6181_v38, %s5385_s28  ;;  %1134 = vrot.lane.b32.xlu0 %v6183_v40, %s5385_s28 }
 0x111   : > { %v6193_v6 = vpop.permute.xlu1 %952  ;;  %v6195_v41 = vpop.permute.xlu0 %950 }
 0x112   : > { %8881 = vst [vmem:[#allocation94_spill] sm:$0xff] %v6193_v6  ;;  %8882 = vst [vmem:[#allocation95_spill] sm:$0xff] %v6195_v41 }
 0x113   : > { %1212 = vrot.lane.b32.xlu1 %v5636_v9, %s5386_s29  ;;  %1210 = vrot.lane.b32.xlu0 %v4814_v7, %s5386_s29 }
 0x115   : > { %v6200_v37 = vpop.permute.xlu1 %956  ;;  %v6202_v39 = vpop.permute.xlu0 %954 }
 0x116   : > { %8883 = vst [vmem:[#allocation96_spill] sm:$0xff] %v6200_v37  ;;  %8884 = vst [vmem:[#allocation97_spill] sm:$0xff] %v6202_v39  ;;  %v4928_v39 = vld [vmem:[#allocation2 + $0x79] sm:$0xff] }
 0x117   : > { %1216 = vrot.lane.b32.xlu1 %v5670_v24, %s5386_s29  ;;  %1214 = vrot.lane.b32.xlu0 %v5672_v25, %s5386_s29 }
 0x119   : > { %v6208_v40 = vpop.permute.xlu1 %960  ;;  %v6210_v6 = vpop.permute.xlu0 %958 }
 0x11a   : > { %8885 = vst [vmem:[#allocation98_spill] sm:$0xff] %v6208_v40  ;;  %8886 = vst [vmem:[#allocation99_spill] sm:$0xff] %v6210_v6 }
 0x11b   : > { %1220 = vrot.lane.b32.xlu1 %v5687_v30, %s5386_s29  ;;  %1218 = vrot.lane.b32.xlu0 %v5689_v31, %s5386_s29 }
 0x11d   : > { %v6216_v9 = vpop.permute.xlu1 %964  ;;  %v6218_v7 = vpop.permute.xlu0 %962 }
 0x11e   : > { %8887 = vst [vmem:[#allocation100_spill] sm:$0xff] %v6216_v9  ;;  %8888 = vst [vmem:[#allocation101_spill] sm:$0xff] %v6218_v7  ;;  %v8991_v9 = vld [vmem:[#allocation90_spill] sm:$0xff] }
 0x11f   : > { %1224 = vrot.lane.b32.xlu1 %v5696_v32, %s5386_s29  ;;  %1222 = vrot.lane.b32.xlu0 %v5698_v33, %s5386_s29 }
 0x121   : > { %v6224_v24 = vpop.permute.xlu1 %968  ;;  %v6226_v25 = vpop.permute.xlu0 %966 }
 0x122   : > { %8889 = vst [vmem:[#allocation102_spill] sm:$0xff] %v6224_v24  ;;  %8890 = vst [vmem:[#allocation103_spill] sm:$0xff] %v6226_v25  ;;  %v8961_v24 = vld [vmem:[#allocation50_spill] sm:$0xff] }
 0x123   : > { %1228 = vrot.lane.b32.xlu1 %v5720_v43, %s5386_s29  ;;  %1226 = vrot.lane.b32.xlu0 %v5722_v44, %s5386_s29 }
 0x125   : > { %v6232_v30 = vpop.permute.xlu1 %972  ;;  %v6234_v31 = vpop.permute.xlu0 %970 }
 0x126   : > { %8891 = vst [vmem:[#allocation104_spill] sm:$0xff] %v6232_v30  ;;  %8892 = vst [vmem:[#allocation105_spill] sm:$0xff] %v6234_v31  ;;  %v8953_v30 = vld [vmem:[#allocation42_spill] sm:$0xff] }
 0x127   : > { %1232 = vrot.lane.b32.xlu1 %v5730_v45, %s5386_s29  ;;  %1230 = vrot.lane.b32.xlu0 %v5732_v46, %s5386_s29 }
 0x129   : > { %v6240_v32 = vpop.permute.xlu1 %976  ;;  %v6242_v33 = vpop.permute.xlu0 %974 }
 0x12a   : > { %8893 = vst [vmem:[#allocation106_spill] sm:$0xff] %v6240_v32  ;;  %8894 = vst [vmem:[#allocation107_spill] sm:$0xff] %v6242_v33 }
 0x12b   : > { %1236 = vrot.lane.b32.xlu1 %v5738_v47, %s5386_s29  ;;  %1234 = vrot.lane.b32.xlu0 %v5740_v48, %s5386_s29 }
 0x12d   : > { %v6248_v43 = vpop.permute.xlu1 %980  ;;  %v6250_v44 = vpop.permute.xlu0 %978 }
 0x12e   : > { %8895 = vst [vmem:[#allocation108_spill] sm:$0xff] %v6248_v43  ;;  %8896 = vst [vmem:[#allocation109_spill] sm:$0xff] %v6250_v44  ;;  %v6472_v44 = vld [vmem:[#allocation2 + $0x1b2] sm:$0xff] }
 0x12f   : > { %1240 = vrot.lane.b32.xlu1 %v5746_v49, %s5386_s29  ;;  %1238 = vrot.lane.b32.xlu0 %v5748_v50, %s5386_s29 }
 0x131   : > { %v6256_v45 = vpop.permute.xlu1 %984  ;;  %v6258_v46 = vpop.permute.xlu0 %982 }
 0x132   : > { %8897 = vst [vmem:[#allocation110_spill] sm:$0xff] %v6256_v45  ;;  %8898 = vst [vmem:[#allocation111_spill] sm:$0xff] %v6258_v46  ;;  %v8936_v45 = vld [vmem:[#allocation23_spill] sm:$0xff] }
 0x133   : > { %1244 = vrot.lane.b32.xlu1 %v5754_v51, %s5386_s29  ;;  %1242 = vrot.lane.b32.xlu0 %v5756_v52, %s5386_s29 }
 0x135   : > { %v6264_v47 = vpop.permute.xlu1 %988  ;;  %v6266_v48 = vpop.permute.xlu0 %986 }
 0x136   : > { %8899 = vst [vmem:[#allocation112_spill] sm:$0xff] %v6264_v47  ;;  %8900 = vst [vmem:[#allocation113_spill] sm:$0xff] %v6266_v48  ;;  %v8932_v47 = vld [vmem:[#allocation15_spill] sm:$0xff] }
 0x137   : > { %1248 = vrot.lane.b32.xlu1 %v5762_v53, %s5386_s29  ;;  %1246 = vrot.lane.b32.xlu0 %v5764_v54, %s5386_s29 }
 0x139   : > { %v6272_v49 = vpop.permute.xlu1 %992  ;;  %v6274_v50 = vpop.permute.xlu0 %990 }
 0x13a   : > { %8901 = vst [vmem:[#allocation114_spill] sm:$0xff] %v6272_v49  ;;  %8902 = vst [vmem:[#allocation115_spill] sm:$0xff] %v6274_v50 }
 0x13b   : > { %1252 = vrot.lane.b32.xlu1 %v5770_v55, %s5386_s29  ;;  %1250 = vrot.lane.b32.xlu0 %v5772_v56, %s5386_s29 }
 0x13d   : > { %v6280_v51 = vpop.permute.xlu1 %1068  ;;  %v6282_v52 = vpop.permute.xlu0 %1066 }
 0x13f   : > { %1256 = vrot.lane.b32.xlu1 %v5778_v57, %s5386_s29  ;;  %1254 = vrot.lane.b32.xlu0 %v5780_v58, %s5386_s29 }
 0x141   : > { %v6288_v53 = vpop.permute.xlu1 %1072  ;;  %v6290_v54 = vpop.permute.xlu0 %1070 }
 0x143   : > { %1260 = vrot.lane.b32.xlu1 %v5786_v59, %s5386_s29  ;;  %1258 = vrot.lane.b32.xlu0 %v5788_v60, %s5386_s29 }
 0x145   : > { %v6296_v55 = vpop.permute.xlu1 %1076  ;;  %v6298_v56 = vpop.permute.xlu0 %1074 }
 0x147   : > { %1264 = vrot.lane.b32.xlu1 %v5794_v61, %s5386_s29  ;;  %1262 = vrot.lane.b32.xlu0 %v5796_v62, %s5386_s29 }
 0x149   : > { %v6304_v57 = vpop.permute.xlu1 %1080  ;;  %v6306_v58 = vpop.permute.xlu0 %1078 }
 0x14b   : > { %1268 = vrot.lane.b32.xlu1 %v5802_v63, %s5386_s29  ;;  %1266 = vrot.lane.b32.xlu0 %v5804_v1, %s5386_s29  ;;  %v4849_v63 = vld [vmem:[#allocation2 + $0x1b9] sm:$0xff]  ;;  %v4848_v1 = vld [vmem:[#allocation2 + $0x1b1] sm:$0xff] }
 0x14d   : > { %v6312_v59 = vpop.permute.xlu1 %1084  ;;  %v6314_v60 = vpop.permute.xlu0 %1082 }
 0x14f   : > { %1272 = vrot.lane.b32.xlu1 %v5810_v2, %s5386_s29  ;;  %1270 = vrot.lane.b32.xlu0 %v5812_v3, %s5386_s29 }
 0x151   : > { %v6320_v61 = vpop.permute.xlu1 %1088  ;;  %v6322_v62 = vpop.permute.xlu0 %1086 }
 0x153   : > { %1276 = vrot.lane.b32.xlu1 %v5818_v4, %s5386_s29  ;;  %1274 = vrot.lane.b32.xlu0 %v5820_v5, %s5386_s29 }
 0x155   : > { %v6328_v50 = vpop.permute.xlu1 %1092  ;;  %v6330_v49 = vpop.permute.xlu0 %1090 }
 0x156   : > { %8903 = vst [vmem:[#allocation116_spill] sm:$0xff] %v6328_v50  ;;  %8904 = vst [vmem:[#allocation117_spill] sm:$0xff] %v6330_v49  ;;  %v4954_v49 = vld [vmem:[#allocation2 + $0x1b1] sm:$0xff] }
 0x157   : > { %1280 = vrot.lane.b32.xlu1 %v4849_v63, %s5386_s29  ;;  %1278 = vrot.lane.b32.xlu0 %v4848_v1, %s5386_s29 }
 0x159   : > { %v6334_v2 = vpop.permute.xlu1 %1096  ;;  %v6336_v3 = vpop.permute.xlu0 %1094 }
 0x15a   : > { %8905 = vst [vmem:[#allocation118_spill] sm:$0xff] %v6334_v2  ;;  %8906 = vst [vmem:[#allocation119_spill] sm:$0xff] %v6336_v3 }
 0x15b   : > { %1356 = vrot.lane.b32.xlu1 %v5828_v8, %s5387_s30  ;;  %1354 = vrot.lane.b32.xlu0 %v5830_v10, %s5387_s30 }
 0x15d   : > { %v6342_v4 = vpop.permute.xlu1 %1100  ;;  %v6344_v5 = vpop.permute.xlu0 %1098 }
 0x15e   : > { %8907 = vst [vmem:[#allocation120_spill] sm:$0xff] %v6342_v4  ;;  %8908 = vst [vmem:[#allocation121_spill] sm:$0xff] %v6344_v5  ;;  %v2192_v5 = vld [vmem:[%s8737_s1 + $0x10] sm:$0xff] }
 0x15f   : > { %1360 = vrot.lane.b32.xlu1 %v5836_v11, %s5387_s30  ;;  %1358 = vrot.lane.b32.xlu0 %v5838_v12, %s5387_s30  ;;  %v4927_v4 = vld [vmem:[#allocation2 + $0x69] sm:$0xff] }
 0x161   : > { %v6350_v63 = vpop.permute.xlu1 %1104  ;;  %v6352_v1 = vpop.permute.xlu0 %1102 }
 0x162   : > { %8909 = vst [vmem:[#allocation122_spill] sm:$0xff] %v6350_v63  ;;  %8910 = vst [vmem:[#allocation123_spill] sm:$0xff] %v6352_v1 }
 0x163   : > { %1364 = vrot.lane.b32.xlu1 %v5844_v13, %s5387_s30  ;;  %1362 = vrot.lane.b32.xlu0 %v5846_v14, %s5387_s30 }
 0x165   : > { %v6358_v8 = vpop.permute.xlu1 %1108  ;;  %v6360_v10 = vpop.permute.xlu0 %1106 }
 0x166   : > { %8911 = vst [vmem:[#allocation124_spill] sm:$0xff] %v6358_v8  ;;  %8912 = vst [vmem:[#allocation125_spill] sm:$0xff] %v6360_v10  ;;  %v8989_v8 = vld [vmem:[#allocation86_spill] sm:$0xff] }
 0x167   : > { %1368 = vrot.lane.b32.xlu1 %v5852_v15, %s5387_s30  ;;  %1366 = vrot.lane.b32.xlu0 %v5854_v16, %s5387_s30 }
 0x169   : > { %v6366_v11 = vpop.permute.xlu1 %1112  ;;  %v6368_v12 = vpop.permute.xlu0 %1110 }
 0x16a   : > { %8913 = vst [vmem:[#allocation126_spill] sm:$0xff] %v6366_v11  ;;  %8914 = vst [vmem:[#allocation127_spill] sm:$0xff] %v6368_v12  ;;  %v8957_v11 = vld [vmem:[#allocation46_spill] sm:$0xff] }
 0x16b   : > { %1372 = vrot.lane.b32.xlu1 %v5860_v17, %s5387_s30  ;;  %1370 = vrot.lane.b32.xlu0 %v5862_v18, %s5387_s30 }
 0x16d   : > { %v6374_v13 = vpop.permute.xlu1 %1116  ;;  %v6376_v14 = vpop.permute.xlu0 %1114 }
 0x16e   : > { %8915 = vst [vmem:[#allocation128_spill] sm:$0xff] %v6374_v13  ;;  %8916 = vst [vmem:[#allocation129_spill] sm:$0xff] %v6376_v14 }
 0x16f   : > { %1376 = vrot.lane.b32.xlu1 %v5868_v19, %s5387_s30  ;;  %1374 = vrot.lane.b32.xlu0 %v5870_v20, %s5387_s30 }
 0x171   : > { %v6382_v15 = vpop.permute.xlu1 %1120  ;;  %v6384_v16 = vpop.permute.xlu0 %1118 }
 0x172   : > { %8917 = vst [vmem:[#allocation130_spill] sm:$0xff] %v6382_v15  ;;  %8918 = vst [vmem:[#allocation131_spill] sm:$0xff] %v6384_v16  ;;  %v4886_v16 = vld [vmem:[#allocation2 + $0x30] sm:$0xff] }
 0x173   : > { %1380 = vrot.lane.b32.xlu1 %v5876_v21, %s5387_s30  ;;  %1378 = vrot.lane.b32.xlu0 %v5878_v22, %s5387_s30 }
 0x175   : > { %v6390_v17 = vpop.permute.xlu1 %1124  ;;  %v6392_v18 = vpop.permute.xlu0 %1122 }
 0x176   : > { %8919 = vst [vmem:[#allocation132_spill] sm:$0xff] %v6390_v17  ;;  %8920 = vst [vmem:[#allocation133_spill] sm:$0xff] %v6392_v18  ;;  %v8940_v17 = vld [vmem:[#allocation27_spill] sm:$0xff] }
 0x177   : > { %1384 = vrot.lane.b32.xlu1 %v5884_v23, %s5387_s30  ;;  %1382 = vrot.lane.b32.xlu0 %v5886_v26, %s5387_s30 }
 0x179   : > { %v6398_v19 = vpop.permute.xlu1 %1128  ;;  %v6400_v20 = vpop.permute.xlu0 %1126 }
 0x17a   : > { %8921 = vst [vmem:[#allocation134_spill] sm:$0xff] %v6398_v19  ;;  %8922 = vst [vmem:[#allocation135_spill] sm:$0xff] %v6400_v20  ;;  %v8934_v19 = vld [vmem:[#allocation19_spill] sm:$0xff] }
 0x17b   : > { %1388 = vrot.lane.b32.xlu1 %v5892_v27, %s5387_s30  ;;  %1386 = vrot.lane.b32.xlu0 %v5894_v28, %s5387_s30  ;;  %v8927_v27 = vld [vmem:[#allocation4_spill] sm:$0xff] }
 0x17d   : > { %v6406_v21 = vpop.permute.xlu1 %1132  ;;  %v6408_v22 = vpop.permute.xlu0 %1130 }
 0x17e   : > { %8923 = vst [vmem:[#allocation136_spill] sm:$0xff] %v6406_v21  ;;  %8924 = vst [vmem:[#allocation137_spill] sm:$0xff] %v6408_v22  ;;  %v8928_v22 = vld [vmem:[#allocation7_spill] sm:$0xff] }
 0x17f   : > { %1392 = vrot.lane.b32.xlu1 %v5900_v29, %s5387_s30  ;;  %1390 = vrot.lane.b32.xlu0 %v5902_v34, %s5387_s30  ;;  %v8929_v29 = vld [vmem:[#allocation8_spill] sm:$0xff] }
 0x181   : > { %v6414_v23 = vpop.permute.xlu1 %1136  ;;  %v6416_v26 = vpop.permute.xlu0 %1134 }
 0x182   : > { %8925 = vst [vmem:[#allocation138_spill] sm:$0xff] %v6414_v23  ;;  %8926 = vst [vmem:[#allocation139_spill] sm:$0xff] %v6416_v26  ;;  %v8930_v26 = vld [vmem:[#allocation11_spill] sm:$0xff] }
 0x183   : > { %1396 = vrot.lane.b32.xlu1 %v5908_v35, %s5387_s30  ;;  %1394 = vrot.lane.b32.xlu0 %v8927_v27, %s5387_s30  ;;  %v8931_v35 = vld [vmem:[#allocation12_spill] sm:$0xff] }
 0x185   : > { %v6422_v28 = vpop.permute.xlu1 %1212  ;;  %v6424_v21 = vpop.permute.xlu0 %1210 }
 0x187   : > { %1400 = vrot.lane.b32.xlu1 %v8928_v22, %s5387_s30  ;;  %1398 = vrot.lane.b32.xlu0 %v8929_v29, %s5387_s30  ;;  %v8933_v22 = vld [vmem:[#allocation16_spill] sm:$0xff] }
 0x189   : > { %v6430_v34 = vpop.permute.xlu1 %1216  ;;  %v6432_v23 = vpop.permute.xlu0 %1214 }
 0x18b   : > { %1404 = vrot.lane.b32.xlu1 %v8930_v26, %s5387_s30  ;;  %1402 = vrot.lane.b32.xlu0 %v8931_v35, %s5387_s30  ;;  %v8935_v26 = vld [vmem:[#allocation20_spill] sm:$0xff] }
 0x18d   : > { %v6438_v27 = vpop.permute.xlu1 %1220  ;;  %v6440_v48 = vpop.permute.xlu0 %1218 }
 0x18f   : > { %1408 = vrot.lane.b32.xlu1 %v8932_v47, %s5387_s30  ;;  %1406 = vrot.lane.b32.xlu0 %v8933_v22, %s5387_s30  ;;  %v8937_v47 = vld [vmem:[#allocation24_spill] sm:$0xff] }
 0x191   : > { %v6446_v29 = vpop.permute.xlu1 %1224  ;;  %v6448_v20 = vpop.permute.xlu0 %1222 }
 0x193   : > { %1412 = vrot.lane.b32.xlu1 %v8934_v19, %s5387_s30  ;;  %1410 = vrot.lane.b32.xlu0 %v8935_v26, %s5387_s30  ;;  %v8941_v19 = vld [vmem:[#allocation28_spill] sm:$0xff]  ;;  %v6470_v26 = vld [vmem:[#allocation2 + $0x1ba] sm:$0xff] }
 0x195   : > { %v6454_v35 = vpop.permute.xlu1 %1228  ;;  %v6456_v46 = vpop.permute.xlu0 %1226 }
 0x197   : > { %1416 = vrot.lane.b32.xlu1 %v8936_v45, %s5387_s30  ;;  %1414 = vrot.lane.b32.xlu0 %v8937_v47, %s5387_s30  ;;  %v4887_v47 = vld [vmem:[#allocation2 + $0x38] sm:$0xff] }
 0x199   : > { %v6462_v22 = vpop.permute.xlu1 %1232  ;;  %v6464_v18 = vpop.permute.xlu0 %1230 }
 0x19a   : > { %8938 = vst [vmem:[#allocation4_spill] sm:$0xff] %v6462_v22  ;;  %8939 = vst [vmem:[#allocation7_spill] sm:$0xff] %v6464_v18  ;;  %v9049_v22 = vld [vmem:[#allocation10_spill] sm:$0xff] }
 0x19b   : > { %1420 = vrot.lane.b32.xlu1 %v8940_v17, %s5387_s30  ;;  %1418 = vrot.lane.b32.xlu0 %v8941_v19, %s5387_s30  ;;  %v4889_v19 = vld [vmem:[#allocation2 + $0x50] sm:$0xff] }
 0x19d   : > { %v6474_v43 = vpop.permute.xlu1 %1236  ;;  %v6476_v45 = vpop.permute.xlu0 %1234 }
 0x19e   : > { %8942 = vst [vmem:[#allocation8_spill] sm:$0xff] %v6474_v43  ;;  %8943 = vst [vmem:[#allocation11_spill] sm:$0xff] %v6476_v45 }
 0x19f   : > { %1424 = vrot.lane.b32.xlu1 %v6470_v26, %s5387_s30  ;;  %1422 = vrot.lane.b32.xlu0 %v6472_v44, %s5387_s30 }
 0x1a1   : > { %v6482_v17 = vpop.permute.xlu1 %1240  ;;  %v6484_v15 = vpop.permute.xlu0 %1238 }
 0x1a2   : > { %8944 = vst [vmem:[#allocation12_spill] sm:$0xff] %v6482_v17  ;;  %8945 = vst [vmem:[#allocation15_spill] sm:$0xff] %v6484_v15 }
 0x1a3   : > { %1500 = vrot.lane.b32.xlu1 %v4887_v47, %s5388_s6  ;;  %1498 = vrot.lane.b32.xlu0 %v4886_v16, %s5388_s6  ;;  %v8950_v47 = vld [vmem:[#allocation39_spill] sm:$0xff] }
 0x1a5   : > { %v6488_v33 = vpop.permute.xlu1 %1244  ;;  %v6490_v32 = vpop.permute.xlu0 %1242 }
 0x1a6   : > { %8946 = vst [vmem:[#allocation16_spill] sm:$0xff] %v6488_v33  ;;  %8947 = vst [vmem:[#allocation19_spill] sm:$0xff] %v6490_v32 }
 0x1a7   : > { %1504 = vrot.lane.b32.xlu1 %v4889_v19, %s5388_s6  ;;  %1502 = vrot.lane.b32.xlu0 %v6008_v36, %s5388_s6  ;;  %v8954_v19 = vld [vmem:[#allocation43_spill] sm:$0xff] }
 0x1a9   : > { %v6495_v14 = vpop.permute.xlu1 %1248  ;;  %v6497_v13 = vpop.permute.xlu0 %1246 }
 0x1aa   : > { %8948 = vst [vmem:[#allocation20_spill] sm:$0xff] %v6495_v14  ;;  %8949 = vst [vmem:[#allocation23_spill] sm:$0xff] %v6497_v13  ;;  %v4920_v13 = vld [vmem:[#allocation2 + $0x1c8] sm:$0xff] }
 0x1ab   : > { %1508 = vrot.lane.b32.xlu1 %v6017_v0, %s5388_s6  ;;  %1506 = vrot.lane.b32.xlu0 %v8950_v47, %s5388_s6  ;;  %v8958_v0 = vld [vmem:[#allocation47_spill] sm:$0xff] }
 0x1ad   : > { %v6503_v16 = vpop.permute.xlu1 %1252  ;;  %v6505_v31 = vpop.permute.xlu0 %1250 }
 0x1ae   : > { %8951 = vst [vmem:[#allocation24_spill] sm:$0xff] %v6503_v16  ;;  %8952 = vst [vmem:[#allocation27_spill] sm:$0xff] %v6505_v31  ;;  %v8987_v16 = vld [vmem:[#allocation82_spill] sm:$0xff] }
 0x1af   : > { %1512 = vrot.lane.b32.xlu1 %v8953_v30, %s5388_s6  ;;  %1510 = vrot.lane.b32.xlu0 %v8954_v19, %s5388_s6  ;;  %v8962_v30 = vld [vmem:[#allocation51_spill] sm:$0xff] }
 0x1b1   : > { %v6511_v36 = vpop.permute.xlu1 %1256  ;;  %v6513_v12 = vpop.permute.xlu0 %1254 }
 0x1b2   : > { %8955 = vst [vmem:[#allocation28_spill] sm:$0xff] %v6511_v36  ;;  %8956 = vst [vmem:[#allocation39_spill] sm:$0xff] %v6513_v12  ;;  %v8965_v12 = vld [vmem:[#allocation54_spill] sm:$0xff] }
 0x1b3   : > { %1516 = vrot.lane.b32.xlu1 %v8957_v11, %s5388_s6  ;;  %1514 = vrot.lane.b32.xlu0 %v8958_v0, %s5388_s6  ;;  %v8966_v11 = vld [vmem:[#allocation55_spill] sm:$0xff] }
 0x1b5   : > { %v6519_v47 = vpop.permute.xlu1 %1260  ;;  %v6521_v25 = vpop.permute.xlu0 %1258 }
 0x1b6   : > { %8959 = vst [vmem:[#allocation42_spill] sm:$0xff] %v6519_v47  ;;  %8960 = vst [vmem:[#allocation43_spill] sm:$0xff] %v6521_v25  ;;  %v8969_v25 = vld [vmem:[#allocation58_spill] sm:$0xff] }
 0x1b7   : > { %1520 = vrot.lane.b32.xlu1 %v8961_v24, %s5388_s6  ;;  %1518 = vrot.lane.b32.xlu0 %v8962_v30, %s5388_s6  ;;  %v8970_v24 = vld [vmem:[#allocation59_spill] sm:$0xff] }
 0x1b9   : > { %v6527_v19 = vpop.permute.xlu1 %1264  ;;  %v6529_v36 = vpop.permute.xlu0 %1262 }
 0x1ba   : > { %8963 = vst [vmem:[#allocation46_spill] sm:$0xff] %v6527_v19  ;;  %8964 = vst [vmem:[#allocation47_spill] sm:$0xff] %v6529_v36  ;;  %v8973_v36 = vld [vmem:[#allocation62_spill] sm:$0xff] }
 0x1bb   : > { %1524 = vrot.lane.b32.xlu1 %v8965_v12, %s5388_s6  ;;  %1522 = vrot.lane.b32.xlu0 %v8966_v11, %s5388_s6  ;;  %v8974_v12 = vld [vmem:[#allocation63_spill] sm:$0xff] }
 0x1bd   : > { %v6535_v0 = vpop.permute.xlu1 %1268  ;;  %v6537_v47 = vpop.permute.xlu0 %1266 }
 0x1be   : > { %8967 = vst [vmem:[#allocation50_spill] sm:$0xff] %v6535_v0  ;;  %8968 = vst [vmem:[#allocation51_spill] sm:$0xff] %v6537_v47  ;;  %v8977_v47 = vld [vmem:[#allocation66_spill] sm:$0xff] }
 0x1bf   : > { %1528 = vrot.lane.b32.xlu1 %v8969_v25, %s5388_s6  ;;  %1526 = vrot.lane.b32.xlu0 %v8970_v24, %s5388_s6  ;;  %v8978_v25 = vld [vmem:[#allocation67_spill] sm:$0xff] }
 0x1c1   : > { %v6543_v30 = vpop.permute.xlu1 %1272  ;;  %v6545_v19 = vpop.permute.xlu0 %1270 }
 0x1c2   : > { %8971 = vst [vmem:[#allocation54_spill] sm:$0xff] %v6543_v30  ;;  %8972 = vst [vmem:[#allocation55_spill] sm:$0xff] %v6545_v19  ;;  %v8981_v19 = vld [vmem:[#allocation70_spill] sm:$0xff] }
 0x1c3   : > { %1532 = vrot.lane.b32.xlu1 %v8973_v36, %s5388_s6  ;;  %1530 = vrot.lane.b32.xlu0 %v8974_v12, %s5388_s6  ;;  %v8982_v36 = vld [vmem:[#allocation71_spill] sm:$0xff] }
 0x1c5   : > { %v6551_v11 = vpop.permute.xlu1 %1276  ;;  %v6553_v0 = vpop.permute.xlu0 %1274 }
 0x1c6   : > { %8975 = vst [vmem:[#allocation58_spill] sm:$0xff] %v6551_v11  ;;  %8976 = vst [vmem:[#allocation59_spill] sm:$0xff] %v6553_v0  ;;  %v8983_v0 = vld [vmem:[#allocation74_spill] sm:$0xff] }
 0x1c7   : > { %1536 = vrot.lane.b32.xlu1 %v8977_v47, %s5388_s6  ;;  %1534 = vrot.lane.b32.xlu0 %v8978_v25, %s5388_s6  ;;  %v8984_v47 = vld [vmem:[#allocation75_spill] sm:$0xff] }
 0x1c9   : > { %v6559_v24 = vpop.permute.xlu1 %1280  ;;  %v6561_v30 = vpop.permute.xlu0 %1278 }
 0x1ca   : > { %8979 = vst [vmem:[#allocation62_spill] sm:$0xff] %v6559_v24  ;;  %8980 = vst [vmem:[#allocation63_spill] sm:$0xff] %v6561_v30  ;;  %v8985_v30 = vld [vmem:[#allocation78_spill] sm:$0xff] }
 0x1cb   : > { %1540 = vrot.lane.b32.xlu1 %v8981_v19, %s5388_s6  ;;  %1538 = vrot.lane.b32.xlu0 %v8982_v36, %s5388_s6  ;;  %v8986_v19 = vld [vmem:[#allocation79_spill] sm:$0xff] }
 0x1cd   : > { %v6567_v12 = vpop.permute.xlu1 %1356  ;;  %v6569_v11 = vpop.permute.xlu0 %1354 }
 0x1cf   : > { %1544 = vrot.lane.b32.xlu1 %v8983_v0, %s5388_s6  ;;  %1542 = vrot.lane.b32.xlu0 %v8984_v47, %s5388_s6  ;;  %v8988_v0 = vld [vmem:[#allocation83_spill] sm:$0xff] }
 0x1d1   : > { %v6575_v25 = vpop.permute.xlu1 %1360  ;;  %v6577_v24 = vpop.permute.xlu0 %1358 }
 0x1d3   : > { %1548 = vrot.lane.b32.xlu1 %v8985_v30, %s5388_s6  ;;  %1546 = vrot.lane.b32.xlu0 %v8986_v19, %s5388_s6  ;;  %v8990_v30 = vld [vmem:[#allocation87_spill] sm:$0xff] }
 0x1d5   : > { %v6583_v36 = vpop.permute.xlu1 %1364  ;;  %v6585_v31 = vpop.permute.xlu0 %1362 }
 0x1d7   : > { %1552 = vrot.lane.b32.xlu1 %v8987_v16, %s5388_s6  ;;  %1550 = vrot.lane.b32.xlu0 %v8988_v0, %s5388_s6 }
 0x1d9   : > { %v6591_v47 = vpop.permute.xlu1 %1368  ;;  %v6593_v10 = vpop.permute.xlu0 %1366 }
 0x1db   : > { %1556 = vrot.lane.b32.xlu1 %v8989_v8, %s5388_s6  ;;  %1554 = vrot.lane.b32.xlu0 %v8990_v30, %s5388_s6  ;;  %v8994_v8 = vld [vmem:[#allocation91_spill] sm:$0xff]  ;;  %v4921_v30 = vld [vmem:[#allocation2 + $0x1d0] sm:$0xff] }
 0x1dd   : > { %v6599_v19 = vpop.permute.xlu1 %1372  ;;  %v6601_v7 = vpop.permute.xlu0 %1370 }
 0x1df   : > { %1560 = vrot.lane.b32.xlu1 %v8991_v9, %s5388_s6  ;;  %1558 = vrot.lane.b32.xlu0 %v6175_v42, %s5388_s6  ;;  %v4923_v42 = vld [vmem:[#allocation2 + $0x39] sm:$0xff]  ;;  %v4922_v9 = vld [vmem:[#allocation2 + $0x31] sm:$0xff] }
 0x1e1   : > { %v6607_v16 = vpop.permute.xlu1 %1376  ;;  %v6609_v0 = vpop.permute.xlu0 %1374 }
 0x1e2   : > { %8992 = vst [vmem:[#allocation66_spill] sm:$0xff] %v6607_v16  ;;  %8993 = vst [vmem:[#allocation67_spill] sm:$0xff] %v6609_v0 }
 0x1e3   : > { %1564 = vrot.lane.b32.xlu1 %v6181_v38, %s5388_s6  ;;  %1562 = vrot.lane.b32.xlu0 %v8994_v8, %s5388_s6  ;;  %v2190_v38 = vld [vmem:[%s8737_s1] sm:$0xff]  ;;  %v2191_v8 = vld [vmem:[%s8737_s1 + $0x8] sm:$0xff] }
 0x1e4   : > { %v5270_v40 = vpack.c.bf16 %v2191_v8, %v2190_v38  ;;  %v4926_v38 = vld [vmem:[#allocation2 + $0x61] sm:$0xff] }
 0x1e5   : > { %v6615_v14 = vpop.permute.xlu1 %1380  ;;  %v6617_v1 = vpop.permute.xlu0 %1378 }
 0x1e6   : > { %8995 = vst [vmem:[#allocation70_spill] sm:$0xff] %v6615_v14  ;;  %8996 = vst [vmem:[#allocation71_spill] sm:$0xff] %v6617_v1  ;;  %5271 = vmatprep.subr.bf16.mxu0 %v5270_v40 }
 0x1e7   : > { %1568 = vrot.lane.b32.xlu1 %v4921_v30, %s5388_s6  ;;  %1566 = vrot.lane.b32.xlu0 %v4920_v13, %s5388_s6  ;;  %v4925_v13 = vld [vmem:[#allocation2 + $0x51] sm:$0xff]  ;;  %v4924_v30 = vld [vmem:[#allocation2 + $0x49] sm:$0xff] }
 0x1e8   : > { %5273 = vmatpush3.bf16.msra.mxu0 %v5270_v40 }
 0x1e9   : > { %v6621_v63 = vpop.permute.xlu1 %1384  ;;  %v6623_v6 = vpop.permute.xlu0 %1382 }
 0x1ea   : > { %8997 = vst [vmem:[#allocation74_spill] sm:$0xff] %v6621_v63  ;;  %8998 = vst [vmem:[#allocation75_spill] sm:$0xff] %v6623_v6 }
 0x1eb   : > { %1644 = vrot.lane.b32.xlu1 %v4923_v42, %s5389_s9  ;;  %1642 = vrot.lane.b32.xlu0 %v4922_v9, %s5389_s9  ;;  %v2193_v42 = vld [vmem:[%s8737_s1 + $0x18] sm:$0xff] }
 0x1ec   : > { %v5274_v9 = vpack.c.bf16 %v2193_v42, %v2192_v5 }
 0x1ed   : > { %v6633_v32 = vpop.permute.xlu1 %1388  ;;  %v6635_v33 = vpop.permute.xlu0 %1386 }
 0x1ee   : > { %8999 = vst [vmem:[#allocation78_spill] sm:$0xff] %v6633_v32  ;;  %9000 = vst [vmem:[#allocation79_spill] sm:$0xff] %v6635_v33  ;;  %5275 = vmatprep.subr.bf16.mxu0 %v5274_v9  ;;  %v4929_v32 = vld [vmem:[#allocation2 + $0x81] sm:$0xff] }
 0x1ef   : > { %1648 = vrot.lane.b32.xlu1 %v4925_v13, %s5389_s9  ;;  %1646 = vrot.lane.b32.xlu0 %v4924_v30, %s5389_s9  ;;  %v2194_v13 = vld [vmem:[%s8737_s1 + $0x20] sm:$0xf]  ;;  %v4930_v30 = vld [vmem:[#allocation2 + $0x91] sm:$0xff] }
 0x1f0   : > { %5277 = vmatpush3.bf16.msra.mxu0 %v5274_v9 }
 0x1f1   : > { %v6645_v8 = vpop.permute.xlu1 %1392  ;;  %v6647_v33 = vpop.permute.xlu0 %1390  ;;  %5156 = vmatprep.subr.msk.mxu0 %vm2311_vm3, %v2194_v13 }
 0x1f2   : > { %9001 = vst [vmem:[#allocation82_spill] sm:$0xff] %v6645_v8  ;;  %9002 = vst [vmem:[#allocation83_spill] sm:$0xff] %v6647_v33 }
 0x1f3   : > { %1652 = vrot.lane.b32.xlu1 %v4927_v4, %s5389_s9  ;;  %1650 = vrot.lane.b32.xlu0 %v4926_v38, %s5389_s9  ;;  %v4931_v4 = vld [vmem:[#allocation2 + $0x99] sm:$0xff] }
 0x1f4   : > { %5157 = vmatpush3.msk.msra.mxu0 %vm2311_vm3, %v2194_v13  ;;  %v4958_v38 = vld [vmem:[#allocation2 + $0x32] sm:$0xff] }
 0x1f5   : > { %v6654_v5 = vpop.permute.xlu1 %1396  ;;  %v6656_v40 = vpop.permute.xlu0 %1394 }
 0x1f6   : > { %9003 = vst [vmem:[#allocation86_spill] sm:$0xff] %v6654_v5  ;;  %9004 = vst [vmem:[#allocation87_spill] sm:$0xff] %v6656_v40  ;;  %v4932_v40 = vld [vmem:[#allocation2 + $0xa9] sm:$0xff] }
 0x1f7   : > { %1656 = vrot.lane.b32.xlu1 %v4929_v32, %s5389_s9  ;;  %1654 = vrot.lane.b32.xlu0 %v4928_v39, %s5389_s9  ;;  %v4960_v39 = vld [vmem:[#allocation2 + $0x4a] sm:$0xff]  ;;  %v4959_v32 = vld [vmem:[#allocation2 + $0x3a] sm:$0xff] }
 0x1f9   : > { %v6662_v42 = vpop.permute.xlu1 %1400  ;;  %v6664_v9 = vpop.permute.xlu0 %1398 }
 0x1fa   : > { %9005 = vst [vmem:[#allocation90_spill] sm:$0xff] %v6662_v42  ;;  %9006 = vst [vmem:[#allocation91_spill] sm:$0xff] %v6664_v9 }
 0x1fb   : > { %1660 = vrot.lane.b32.xlu1 %v4931_v4, %s5389_s9  ;;  %1658 = vrot.lane.b32.xlu0 %v4930_v30, %s5389_s9  ;;  %v4962_v4 = vld [vmem:[#allocation2 + $0x62] sm:$0xff]  ;;  %v4961_v30 = vld [vmem:[#allocation2 + $0x52] sm:$0xff] }
 0x1fd   : > { %v6668_v5 = vpop.permute.xlu1 %1404  ;;  %v6670_v33 = vpop.permute.xlu0 %1402 }
 0x1fe   : > { %9007 = vst [vmem:[#allocation140_spill] sm:$0xff] %v6668_v5  ;;  %9008 = vst [vmem:[#allocation141_spill] sm:$0xff] %v6670_v33 }
 0x1ff   : > { %1786 = vrot.lane.b32.xlu1 %v4958_v38, %s5390_s23  ;;  %1662 = vrot.lane.b32.xlu0 %v4932_v40, %s5389_s9  ;;  %v4964_v40 = vld [vmem:[#allocation2 + $0x7a] sm:$0xff]  ;;  %v4963_v38 = vld [vmem:[#allocation2 + $0x6a] sm:$0xff] }
 0x201   : > { %v6674_v13 = vpop.permute.xlu1 %1408  ;;  %v6676_v9 = vpop.permute.xlu0 %1406 }
 0x202   : > { %9009 = vst [vmem:[#allocation142_spill] sm:$0xff] %v6674_v13  ;;  %9010 = vst [vmem:[#allocation143_spill] sm:$0xff] %v6676_v9 }
 0x203   : > { %1790 = vrot.lane.b32.xlu1 %v4960_v39, %s5390_s23  ;;  %1788 = vrot.lane.b32.xlu0 %v4959_v32, %s5390_s23  ;;  %v4966_v39 = vld [vmem:[#allocation2 + $0x92] sm:$0xff]  ;;  %v4965_v32 = vld [vmem:[#allocation2 + $0x82] sm:$0xff] }
 0x205   : > { %v6680_v5 = vpop.permute.xlu1 %1412  ;;  %v6682_v33 = vpop.permute.xlu0 %1410 }
 0x206   : > { %9011 = vst [vmem:[#allocation144_spill] sm:$0xff] %v6680_v5  ;;  %9012 = vst [vmem:[#allocation145_spill] sm:$0xff] %v6682_v33 }
 0x207   : > { %1794 = vrot.lane.b32.xlu1 %v4962_v4, %s5390_s23  ;;  %1792 = vrot.lane.b32.xlu0 %v4961_v30, %s5390_s23  ;;  %v4933_v4 = vld [vmem:[#allocation2 + $0xb1] sm:$0xff]  ;;  %v4967_v30 = vld [vmem:[#allocation2 + $0x9a] sm:$0xff] }
 0x209   : > { %v6686_v42 = vpop.permute.xlu1 %1416  ;;  %v6688_v13 = vpop.permute.xlu0 %1414 }
 0x20a   : > { %9013 = vst [vmem:[#allocation146_spill] sm:$0xff] %v6686_v42  ;;  %9014 = vst [vmem:[#allocation147_spill] sm:$0xff] %v6688_v13 }
 0x20b   : > { %1798 = vrot.lane.b32.xlu1 %v4964_v40, %s5390_s23  ;;  %1796 = vrot.lane.b32.xlu0 %v4963_v38, %s5390_s23  ;;  %v4969_v40 = vld [vmem:[#allocation2 + $0xb2] sm:$0xff]  ;;  %v4968_v38 = vld [vmem:[#allocation2 + $0xaa] sm:$0xff] }
 0x20d   : > { %v6692_v9 = vpop.permute.xlu1 %1420  ;;  %v6694_v5 = vpop.permute.xlu0 %1418 }
 0x20e   : > { %9015 = vst [vmem:[#allocation148_spill] sm:$0xff] %v6692_v9  ;;  %9016 = vst [vmem:[#allocation149_spill] sm:$0xff] %v6694_v5 }
 0x20f   : > { %1802 = vrot.lane.b32.xlu1 %v4966_v39, %s5390_s23  ;;  %1800 = vrot.lane.b32.xlu0 %v4965_v32, %s5390_s23  ;;  %v4935_v39 = vld [vmem:[#allocation2 + $0xc9] sm:$0xff]  ;;  %v4934_v32 = vld [vmem:[#allocation2 + $0xc1] sm:$0xff] }
 0x211   : > { %v6698_v33 = vpop.permute.xlu1 %1424  ;;  %v6700_v42 = vpop.permute.xlu0 %1422 }
 0x212   : > { %9017 = vst [vmem:[#allocation150_spill] sm:$0xff] %v6698_v33  ;;  %9018 = vst [vmem:[#allocation151_spill] sm:$0xff] %v6700_v42 }
 0x213   : > { %1664 = vrot.lane.b32.xlu1 %v4933_v4, %s5389_s9  ;;  %1804 = vrot.lane.b32.xlu0 %v4967_v30, %s5390_s23  ;;  %v4971_v4 = vld [vmem:[#allocation2 + $0xca] sm:$0xff]  ;;  %v4970_v30 = vld [vmem:[#allocation2 + $0xc2] sm:$0xff] }
 0x215   : > { %v6704_v13 = vpop.permute.xlu1 %1500  ;;  %v6706_v9 = vpop.permute.xlu0 %1498 }
 0x217   : > { %1808 = vrot.lane.b32.xlu1 %v4969_v40, %s5390_s23  ;;  %1806 = vrot.lane.b32.xlu0 %v4968_v38, %s5390_s23  ;;  %v4937_v40 = vld [vmem:[#allocation2 + $0xe1] sm:$0xff]  ;;  %v4936_v38 = vld [vmem:[#allocation2 + $0xd9] sm:$0xff] }
 0x219   : > { %v6710_v5 = vpop.permute.xlu1 %1504  ;;  %v6712_v33 = vpop.permute.xlu0 %1502 }
 0x21b   : > { %1668 = vrot.lane.b32.xlu1 %v4935_v39, %s5389_s9  ;;  %1666 = vrot.lane.b32.xlu0 %v4934_v32, %s5389_s9  ;;  %v4973_v39 = vld [vmem:[#allocation2 + $0xe2] sm:$0xff]  ;;  %v4972_v32 = vld [vmem:[#allocation2 + $0xda] sm:$0xff] }
 0x21d   : > { %v6716_v42 = vpop.permute.xlu1 %1508  ;;  %v6718_v8 = vpop.permute.xlu0 %1506 }
 0x21f   : > { %1812 = vrot.lane.b32.xlu1 %v4971_v4, %s5390_s23  ;;  %1810 = vrot.lane.b32.xlu0 %v4970_v30, %s5390_s23  ;;  %v4939_v4 = vld [vmem:[#allocation2 + $0xf9] sm:$0xff]  ;;  %v4938_v30 = vld [vmem:[#allocation2 + $0xf1] sm:$0xff] }
 0x221   : > { %v6722_v37 = vpop.permute.xlu1 %1512  ;;  %v6724_v6 = vpop.permute.xlu0 %1510 }
 0x223   : > { %1672 = vrot.lane.b32.xlu1 %v4937_v40, %s5389_s9  ;;  %1670 = vrot.lane.b32.xlu0 %v4936_v38, %s5389_s9  ;;  %v4975_v40 = vld [vmem:[#allocation2 + $0xfa] sm:$0xff]  ;;  %v4974_v38 = vld [vmem:[#allocation2 + $0xf2] sm:$0xff] }
 0x225   : > { %v6728_v63 = vpop.permute.xlu1 %1516  ;;  %v6730_v15 = vpop.permute.xlu0 %1514 }
 0x227   : > { %1816 = vrot.lane.b32.xlu1 %v4973_v39, %s5390_s23  ;;  %1814 = vrot.lane.b32.xlu0 %v4972_v32, %s5390_s23  ;;  %v4941_v39 = vld [vmem:[#allocation2 + $0x111] sm:$0xff]  ;;  %v4940_v32 = vld [vmem:[#allocation2 + $0x109] sm:$0xff] }
 0x229   : > { %v6734_v17 = vpop.permute.xlu1 %1520  ;;  %v6736_v3 = vpop.permute.xlu0 %1518 }
 0x22a   : > { %9019 = vst [vmem:[#allocation152_spill] sm:$0xff] %v6734_v17  ;;  %9020 = vst [vmem:[#allocation153_spill] sm:$0xff] %v6736_v3  ;;  %v9046_v17 = vld [vmem:[#allocation69_spill] sm:$0xff] }
 0x22b   : > { %1676 = vrot.lane.b32.xlu1 %v4939_v4, %s5389_s9  ;;  %1674 = vrot.lane.b32.xlu0 %v4938_v30, %s5389_s9  ;;  %v4977_v4 = vld [vmem:[#allocation2 + $0x112] sm:$0xff]  ;;  %v4976_v30 = vld [vmem:[#allocation2 + $0x10a] sm:$0xff] }
 0x22d   : > { %v6740_v2 = vpop.permute.xlu1 %1524  ;;  %v6742_v41 = vpop.permute.xlu0 %1522 }
 0x22e   : > { %9021 = vst [vmem:[#allocation154_spill] sm:$0xff] %v6740_v2  ;;  %9022 = vst [vmem:[#allocation155_spill] sm:$0xff] %v6742_v41 }
 0x22f   : > { %1820 = vrot.lane.b32.xlu1 %v4975_v40, %s5390_s23  ;;  %1818 = vrot.lane.b32.xlu0 %v4974_v38, %s5390_s23  ;;  %v4943_v40 = vld [vmem:[#allocation2 + $0x129] sm:$0xff]  ;;  %v4942_v38 = vld [vmem:[#allocation2 + $0x121] sm:$0xff] }
 0x231   : > { %v6746_v1 = vpop.permute.xlu1 %1528  ;;  %v6748_v14 = vpop.permute.xlu0 %1526 }
 0x232   : > { %9023 = vst [vmem:[#allocation156_spill] sm:$0xff] %v6746_v1  ;;  %9024 = vst [vmem:[#allocation157_spill] sm:$0xff] %v6748_v14 }
 0x233   : > { %1680 = vrot.lane.b32.xlu1 %v4941_v39, %s5389_s9  ;;  %1678 = vrot.lane.b32.xlu0 %v4940_v32, %s5389_s9  ;;  %v4979_v39 = vld [vmem:[#allocation2 + $0x12a] sm:$0xff]  ;;  %v4978_v32 = vld [vmem:[#allocation2 + $0x122] sm:$0xff] }
 0x235   : > { %v6752_v45 = vpop.permute.xlu1 %1532  ;;  %v6754_v2 = vpop.permute.xlu0 %1530 }
 0x236   : > { %9025 = vst [vmem:[#allocation158_spill] sm:$0xff] %v6752_v45  ;;  %9026 = vst [vmem:[#allocation159_spill] sm:$0xff] %v6754_v2 }
 0x237   : > { %1824 = vrot.lane.b32.xlu1 %v4977_v4, %s5390_s23  ;;  %1822 = vrot.lane.b32.xlu0 %v4976_v30, %s5390_s23  ;;  %v4945_v4 = vld [vmem:[#allocation2 + $0x141] sm:$0xff]  ;;  %v4944_v30 = vld [vmem:[#allocation2 + $0x139] sm:$0xff] }
 0x239   : > { %v6758_v41 = vpop.permute.xlu1 %1536  ;;  %v6760_v1 = vpop.permute.xlu0 %1534 }
 0x23a   : > { %9027 = vst [vmem:[#allocation160_spill] sm:$0xff] %v6758_v41  ;;  %9028 = vst [vmem:[#allocation161_spill] sm:$0xff] %v6760_v1 }
 0x23b   : > { %1684 = vrot.lane.b32.xlu1 %v4943_v40, %s5389_s9  ;;  %1682 = vrot.lane.b32.xlu0 %v4942_v38, %s5389_s9  ;;  %v4981_v40 = vld [vmem:[#allocation2 + $0x142] sm:$0xff]  ;;  %v4980_v38 = vld [vmem:[#allocation2 + $0x13a] sm:$0xff] }
 0x23d   : > { %v6764_v14 = vpop.permute.xlu1 %1540  ;;  %v6766_v45 = vpop.permute.xlu0 %1538 }
 0x23e   : > { %9029 = vst [vmem:[#allocation162_spill] sm:$0xff] %v6764_v14  ;;  %9030 = vst [vmem:[#allocation163_spill] sm:$0xff] %v6766_v45 }
 0x23f   : > { %1828 = vrot.lane.b32.xlu1 %v4979_v39, %s5390_s23  ;;  %1826 = vrot.lane.b32.xlu0 %v4978_v32, %s5390_s23  ;;  %v4947_v39 = vld [vmem:[#allocation2 + $0x159] sm:$0xff]  ;;  %v4946_v32 = vld [vmem:[#allocation2 + $0x151] sm:$0xff] }
 0x241   : > { %v6770_v2 = vpop.permute.xlu1 %1544  ;;  %v6772_v41 = vpop.permute.xlu0 %1542 }
 0x242   : > { %9031 = vst [vmem:[#allocation164_spill] sm:$0xff] %v6770_v2  ;;  %9032 = vst [vmem:[#allocation165_spill] sm:$0xff] %v6772_v41 }
 0x243   : > { %1688 = vrot.lane.b32.xlu1 %v4945_v4, %s5389_s9  ;;  %1686 = vrot.lane.b32.xlu0 %v4944_v30, %s5389_s9  ;;  %v4983_v4 = vld [vmem:[#allocation2 + $0x15a] sm:$0xff]  ;;  %v4982_v30 = vld [vmem:[#allocation2 + $0x152] sm:$0xff] }
 0x245   : > { %v6776_v1 = vpop.permute.xlu1 %1548  ;;  %v6778_v14 = vpop.permute.xlu0 %1546 }
 0x246   : > { %9033 = vst [vmem:[#allocation166_spill] sm:$0xff] %v6776_v1  ;;  %9034 = vst [vmem:[#allocation167_spill] sm:$0xff] %v6778_v14 }
 0x247   : > { %1832 = vrot.lane.b32.xlu1 %v4981_v40, %s5390_s23  ;;  %1830 = vrot.lane.b32.xlu0 %v4980_v38, %s5390_s23  ;;  %v4949_v40 = vld [vmem:[#allocation2 + $0x171] sm:$0xff]  ;;  %v4948_v38 = vld [vmem:[#allocation2 + $0x169] sm:$0xff] }
 0x249   : > { %v6782_v45 = vpop.permute.xlu1 %1552  ;;  %v6784_v2 = vpop.permute.xlu0 %1550 }
 0x24a   : > { %9035 = vst [vmem:[#allocation168_spill] sm:$0xff] %v6782_v45  ;;  %9036 = vst [vmem:[#allocation169_spill] sm:$0xff] %v6784_v2 }
 0x24b   : > { %1692 = vrot.lane.b32.xlu1 %v4947_v39, %s5389_s9  ;;  %1690 = vrot.lane.b32.xlu0 %v4946_v32, %s5389_s9  ;;  %v4985_v39 = vld [vmem:[#allocation2 + $0x172] sm:$0xff]  ;;  %v4984_v32 = vld [vmem:[#allocation2 + $0x16a] sm:$0xff] }
 0x24d   : > { %v6788_v41 = vpop.permute.xlu1 %1556  ;;  %v6790_v1 = vpop.permute.xlu0 %1554 }
 0x24e   : > { %9037 = vst [vmem:[#allocation170_spill] sm:$0xff] %v6788_v41  ;;  %9038 = vst [vmem:[#allocation171_spill] sm:$0xff] %v6790_v1 }
 0x24f   : > { %1836 = vrot.lane.b32.xlu1 %v4983_v4, %s5390_s23  ;;  %1834 = vrot.lane.b32.xlu0 %v4982_v30, %s5390_s23  ;;  %v4951_v4 = vld [vmem:[#allocation2 + $0x189] sm:$0xff]  ;;  %v4950_v30 = vld [vmem:[#allocation2 + $0x181] sm:$0xff] }
 0x251   : > { %v6794_v14 = vpop.permute.xlu1 %1560  ;;  %v6796_v45 = vpop.permute.xlu0 %1558 }
 0x252   : > { %9039 = vst [vmem:[#allocation172_spill] sm:$0xff] %v6794_v14  ;;  %9040 = vst [vmem:[#allocation173_spill] sm:$0xff] %v6796_v45 }
 0x253   : > { %1696 = vrot.lane.b32.xlu1 %v4949_v40, %s5389_s9  ;;  %1694 = vrot.lane.b32.xlu0 %v4948_v38, %s5389_s9  ;;  %v4987_v40 = vld [vmem:[#allocation2 + $0x18a] sm:$0xff]  ;;  %v4986_v38 = vld [vmem:[#allocation2 + $0x182] sm:$0xff] }
 0x255   : > { %v6800_v2 = vpop.permute.xlu1 %1564  ;;  %v6802_v41 = vpop.permute.xlu0 %1562 }
 0x256   : > { %9041 = vst [vmem:[#allocation174_spill] sm:$0xff] %v6800_v2  ;;  %9042 = vst [vmem:[#allocation175_spill] sm:$0xff] %v6802_v41 }
 0x257   : > { %1840 = vrot.lane.b32.xlu1 %v4985_v39, %s5390_s23  ;;  %1838 = vrot.lane.b32.xlu0 %v4984_v32, %s5390_s23  ;;  %v4953_v39 = vld [vmem:[#allocation2 + $0x1a1] sm:$0xff]  ;;  %v4952_v32 = vld [vmem:[#allocation2 + $0x199] sm:$0xff] }
 0x259   : > { %v6806_v1 = vpop.permute.xlu1 %1568  ;;  %v6808_v14 = vpop.permute.xlu0 %1566 }
 0x25a   : > { %9043 = vst [vmem:[#allocation176_spill] sm:$0xff] %v6806_v1  ;;  %9044 = vst [vmem:[#allocation177_spill] sm:$0xff] %v6808_v14 }
 0x25b   : > { %1700 = vrot.lane.b32.xlu1 %v4951_v4, %s5389_s9  ;;  %1698 = vrot.lane.b32.xlu0 %v4950_v30, %s5389_s9  ;;  %v4989_v4 = vld [vmem:[#allocation2 + $0x1a2] sm:$0xff]  ;;  %v4988_v30 = vld [vmem:[#allocation2 + $0x19a] sm:$0xff] }
 0x25d   : > { %v6812_v45 = vpop.permute.xlu1 %1644  ;;  %v1643_v2 = vpop.permute.xlu0 %1642 }
 0x25f   : > { %1844 = vrot.lane.b32.xlu1 %v4987_v40, %s5390_s23  ;;  %1842 = vrot.lane.b32.xlu0 %v4986_v38, %s5390_s23  ;;  %v412_v40 = vld [vmem:[#allocation2] sm:$0xff] }
 0x260   : > { %v4955_v38 = vld [vmem:[#allocation2 + $0x1b9] sm:$0xff] }
 0x261   : > { %v6816_v41 = vpop.permute.xlu1 %1648  ;;  %v6818_v1 = vpop.permute.xlu0 %1646 }
 0x263   : > { %1704 = vrot.lane.b32.xlu1 %v4953_v39, %s5389_s9  ;;  %1702 = vrot.lane.b32.xlu0 %v4952_v32, %s5389_s9  ;;  %v9045_v39 = vld [vmem:[#allocation6_spill] sm:$0xff] }
 0x264   : > { %v1895_v32 = vsel %vm253_vm0, %v412_v40, %v9045_v39  ;;  %v9048_v39 = vld [vmem:[#allocation5_spill] sm:$0xff] }
 0x265   : > { %v6822_v14 = vpop.permute.xlu1 %1652  ;;  %v6824_v43 = vpop.permute.xlu0 %1650 }
 0x267   : > { %1848 = vrot.lane.b32.xlu1 %v4989_v4, %s5390_s23  ;;  %1846 = vrot.lane.b32.xlu0 %v4988_v30, %s5390_s23  ;;  %v413_v4 = vld [vmem:[#allocation2 + $0x8] sm:$0xff]  ;;  %v1932_v30 = vsel %vm1931_vm4, %v1895_v32, %v9046_v17 }
 0x268   : > { %v1969_v0 = vsel %vm1968_vm5, %v1932_v30, %v6282_v52  ;;  %v1896_v17 = vsel %vm253_vm0, %v413_v4, %v9049_v22  ;;  %v5320_v52 = vld [vmem:[#allocation2 + $0x20] sm:$0xff]  ;;  %v9051_v30 = vld [vmem:[#allocation68_spill] sm:$0xff] }
 0x269   : > { %v6828_v50 = vpop.permute.xlu1 %1656  ;;  %v6830_v3 = vpop.permute.xlu0 %1654  ;;  %v2006_v40 = vsel %vm2005_vm6, %v1969_v0, %v6424_v21  ;;  %v9050_v21 = vld [vmem:[#allocation9_spill] sm:$0xff] }
 0x26a   : > { %v2043_v32 = vsel %vm2042_vm7, %v2006_v40, %v6569_v11  ;;  %v1898_v0 = vsel %vm253_vm0, %v5320_v52, %v9050_v21  ;;  %v4957_v4 = vld [vmem:[#allocation2 + $0x1d1] sm:$0xff]  ;;  %v4956_v40 = vld [vmem:[#allocation2 + $0x1c9] sm:$0xff] }
 0x26b   : > { %1708 = vrot.lane.b32.xlu1 %v4955_v38, %s5389_s9  ;;  %1706 = vrot.lane.b32.xlu0 %v4954_v49, %s5389_s9  ;;  %v5319_v38 = vld [vmem:[#allocation2 + $0x18] sm:$0xff]  ;;  %v2080_v11 = vsel %vm2079_vm8, %v2043_v32, %v6706_v9 }
 0x26c   : > { %v1897_v49 = vsel %vm253_vm0, %v5319_v38, %v9048_v39  ;;  %v1933_v38 = vsel %vm1931_vm4, %v1896_v17, %v9051_v30  ;;  %v9052_v39 = vld [vmem:[#allocation73_spill] sm:$0xff] }
 0x26d   : > { %v6840_v16 = vpop.permute.xlu1 %1660  ;;  %v6842_v18 = vpop.permute.xlu0 %1658  ;;  %v1934_v22 = vsel %vm1931_vm4, %v1897_v49, %v9052_v39  ;;  %v5321_v17 = vld [vmem:[#allocation2 + $0x38] sm:$0xff] }
 0x26e   : > { %9047 = vst [vmem:[#allocation6_spill] sm:$0xff] %v6840_v16  ;;  %v2117_v16 = vsel %vm2116_vm9, %v2080_v11, %v1643_v2  ;;  %v9053_v30 = vld [vmem:[#allocation13_spill] sm:$0xff] }
 0x26f   : > { %1852 = vrot.lane.b32.xlu1 %v6470_v26, %s5390_s23  ;;  %1850 = vrot.lane.b32.xlu0 %v6472_v44, %s5390_s23  ;;  %v1970_v26 = vsel %vm1968_vm5, %v1933_v38, %v6280_v51  ;;  %v1971_v44 = vsel %vm1968_vm5, %v1934_v22, %v6290_v54  ;;  %v1900_v49 = vsel %vm253_vm0, %v5321_v17, %v9053_v30  ;;  %v5322_v38 = vld [vmem:[#allocation2 + $0x30] sm:$0xff]  ;;  %v9054_v54 = vld [vmem:[#allocation14_spill] sm:$0xff] }
 0x270   : > { %v2007_v9 = vsel %vm2005_vm6, %v1970_v26, %v6422_v28  ;;  %v2008_v32 = vsel %vm2005_vm6, %v1971_v44, %v6432_v23  ;;  %v1899_v2 = vsel %vm253_vm0, %v5322_v38, %v9054_v54  ;;  %v9055_v28 = vld [vmem:[#allocation72_spill] sm:$0xff]  ;;  %v9056_v23 = vld [vmem:[#allocation77_spill] sm:$0xff] }
 0x271   : > { %v1787_v52 = vpop.permute.xlu1 %1786  ;;  %v6869_v21 = vpop.permute.xlu0 %1662  ;;  %v2044_v39 = vsel %vm2042_vm7, %v2007_v9, %v6567_v12  ;;  %v2045_v22 = vsel %vm2042_vm7, %v2008_v32, %v6577_v24  ;;  %v1935_v11 = vsel %vm1931_vm4, %v1898_v0, %v9055_v28  ;;  %v4993_v12 = vld [vmem:[#allocation2 + $0x1d2] sm:$0xff]  ;;  %v4992_v24 = vld [vmem:[#allocation2 + $0x1ca] sm:$0xff] }
 0x272   : > { %v2154_v51 = vsel %vm2153_vm10, %v2117_v16, %v1787_v52  ;;  %v1936_v16 = vsel %vm1931_vm4, %v1899_v2, %v9056_v23  ;;  %v2081_v26 = vsel %vm2079_vm8, %v2044_v39, %v6704_v13  ;;  %v2082_v44 = vsel %vm2079_vm8, %v2045_v22, %v6712_v33  ;;  %v5323_v32 = vld [vmem:[#allocation2 + $0x48] sm:$0xff]  ;;  %v9059_v38 = vld [vmem:[#allocation81_spill] sm:$0xff]  ;;  %v5324_v23 = vld [vmem:[#allocation2 + $0x50] sm:$0xff] }
 0x273   : > { %1712 = vrot.lane.b32.xlu1 %v4957_v4, %s5389_s9  ;;  %1710 = vrot.lane.b32.xlu0 %v4956_v40, %s5389_s9  ;;  %v1972_v4 = vsel %vm1968_vm5, %v1935_v11, %v6288_v53  ;;  %v1973_v40 = vsel %vm1968_vm5, %v1936_v16, %v6298_v56  ;;  %v2118_v0 = vsel %vm2116_vm9, %v2081_v26, %v6812_v45  ;;  %v9057_v56 = vld [vmem:[#allocation18_spill] sm:$0xff]  ;;  %v9060_v16 = vld [vmem:[#allocation17_spill] sm:$0xff] }
 0x274   : > { %5158 = vmatprep.mubr.msk.f32.mxu0 %vm2202_vm11, %v2154_v51  ;;  %v2119_v52 = vsel %vm2116_vm9, %v2082_v44, %v6818_v1  ;;  %v2009_v33 = vsel %vm2005_vm6, %v1972_v4, %v6430_v34  ;;  %v2010_v30 = vsel %vm2005_vm6, %v1973_v40, %v6440_v48  ;;  %v1901_v51 = vsel %vm253_vm0, %v5323_v32, %v9057_v56  ;;  %v9058_v34 = vld [vmem:[#allocation76_spill] sm:$0xff]  ;;  %v5325_v26 = vld [vmem:[#allocation2 + $0x60] sm:$0xff]  ;;  %v9063_v4 = vld [vmem:[#allocation85_spill] sm:$0xff] }
 0x275   : > { %v1791_v13 = vpop.permute.xlu1 %1790  ;;  %v1789_v17 = vpop.permute.xlu0 %1788  ;;  %v2046_v45 = vsel %vm2042_vm7, %v2009_v33, %v6575_v25  ;;  %v2047_v1 = vsel %vm2042_vm7, %v2010_v30, %v6585_v31  ;;  %v1937_v48 = vsel %vm1931_vm4, %v1900_v49, %v9058_v34  ;;  %v1938_v54 = vsel %vm1931_vm4, %v1901_v51, %v9059_v38  ;;  %v9065_v56 = vld [vmem:[#allocation84_spill] sm:$0xff]  ;;  %v5327_v38 = vld [vmem:[#allocation2 + $0x80] sm:$0xff] }
 0x276   : > { %v2156_v9 = vsel %vm2153_vm10, %v2119_v52, %v1791_v13  ;;  %v2155_v53 = vsel %vm2153_vm10, %v2118_v0, %v1789_v17  ;;  %v2083_v2 = vsel %vm2079_vm8, %v2046_v45, %v6710_v5  ;;  %v2084_v39 = vsel %vm2079_vm8, %v2047_v1, %v6718_v8 }
 0x277   : > { %1856 = vrot.lane.b32.xlu1 %v4993_v12, %s5390_s23  ;;  %1854 = vrot.lane.b32.xlu0 %v4992_v24, %s5390_s23  ;;  %v1974_v31 = vsel %vm1968_vm5, %v1937_v48, %v6296_v55  ;;  %v1975_v25 = vsel %vm1968_vm5, %v1938_v54, %v6306_v58  ;;  %v2120_v49 = vsel %vm2116_vm9, %v2083_v2, %v6816_v41  ;;  %v9062_v24 = vld [vmem:[#allocation80_spill] sm:$0xff]  ;;  %v9066_v54 = vld [vmem:[#allocation25_spill] sm:$0xff] }
 0x278   : > { %5159 = vmatmul.mubr.msk.f32.vlgmr.msra.gmra.mrb[0].mxu0 %vm2202_vm11, %v2155_v53  ;;  %v2121_v22 = vsel %vm2116_vm9, %v2084_v39, %v6824_v43  ;;  %v2011_v8 = vsel %vm2005_vm6, %v1974_v31, %v6438_v27  ;;  %v2012_v11 = vsel %vm2005_vm6, %v1975_v25, %v6448_v20  ;;  %v1902_v41 = vsel %vm253_vm0, %v5324_v23, %v9060_v16  ;;  %v9061_v43 = vld [vmem:[#allocation22_spill] sm:$0xff]  ;;  %v9064_v53 = vld [vmem:[#allocation21_spill] sm:$0xff]  ;;  %v9068_v31 = vld [vmem:[#allocation88_spill] sm:$0xff] }
 0x279   : > { %5161 = vmatprep.mubr.msk.f32.mxu0 %vm2202_vm11, %v2156_v9  ;;  %v1795_v5 = vpop.permute.xlu1 %1794  ;;  %v1793_v28 = vpop.permute.xlu0 %1792  ;;  %v1903_v44 = vsel %vm253_vm0, %v5325_v26, %v9061_v43  ;;  %v2048_v12 = vsel %vm2042_vm7, %v2011_v8, %v6583_v36  ;;  %v2049_v27 = vsel %vm2042_vm7, %v2012_v11, %v6593_v10  ;;  %v1939_v20 = vsel %vm1931_vm4, %v1902_v41, %v9062_v24  ;;  %v5326_v9 = vld [vmem:[#allocation2 + $0x68] sm:$0xff]  ;;  %v5328_v2 = vld [vmem:[#allocation2 + $0x78] sm:$0xff]  ;;  %v9070_v8 = vld [vmem:[#allocation6_spill] sm:$0xff] }
 0x27a   : > { %v2158_v55 = vsel %vm2153_vm10, %v2121_v22, %v1795_v5  ;;  %v2157_v58 = vsel %vm2153_vm10, %v2120_v49, %v1793_v28  ;;  %v1940_v40 = vsel %vm1931_vm4, %v1903_v44, %v9063_v4  ;;  %v2085_v0 = vsel %vm2079_vm8, %v2048_v12, %v6716_v42  ;;  %v9069_v49 = vld [vmem:[#allocation89_spill] sm:$0xff]  ;;  %v9072_v16 = vld [vmem:[#allocation7_spill] sm:$0xff]  ;;  %v9073_v26 = vld [vmem:[#allocation66_spill] sm:$0xff] }
 0x27b   : > { %v2086_v52 = vsel %vm2079_vm8, %v2049_v27, %v6724_v6  ;;  %v1976_v36 = vsel %vm1968_vm5, %v1939_v20, %v6304_v57  ;;  %v1977_v10 = vsel %vm1968_vm5, %v1940_v40, %v6314_v60  ;;  %v2122_v13 = vsel %vm2116_vm9, %v2085_v0, %v6822_v14  ;;  %v9074_v43 = vld [vmem:[#allocation67_spill] sm:$0xff]  ;;  %v9075_v44 = vld [vmem:[#allocation152_spill] sm:$0xff]  ;;  %v9076_v27 = vld [vmem:[#allocation153_spill] sm:$0xff] }
 0x27c   : > { %5162 = vmatmul.mubr.msk.f32.gmra.mrb[2].mxu0 %vm2202_vm11, %v2157_v58  ;;  %v2123_v17 = vsel %vm2116_vm9, %v2086_v52, %v6830_v3  ;;  %v2013_v6 = vsel %vm2005_vm6, %v1976_v36, %v6446_v29  ;;  %v2014_v30 = vsel %vm2005_vm6, %v1977_v10, %v6456_v46  ;;  %v1904_v14 = vsel %vm253_vm0, %v5326_v9, %v9064_v53  ;;  %v9071_v58 = vld [vmem:[#allocation4_spill] sm:$0xff]  ;;  %v5329_v10 = vld [vmem:[#allocation2 + $0x98] sm:$0xff] }
 0x27d   : > { %5164 = vmatprep.mubr.msk.f32.mxu0 %vm2202_vm11, %v2158_v55  ;;  %v1799_v42 = vpop.permute.xlu1 %1798  ;;  %v1797_v33 = vpop.permute.xlu0 %1796  ;;  %v2050_v3 = vsel %vm2042_vm7, %v2013_v6, %v6591_v47  ;;  %v2051_v32 = vsel %vm2042_vm7, %v2014_v30, %v6601_v7  ;;  %v1941_v29 = vsel %vm1931_vm4, %v1904_v14, %v9065_v56  ;;  %v9079_v30 = vld [vmem:[#allocation92_spill] sm:$0xff]  ;;  %v9082_v14 = vld [vmem:[#allocation117_spill] sm:$0xff] }
 0x27e   : > { %v2160_v57 = vsel %vm2153_vm10, %v2123_v17, %v1799_v42  ;;  %v2159_v60 = vsel %vm2153_vm10, %v2122_v13, %v1797_v33  ;;  %v2087_v46 = vsel %vm2079_vm8, %v2050_v3, %v6722_v37  ;;  %v2088_v51 = vsel %vm2079_vm8, %v2051_v32, %v6730_v15  ;;  %v9077_v13 = vld [vmem:[#allocation29_spill] sm:$0xff]  ;;  %v5330_v42 = vld [vmem:[#allocation2 + $0x90] sm:$0xff]  ;;  %v9078_v33 = vld [vmem:[#allocation30_spill] sm:$0xff] }
 0x27f   : > { %v1978_v45 = vsel %vm1968_vm5, %v1941_v29, %v6312_v59  ;;  %v2124_v47 = vsel %vm2116_vm9, %v2087_v46, %v6828_v50  ;;  %v2125_v7 = vsel %vm2116_vm9, %v2088_v51, %v6842_v18  ;;  %v1906_v59 = vsel %vm253_vm0, %v5327_v38, %v9066_v54  ;;  %v9067_v50 = vld [vmem:[#allocation26_spill] sm:$0xff]  ;;  %v9081_v9 = vld [vmem:[#allocation116_spill] sm:$0xff]  ;;  %v9084_v51 = vld [vmem:[#allocation11_spill] sm:$0xff] }
 0x280   : > { %5165 = vmatmul.mubr.msk.f32.gmra.mrb[4].mxu0 %vm2202_vm11, %v2159_v60  ;;  %v2015_v37 = vsel %vm2005_vm6, %v1978_v45, %v6454_v35  ;;  %v1905_v39 = vsel %vm253_vm0, %v5328_v2, %v9067_v50  ;;  %v1943_v25 = vsel %vm1931_vm4, %v1906_v59, %v9068_v31  ;;  %v1908_v17 = vsel %vm253_vm0, %v5329_v10, %v9077_v13  ;;  %v9083_v29 = vld [vmem:[#allocation8_spill] sm:$0xff] }
 0x281   : > { %5167 = vmatprep.mubr.msk.f32.mxu0 %vm2202_vm11, %v2160_v57  ;;  %v1803_v1 = vpop.permute.xlu1 %1802  ;;  %v1801_v34 = vpop.permute.xlu0 %1800  ;;  %v2052_v18 = vsel %vm2042_vm7, %v2015_v37, %v6599_v19  ;;  %v1942_v35 = vsel %vm1931_vm4, %v1905_v39, %v9069_v49  ;;  %v1980_v5 = vsel %vm1968_vm5, %v1943_v25, %v6320_v61  ;;  %v1907_v6 = vsel %vm253_vm0, %v5330_v42, %v9078_v33  ;;  %v9080_v57 = vld [vmem:[#allocation93_spill] sm:$0xff]  ;;  %v9087_v37 = vld [vmem:[#allocation154_spill] sm:$0xff]  ;;  %v5331_v31 = vld [vmem:[#allocation2 + $0xb0] sm:$0xff] }
 0x282   : > { %v2162_v15 = vsel %vm2153_vm10, %v2125_v7, %v1803_v1  ;;  %v2161_v48 = vsel %vm2153_vm10, %v2124_v47, %v1801_v34  ;;  %v2089_v22 = vsel %vm2079_vm8, %v2052_v18, %v6728_v63  ;;  %v1979_v28 = vsel %vm1968_vm5, %v1942_v35, %v6322_v62  ;;  %v9085_v47 = vld [vmem:[#allocation70_spill] sm:$0xff]  ;;  %v9086_v1 = vld [vmem:[#allocation71_spill] sm:$0xff] }
 0x283   : > { %v2126_v19 = vsel %vm2116_vm9, %v2089_v22, %v9070_v8  ;;  %v2017_v23 = vsel %vm2005_vm6, %v1980_v5, %v9071_v58  ;;  %v2016_v63 = vsel %vm2005_vm6, %v1979_v28, %v9072_v16  ;;  %v1944_v60 = vsel %vm1931_vm4, %v1907_v6, %v9080_v57  ;;  %v9089_v25 = vld [vmem:[#allocation31_spill] sm:$0xff]  ;;  %v9090_v22 = vld [vmem:[#allocation32_spill] sm:$0xff]  ;;  %v9091_v28 = vld [vmem:[#allocation94_spill] sm:$0xff] }
 0x284   : > { %5168 = vmatmul.mubr.msk.f32.gmra.mrb[6].mxu0 %vm2202_vm11, %v2161_v48  ;;  %v2054_v61 = vsel %vm2042_vm7, %v2017_v23, %v9073_v26  ;;  %v2053_v62 = vsel %vm2042_vm7, %v2016_v63, %v9074_v43  ;;  %v1981_v3 = vsel %vm1968_vm5, %v1944_v60, %v9082_v14  ;;  %v9088_v48 = vld [vmem:[#allocation155_spill] sm:$0xff]  ;;  %v1910_v49 = vsel %vm253_vm0, %v5331_v31, %v9089_v25  ;;  %v9095_v26 = vld [vmem:[#allocation12_spill] sm:$0xff]  ;;  %v9101_v6 = vld [vmem:[#allocation33_spill] sm:$0xff] }
 0x285   : > { %5170 = vmatprep.mubr.msk.f32.mxu0 %vm2202_vm11, %v2162_v15  ;;  %v1665_v11 = vpop.permute.xlu1 %1664  ;;  %v1805_v55 = vpop.permute.xlu0 %1804  ;;  %v2091_v12 = vsel %vm2079_vm8, %v2054_v61, %v9075_v44  ;;  %v2090_v24 = vsel %vm2079_vm8, %v2053_v62, %v9076_v27  ;;  %v2018_v45 = vsel %vm2005_vm6, %v1981_v3, %v9084_v51  ;;  %v5332_v35 = vld [vmem:[#allocation2 + $0xa8] sm:$0xff]  ;;  %v1947_v8 = vsel %vm1931_vm4, %v1910_v49, %v9091_v28  ;;  %v9097_v44 = vld [vmem:[#allocation74_spill] sm:$0xff]  ;;  %v9104_v14 = vld [vmem:[#allocation97_spill] sm:$0xff] }
 0x286   : > { %v2163_v41 = vsel %vm2153_vm10, %v2126_v19, %v1805_v55  ;;  %v2127_v20 = vsel %vm2116_vm9, %v2090_v24, %v6869_v21  ;;  %v2128_v4 = vsel %vm2116_vm9, %v2091_v12, %v1665_v11  ;;  %v1945_v21 = vsel %vm1931_vm4, %v1908_v17, %v9079_v30  ;;  %v9092_v19 = vld [vmem:[#allocation95_spill] sm:$0xff]  ;;  %v9093_v55 = vld [vmem:[#allocation118_spill] sm:$0xff] }
 0x287   : > { %v1982_v53 = vsel %vm1968_vm5, %v1945_v21, %v9081_v9  ;;  %v2055_v34 = vsel %vm2042_vm7, %v2018_v45, %v9086_v1  ;;  %v1909_v5 = vsel %vm253_vm0, %v5332_v35, %v9090_v22  ;;  %v1984_v58 = vsel %vm1968_vm5, %v1947_v8, %v9093_v55  ;;  %v9094_v23 = vld [vmem:[#allocation119_spill] sm:$0xff]  ;;  %v5334_v21 = vld [vmem:[#allocation2 + $0xc0] sm:$0xff]  ;;  %v9103_v9 = vld [vmem:[#allocation96_spill] sm:$0xff] }
 0x288   : > { %5171 = vmatmul.mubr.msk.f32.gmra.mrb[8].mxu0 %vm2202_vm11, %v2163_v41  ;;  %v2019_v46 = vsel %vm2005_vm6, %v1982_v53, %v9083_v29  ;;  %v2092_v38 = vsel %vm2079_vm8, %v2055_v34, %v9088_v48  ;;  %v1946_v11 = vsel %vm1931_vm4, %v1909_v5, %v9092_v19  ;;  %v2021_v61 = vsel %vm2005_vm6, %v1984_v58, %v9095_v26  ;;  %v9096_v43 = vld [vmem:[#allocation15_spill] sm:$0xff]  ;;  %v9102_v57 = vld [vmem:[#allocation34_spill] sm:$0xff]  ;;  %v9106_v29 = vld [vmem:[#allocation121_spill] sm:$0xff] }
 0x289   : > { %v1809_v40 = vpop.permute.xlu1 %1808  ;;  %v1807_v0 = vpop.permute.xlu0 %1806  ;;  %v2056_v7 = vsel %vm2042_vm7, %v2019_v46, %v9085_v47  ;;  %v1983_v16 = vsel %vm1968_vm5, %v1946_v11, %v9094_v23  ;;  %v2058_v12 = vsel %vm2042_vm7, %v2021_v61, %v9097_v44  ;;  %v9098_v27 = vld [vmem:[#allocation75_spill] sm:$0xff]  ;;  %v1911_v60 = vsel %vm253_vm0, %v5334_v21, %v9102_v57  ;;  %v9107_v47 = vld [vmem:[#allocation16_spill] sm:$0xff]  ;;  %v5335_v22 = vld [vmem:[#allocation2 + $0xe0] sm:$0xff] }
 0x28a   : > { %v2165_v52 = vsel %vm2153_vm10, %v2128_v4, %v1809_v40  ;;  %v2164_v36 = vsel %vm2153_vm10, %v2127_v20, %v1807_v0  ;;  %v2093_v15 = vsel %vm2079_vm8, %v2056_v7, %v9087_v37  ;;  %v2020_v62 = vsel %vm2005_vm6, %v1983_v16, %v9096_v43  ;;  %v9099_v20 = vld [vmem:[#allocation156_spill] sm:$0xff]  ;;  %v9100_v40 = vld [vmem:[#allocation157_spill] sm:$0xff]  ;;  %v5333_v33 = vld [vmem:[#allocation2 + $0xc8] sm:$0xff] }
 0x28b   : > { %5173 = vmatprep.mubr.msk.f32.mxu0 %vm2202_vm11, %v2164_v36  ;;  %v2057_v24 = vsel %vm2042_vm7, %v2020_v62, %v9098_v27  ;;  %v2095_v4 = vsel %vm2079_vm8, %v2058_v12, %v9099_v20  ;;  %v1912_v30 = vsel %vm253_vm0, %v5333_v33, %v9101_v6  ;;  %v1948_v3 = vsel %vm1931_vm4, %v1911_v60, %v9104_v14  ;;  %v9108_v1 = vld [vmem:[#allocation19_spill] sm:$0xff]  ;;  %v9109_v37 = vld [vmem:[#allocation78_spill] sm:$0xff]  ;;  %v5336_v8 = vld [vmem:[#allocation2 + $0xd8] sm:$0xff] }
 0x28c   : > { %5174 = vmatmul.mubr.msk.f32.gmra.mrb[10].mxu0 %vm2202_vm11, %v2165_v52  ;;  %v2094_v0 = vsel %vm2079_vm8, %v2057_v24, %v9100_v40  ;;  %v1949_v53 = vsel %vm1931_vm4, %v1912_v30, %v9103_v9  ;;  %v1985_v46 = vsel %vm1968_vm5, %v1948_v3, %v9106_v29  ;;  %v9110_v48 = vld [vmem:[#allocation79_spill] sm:$0xff]  ;;  %v9114_v19 = vld [vmem:[#allocation36_spill] sm:$0xff]  ;;  %v9115_v55 = vld [vmem:[#allocation98_spill] sm:$0xff] }
 0x28d   : > { %v1669_v32 = vpop.permute.xlu1 %1668  ;;  %v1667_v56 = vpop.permute.xlu0 %1666  ;;  %v2022_v34 = vsel %vm2005_vm6, %v1985_v46, %v9108_v1  ;;  %v9113_v5 = vld [vmem:[#allocation35_spill] sm:$0xff]  ;;  %v1913_v11 = vsel %vm253_vm0, %v5336_v8, %v9114_v19  ;;  %v9119_v44 = vld [vmem:[#allocation20_spill] sm:$0xff]  ;;  %v9121_v20 = vld [vmem:[#allocation82_spill] sm:$0xff] }
 0x28e   : > { %v2130_v54 = vsel %vm2116_vm9, %v2093_v15, %v1669_v32  ;;  %v2129_v59 = vsel %vm2116_vm9, %v2092_v38, %v1667_v56  ;;  %v9105_v32 = vld [vmem:[#allocation120_spill] sm:$0xff]  ;;  %v2059_v38 = vsel %vm2042_vm7, %v2022_v34, %v9110_v48  ;;  %v1914_v28 = vsel %vm253_vm0, %v5335_v22, %v9113_v5  ;;  %v9116_v23 = vld [vmem:[#allocation99_spill] sm:$0xff]  ;;  %v5337_v57 = vld [vmem:[#allocation2 + $0xf8] sm:$0xff] }
 0x28f   : > { %v1986_v56 = vsel %vm1968_vm5, %v1949_v53, %v9105_v32  ;;  %v1951_v58 = vsel %vm1931_vm4, %v1914_v28, %v9115_v55  ;;  %v1950_v16 = vsel %vm1931_vm4, %v1913_v11, %v9116_v23  ;;  %v9118_v26 = vld [vmem:[#allocation123_spill] sm:$0xff]  ;;  %v9125_v60 = vld [vmem:[#allocation37_spill] sm:$0xff]  ;;  %v5338_v53 = vld [vmem:[#allocation2 + $0xf0] sm:$0xff] }
 0x290   : > { %v2023_v7 = vsel %vm2005_vm6, %v1986_v56, %v9107_v47  ;;  %v1987_v61 = vsel %vm1968_vm5, %v1950_v16, %v9118_v26  ;;  %v9120_v27 = vld [vmem:[#allocation23_spill] sm:$0xff]  ;;  %v1916_v9 = vsel %vm253_vm0, %v5337_v57, %v9125_v60  ;;  %v9126_v14 = vld [vmem:[#allocation38_spill] sm:$0xff]  ;;  %v9127_v32 = vld [vmem:[#allocation100_spill] sm:$0xff] }
 0x291   : > { %v1813_v2 = vpop.permute.xlu1 %1812  ;;  %v1811_v50 = vpop.permute.xlu0 %1810  ;;  %v2060_v15 = vsel %vm2042_vm7, %v2023_v7, %v9109_v37  ;;  %v2024_v24 = vsel %vm2005_vm6, %v1987_v61, %v9120_v27  ;;  %v9122_v40 = vld [vmem:[#allocation83_spill] sm:$0xff]  ;;  %v1915_v3 = vsel %vm253_vm0, %v5338_v53, %v9126_v14  ;;  %v1953_v56 = vsel %vm1931_vm4, %v1916_v9, %v9127_v32  ;;  %v9128_v29 = vld [vmem:[#allocation101_spill] sm:$0xff]  ;;  %v9131_v37 = vld [vmem:[#allocation24_spill] sm:$0xff] }
 0x292   : > { %v2167_v39 = vsel %vm2153_vm10, %v2130_v54, %v1813_v2  ;;  %v2166_v18 = vsel %vm2153_vm10, %v2129_v59, %v1811_v50  ;;  %v9111_v54 = vld [vmem:[#allocation158_spill] sm:$0xff]  ;;  %v9112_v2 = vld [vmem:[#allocation159_spill] sm:$0xff]  ;;  %v1952_v46 = vsel %vm1931_vm4, %v1915_v3, %v9128_v29  ;;  %v9130_v47 = vld [vmem:[#allocation125_spill] sm:$0xff] }
 0x293   : > { %5176 = vmatprep.mubr.msk.f32.mxu0 %vm2202_vm11, %v2166_v18  ;;  %v2097_v59 = vsel %vm2079_vm8, %v2060_v15, %v9111_v54  ;;  %v2096_v50 = vsel %vm2079_vm8, %v2059_v38, %v9112_v2  ;;  %v1989_v7 = vsel %vm1968_vm5, %v1952_v46, %v9130_v47  ;;  %v9132_v48 = vld [vmem:[#allocation27_spill] sm:$0xff]  ;;  %v9133_v54 = vld [vmem:[#allocation86_spill] sm:$0xff]  ;;  %v5339_v19 = vld [vmem:[#allocation2 + $0x110] sm:$0xff] }
 0x294   : > { %5177 = vmatmul.mubr.msk.f32.gmra.mrb[12].mxu0 %vm2202_vm11, %v2167_v39  ;;  %v2026_v38 = vsel %vm2005_vm6, %v1989_v7, %v9132_v48  ;;  %v9134_v2 = vld [vmem:[#allocation87_spill] sm:$0xff]  ;;  %v9137_v11 = vld [vmem:[#allocation40_spill] sm:$0xff]  ;;  %v9138_v23 = vld [vmem:[#allocation41_spill] sm:$0xff] }
 0x295   : > { %v1673_v63 = vpop.permute.xlu1 %1672  ;;  %v1671_v41 = vpop.permute.xlu0 %1670  ;;  %v1918_v55 = vsel %vm253_vm0, %v5339_v19, %v9137_v11  ;;  %v9140_v26 = vld [vmem:[#allocation103_spill] sm:$0xff]  ;;  %v9149_v3 = vld [vmem:[#allocation44_spill] sm:$0xff]  ;;  %v9150_v29 = vld [vmem:[#allocation45_spill] sm:$0xff] }
 0x296   : > { %v2132_v52 = vsel %vm2116_vm9, %v2095_v4, %v1673_v63  ;;  %v2131_v36 = vsel %vm2116_vm9, %v2094_v0, %v1671_v41  ;;  %v9117_v63 = vld [vmem:[#allocation122_spill] sm:$0xff]  ;;  %v2061_v0 = vsel %vm2042_vm7, %v2024_v24, %v9122_v40  ;;  %v9144_v40 = vld [vmem:[#allocation39_spill] sm:$0xff]  ;;  %v9152_v47 = vld [vmem:[#allocation105_spill] sm:$0xff] }
 0x297   : > { %v1988_v41 = vsel %vm1968_vm5, %v1951_v58, %v9117_v63  ;;  %v5340_v58 = vld [vmem:[#allocation2 + $0x108] sm:$0xff]  ;;  %v9139_v63 = vld [vmem:[#allocation102_spill] sm:$0xff] }
 0x298   : > { %v2025_v12 = vsel %vm2005_vm6, %v1988_v41, %v9119_v44  ;;  %v1917_v16 = vsel %vm253_vm0, %v5340_v58, %v9138_v23  ;;  %v1955_v41 = vsel %vm1931_vm4, %v1918_v55, %v9139_v63  ;;  %v9142_v44 = vld [vmem:[#allocation127_spill] sm:$0xff]  ;;  %v5343_v23 = vld [vmem:[#allocation2 + $0x140] sm:$0xff] }
 0x299   : > { %v1817_v10 = vpop.permute.xlu1 %1816  ;;  %v1815_v13 = vpop.permute.xlu0 %1814  ;;  %v2062_v4 = vsel %vm2042_vm7, %v2025_v12, %v9121_v20  ;;  %v1954_v61 = vsel %vm1931_vm4, %v1917_v16, %v9140_v26  ;;  %v9143_v20 = vld [vmem:[#allocation28_spill] sm:$0xff]  ;;  %v5341_v14 = vld [vmem:[#allocation2 + $0x128] sm:$0xff]  ;;  %v9162_v26 = vld [vmem:[#allocation49_spill] sm:$0xff] }
 0x29a   : > { %v2169_v17 = vsel %vm2153_vm10, %v2132_v52, %v1817_v10  ;;  %v2168_v42 = vsel %vm2153_vm10, %v2131_v36, %v1815_v13  ;;  %v9123_v52 = vld [vmem:[#allocation160_spill] sm:$0xff]  ;;  %v9124_v10 = vld [vmem:[#allocation161_spill] sm:$0xff]  ;;  %v1991_v12 = vsel %vm1968_vm5, %v1954_v61, %v9142_v44  ;;  %v1920_v32 = vsel %vm253_vm0, %v5341_v14, %v9149_v3  ;;  %v9164_v44 = vld [vmem:[#allocation107_spill] sm:$0xff] }
 0x29b   : > { %5179 = vmatprep.mubr.msk.f32.mxu0 %vm2202_vm11, %v2168_v42  ;;  %v2099_v36 = vsel %vm2079_vm8, %v2062_v4, %v9123_v52  ;;  %v2098_v13 = vsel %vm2079_vm8, %v2061_v0, %v9124_v10  ;;  %v2028_v0 = vsel %vm2005_vm6, %v1991_v12, %v9144_v40  ;;  %v9145_v52 = vld [vmem:[#allocation90_spill] sm:$0xff]  ;;  %v9146_v10 = vld [vmem:[#allocation91_spill] sm:$0xff]  ;;  %v9161_v16 = vld [vmem:[#allocation48_spill] sm:$0xff] }
 0x29c   : > { %5180 = vmatmul.mubr.msk.f32.gmra.mrb[14].mxu0 %vm2202_vm11, %v2169_v17  ;;  %v1922_v63 = vsel %vm253_vm0, %v5343_v23, %v9161_v16 }
 0x29d   : > { %v1677_v51 = vpop.permute.xlu1 %1676  ;;  %v1675_v45 = vpop.permute.xlu0 %1674 }
 0x29e   : > { %v2134_v39 = vsel %vm2116_vm9, %v2097_v59, %v1677_v51  ;;  %v2133_v18 = vsel %vm2116_vm9, %v2096_v50, %v1675_v45  ;;  %v9129_v51 = vld [vmem:[#allocation124_spill] sm:$0xff]  ;;  %v2063_v50 = vsel %vm2042_vm7, %v2026_v38, %v9134_v2  ;;  %v9156_v2 = vld [vmem:[#allocation43_spill] sm:$0xff] }
 0x29f   : > { %v1990_v45 = vsel %vm1968_vm5, %v1953_v56, %v9129_v51  ;;  %v5342_v56 = vld [vmem:[#allocation2 + $0x120] sm:$0xff]  ;;  %v9151_v51 = vld [vmem:[#allocation104_spill] sm:$0xff] }
 0x2a0   : > { %v2027_v15 = vsel %vm2005_vm6, %v1990_v45, %v9131_v37  ;;  %v1919_v46 = vsel %vm253_vm0, %v5342_v56, %v9150_v29  ;;  %v1957_v45 = vsel %vm1931_vm4, %v1920_v32, %v9151_v51  ;;  %v9154_v37 = vld [vmem:[#allocation129_spill] sm:$0xff] }
 0x2a1   : > { %v1821_v31 = vpop.permute.xlu1 %1820  ;;  %v1819_v25 = vpop.permute.xlu0 %1818  ;;  %v2064_v59 = vsel %vm2042_vm7, %v2027_v15, %v9133_v54  ;;  %v1956_v7 = vsel %vm1931_vm4, %v1919_v46, %v9152_v47  ;;  %v9155_v54 = vld [vmem:[#allocation42_spill] sm:$0xff]  ;;  %v5345_v29 = vld [vmem:[#allocation2 + $0x158] sm:$0xff]  ;;  %v9173_v46 = vld [vmem:[#allocation52_spill] sm:$0xff] }
 0x2a2   : > { %v2171_v49 = vsel %vm2153_vm10, %v2134_v39, %v1821_v31  ;;  %v2170_v35 = vsel %vm2153_vm10, %v2133_v18, %v1819_v25  ;;  %v9135_v39 = vld [vmem:[#allocation162_spill] sm:$0xff]  ;;  %v9136_v31 = vld [vmem:[#allocation163_spill] sm:$0xff]  ;;  %v1993_v15 = vsel %vm1968_vm5, %v1956_v7, %v9154_v37  ;;  %v1924_v51 = vsel %vm253_vm0, %v5345_v29, %v9173_v46  ;;  %v9174_v47 = vld [vmem:[#allocation53_spill] sm:$0xff] }
 0x2a3   : > { %5182 = vmatprep.mubr.msk.f32.mxu0 %vm2202_vm11, %v2170_v35  ;;  %v2101_v18 = vsel %vm2079_vm8, %v2064_v59, %v9135_v39  ;;  %v2100_v25 = vsel %vm2079_vm8, %v2063_v50, %v9136_v31  ;;  %v2030_v50 = vsel %vm2005_vm6, %v1993_v15, %v9156_v2  ;;  %v9157_v39 = vld [vmem:[#allocation140_spill] sm:$0xff]  ;;  %v9158_v31 = vld [vmem:[#allocation141_spill] sm:$0xff] }
 0x2a4   : > { %5183 = vmatmul.mubr.msk.f32.gmra.mrb[16].mxu0 %vm2202_vm11, %v2171_v49  ;;  %v9176_v37 = vld [vmem:[#allocation109_spill] sm:$0xff] }
 0x2a5   : > { %v1681_v43 = vpop.permute.xlu1 %1680  ;;  %v1679_v62 = vpop.permute.xlu0 %1678 }
 0x2a6   : > { %v2136_v17 = vsel %vm2116_vm9, %v2099_v36, %v1681_v43  ;;  %v2135_v42 = vsel %vm2116_vm9, %v2098_v13, %v1679_v62  ;;  %v9141_v43 = vld [vmem:[#allocation126_spill] sm:$0xff]  ;;  %v2065_v13 = vsel %vm2042_vm7, %v2028_v0, %v9146_v10  ;;  %v9168_v10 = vld [vmem:[#allocation47_spill] sm:$0xff] }
 0x2a7   : > { %v1992_v62 = vsel %vm1968_vm5, %v1955_v41, %v9141_v43  ;;  %v5344_v41 = vld [vmem:[#allocation2 + $0x138] sm:$0xff]  ;;  %v9163_v43 = vld [vmem:[#allocation106_spill] sm:$0xff] }
 0x2a8   : > { %v2029_v4 = vsel %vm2005_vm6, %v1992_v62, %v9143_v20  ;;  %v1921_v61 = vsel %vm253_vm0, %v5344_v41, %v9162_v26  ;;  %v1959_v62 = vsel %vm1931_vm4, %v1922_v63, %v9163_v43  ;;  %v9166_v20 = vld [vmem:[#allocation131_spill] sm:$0xff]  ;;  %v5347_v26 = vld [vmem:[#allocation2 + $0x170] sm:$0xff] }
 0x2a9   : > { %v1825_v33 = vpop.permute.xlu1 %1824  ;;  %v1823_v6 = vpop.permute.xlu0 %1822  ;;  %v2066_v36 = vsel %vm2042_vm7, %v2029_v4, %v9145_v52  ;;  %v1958_v12 = vsel %vm1931_vm4, %v1921_v61, %v9164_v44  ;;  %v9167_v52 = vld [vmem:[#allocation46_spill] sm:$0xff]  ;;  %v9185_v61 = vld [vmem:[#allocation56_spill] sm:$0xff]  ;;  %v9186_v44 = vld [vmem:[#allocation57_spill] sm:$0xff] }
 0x2aa   : > { %v2173_v30 = vsel %vm2153_vm10, %v2136_v17, %v1825_v33  ;;  %v2172_v21 = vsel %vm2153_vm10, %v2135_v42, %v1823_v6  ;;  %v9147_v17 = vld [vmem:[#allocation164_spill] sm:$0xff]  ;;  %v9148_v33 = vld [vmem:[#allocation165_spill] sm:$0xff]  ;;  %v1995_v4 = vsel %vm1968_vm5, %v1958_v12, %v9166_v20  ;;  %v1926_v43 = vsel %vm253_vm0, %v5347_v26, %v9185_v61  ;;  %v9188_v20 = vld [vmem:[#allocation111_spill] sm:$0xff] }
 0x2ab   : > { %5185 = vmatprep.mubr.msk.f32.mxu0 %vm2202_vm11, %v2172_v21  ;;  %v2103_v42 = vsel %vm2079_vm8, %v2066_v36, %v9147_v17  ;;  %v2102_v6 = vsel %vm2079_vm8, %v2065_v13, %v9148_v33  ;;  %v2032_v13 = vsel %vm2005_vm6, %v1995_v4, %v9168_v10  ;;  %v9169_v17 = vld [vmem:[#allocation142_spill] sm:$0xff]  ;;  %v9170_v33 = vld [vmem:[#allocation143_spill] sm:$0xff] }
 0x2ac   : > { %5186 = vmatmul.mubr.msk.f32.gmra.mrb[18].mxu0 %vm2202_vm11, %v2173_v30 }
 0x2ad   : > { %v1685_v1 = vpop.permute.xlu1 %1684  ;;  %v1683_v34 = vpop.permute.xlu0 %1682 }
 0x2ae   : > { %v2138_v49 = vsel %vm2116_vm9, %v2101_v18, %v1685_v1  ;;  %v2137_v35 = vsel %vm2116_vm9, %v2100_v25, %v1683_v34  ;;  %v9153_v1 = vld [vmem:[#allocation128_spill] sm:$0xff]  ;;  %v2067_v25 = vsel %vm2042_vm7, %v2030_v50, %v9158_v31  ;;  %v9180_v31 = vld [vmem:[#allocation51_spill] sm:$0xff] }
 0x2af   : > { %v1994_v34 = vsel %vm1968_vm5, %v1957_v45, %v9153_v1  ;;  %v5346_v45 = vld [vmem:[#allocation2 + $0x150] sm:$0xff] }
 0x2b0   : > { %v2031_v59 = vsel %vm2005_vm6, %v1994_v34, %v9155_v54  ;;  %v1923_v7 = vsel %vm253_vm0, %v5346_v45, %v9174_v47  ;;  %v9175_v1 = vld [vmem:[#allocation108_spill] sm:$0xff]  ;;  %v9178_v54 = vld [vmem:[#allocation133_spill] sm:$0xff]  ;;  %v5349_v47 = vld [vmem:[#allocation2 + $0x188] sm:$0xff] }
 0x2b1   : > { %v1829_v22 = vpop.permute.xlu1 %1828  ;;  %v1827_v5 = vpop.permute.xlu0 %1826  ;;  %v2068_v18 = vsel %vm2042_vm7, %v2031_v59, %v9157_v39  ;;  %v1961_v34 = vsel %vm1931_vm4, %v1924_v51, %v9175_v1  ;;  %v1960_v15 = vsel %vm1931_vm4, %v1923_v7, %v9176_v37  ;;  %v9179_v39 = vld [vmem:[#allocation50_spill] sm:$0xff]  ;;  %v9197_v7 = vld [vmem:[#allocation60_spill] sm:$0xff]  ;;  %v9198_v37 = vld [vmem:[#allocation61_spill] sm:$0xff] }
 0x2b2   : > { %v2175_v28 = vsel %vm2153_vm10, %v2138_v49, %v1829_v22  ;;  %v2174_v8 = vsel %vm2153_vm10, %v2137_v35, %v1827_v5  ;;  %v9159_v49 = vld [vmem:[#allocation166_spill] sm:$0xff]  ;;  %v9160_v22 = vld [vmem:[#allocation167_spill] sm:$0xff]  ;;  %v1997_v59 = vsel %vm1968_vm5, %v1960_v15, %v9178_v54  ;;  %v1928_v1 = vsel %vm253_vm0, %v5349_v47, %v9197_v7  ;;  %v9200_v54 = vld [vmem:[#allocation113_spill] sm:$0xff] }
 0x2b3   : > { %5188 = vmatprep.mubr.msk.f32.mxu0 %vm2202_vm11, %v2174_v8  ;;  %v2105_v35 = vsel %vm2079_vm8, %v2068_v18, %v9159_v49  ;;  %v2104_v5 = vsel %vm2079_vm8, %v2067_v25, %v9160_v22  ;;  %v2034_v25 = vsel %vm2005_vm6, %v1997_v59, %v9180_v31  ;;  %v9181_v49 = vld [vmem:[#allocation144_spill] sm:$0xff]  ;;  %v9182_v22 = vld [vmem:[#allocation145_spill] sm:$0xff] }
 0x2b4   : > { %5189 = vmatmul.mubr.msk.f32.gmra.mrb[20].mxu0 %vm2202_vm11, %v2175_v28 }
 0x2b5   : > { %v1689_v27 = vpop.permute.xlu1 %1688  ;;  %v1687_v24 = vpop.permute.xlu0 %1686 }
 0x2b6   : > { %v2140_v30 = vsel %vm2116_vm9, %v2103_v42, %v1689_v27  ;;  %v2139_v21 = vsel %vm2116_vm9, %v2102_v6, %v1687_v24  ;;  %v9165_v27 = vld [vmem:[#allocation130_spill] sm:$0xff]  ;;  %v2069_v6 = vsel %vm2042_vm7, %v2032_v13, %v9170_v33  ;;  %v9192_v33 = vld [vmem:[#allocation55_spill] sm:$0xff] }
 0x2b7   : > { %v1996_v24 = vsel %vm1968_vm5, %v1959_v62, %v9165_v27  ;;  %v5348_v62 = vld [vmem:[#allocation2 + $0x168] sm:$0xff]  ;;  %v9187_v27 = vld [vmem:[#allocation110_spill] sm:$0xff] }
 0x2b8   : > { %v2033_v36 = vsel %vm2005_vm6, %v1996_v24, %v9167_v52  ;;  %v1925_v12 = vsel %vm253_vm0, %v5348_v62, %v9186_v44  ;;  %v1963_v24 = vsel %vm1931_vm4, %v1926_v43, %v9187_v27  ;;  %v9190_v52 = vld [vmem:[#allocation135_spill] sm:$0xff]  ;;  %v5351_v44 = vld [vmem:[#allocation2 + $0x1a0] sm:$0xff] }
 0x2b9   : > { %v1833_v57 = vpop.permute.xlu1 %1832  ;;  %v1831_v60 = vpop.permute.xlu0 %1830  ;;  %v2070_v42 = vsel %vm2042_vm7, %v2033_v36, %v9169_v17  ;;  %v1962_v4 = vsel %vm1931_vm4, %v1925_v12, %v9188_v20  ;;  %v9191_v17 = vld [vmem:[#allocation54_spill] sm:$0xff]  ;;  %v9209_v12 = vld [vmem:[#allocation64_spill] sm:$0xff]  ;;  %v9210_v20 = vld [vmem:[#allocation65_spill] sm:$0xff] }
 0x2ba   : > { %v2177_v9 = vsel %vm2153_vm10, %v2140_v30, %v1833_v57  ;;  %v2176_v53 = vsel %vm2153_vm10, %v2139_v21, %v1831_v60  ;;  %v9171_v30 = vld [vmem:[#allocation168_spill] sm:$0xff]  ;;  %v9172_v57 = vld [vmem:[#allocation169_spill] sm:$0xff]  ;;  %v1999_v36 = vsel %vm1968_vm5, %v1962_v4, %v9190_v52  ;;  %v1930_v27 = vsel %vm253_vm0, %v5351_v44, %v9209_v12  ;;  %v9212_v52 = vld [vmem:[#allocation115_spill] sm:$0xff] }
 0x2bb   : > { %5191 = vmatprep.mubr.msk.f32.mxu0 %vm2202_vm11, %v2176_v53  ;;  %v2107_v21 = vsel %vm2079_vm8, %v2070_v42, %v9171_v30  ;;  %v2106_v60 = vsel %vm2079_vm8, %v2069_v6, %v9172_v57  ;;  %v2036_v6 = vsel %vm2005_vm6, %v1999_v36, %v9192_v33  ;;  %v9193_v30 = vld [vmem:[#allocation146_spill] sm:$0xff]  ;;  %v9194_v57 = vld [vmem:[#allocation147_spill] sm:$0xff] }
 0x2bc   : > { %5192 = vmatmul.mubr.msk.f32.gmra.mrb[22].mxu0 %vm2202_vm11, %v2177_v9 }
 0x2bd   : > { %v1693_v48 = vpop.permute.xlu1 %1692  ;;  %v1691_v38 = vpop.permute.xlu0 %1690 }
 0x2be   : > { %v2142_v28 = vsel %vm2116_vm9, %v2105_v35, %v1693_v48  ;;  %v2141_v8 = vsel %vm2116_vm9, %v2104_v5, %v1691_v38  ;;  %v9177_v48 = vld [vmem:[#allocation132_spill] sm:$0xff]  ;;  %v2071_v5 = vsel %vm2042_vm7, %v2034_v25, %v9182_v22  ;;  %v9204_v22 = vld [vmem:[#allocation59_spill] sm:$0xff] }
 0x2bf   : > { %v1998_v38 = vsel %vm1968_vm5, %v1961_v34, %v9177_v48  ;;  %v5350_v34 = vld [vmem:[#allocation2 + $0x180] sm:$0xff]  ;;  %v9199_v48 = vld [vmem:[#allocation112_spill] sm:$0xff] }
 0x2c0   : > { %v2035_v18 = vsel %vm2005_vm6, %v1998_v38, %v9179_v39  ;;  %v1927_v15 = vsel %vm253_vm0, %v5350_v34, %v9198_v37  ;;  %v1965_v38 = vsel %vm1931_vm4, %v1928_v1, %v9199_v48  ;;  %v9202_v39 = vld [vmem:[#allocation137_spill] sm:$0xff]  ;;  %v7401_v37 = vld [vmem:[%s8738_s2] ss:$0 sm:$0xff] }
 0x2c1   : > { %v1837_v19 = vpop.permute.xlu1 %1836  ;;  %v1835_v11 = vpop.permute.xlu0 %1834  ;;  %v2072_v35 = vsel %vm2042_vm7, %v2035_v18, %v9181_v49  ;;  %v1964_v59 = vsel %vm1931_vm4, %v1927_v15, %v9200_v54  ;;  %v9203_v49 = vld [vmem:[#allocation58_spill] sm:$0xff] }
 0x2c2   : > { %v2179_v55 = vsel %vm2153_vm10, %v2142_v28, %v1837_v19  ;;  %v2178_v58 = vsel %vm2153_vm10, %v2141_v8, %v1835_v11  ;;  %v9183_v28 = vld [vmem:[#allocation170_spill] sm:$0xff]  ;;  %v9184_v19 = vld [vmem:[#allocation171_spill] sm:$0xff]  ;;  %v2001_v18 = vsel %vm1968_vm5, %v1964_v59, %v9202_v39 }
 0x2c3   : > { %5194 = vmatprep.mubr.msk.f32.mxu0 %vm2202_vm11, %v2178_v58  ;;  %v2109_v8 = vsel %vm2079_vm8, %v2072_v35, %v9183_v28  ;;  %v2108_v11 = vsel %vm2079_vm8, %v2071_v5, %v9184_v19  ;;  %v2038_v5 = vsel %vm2005_vm6, %v2001_v18, %v9204_v22  ;;  %v9205_v28 = vld [vmem:[#allocation148_spill] sm:$0xff]  ;;  %v9206_v19 = vld [vmem:[#allocation149_spill] sm:$0xff] }
 0x2c4   : > { %5195 = vmatmul.mubr.msk.f32.gmra.mrb[24].mxu0 %vm2202_vm11, %v2179_v55 }
 0x2c5   : > { %v1697_v40 = vpop.permute.xlu1 %1696  ;;  %v1695_v0 = vpop.permute.xlu0 %1694 }
 0x2c6   : > { %v2144_v9 = vsel %vm2116_vm9, %v2107_v21, %v1697_v40  ;;  %v2143_v53 = vsel %vm2116_vm9, %v2106_v60, %v1695_v0  ;;  %v9189_v40 = vld [vmem:[#allocation134_spill] sm:$0xff]  ;;  %v2073_v60 = vsel %vm2042_vm7, %v2036_v6, %v9194_v57  ;;  %v9216_v57 = vld [vmem:[#allocation63_spill] sm:$0xff] }
 0x2c7   : > { %v2000_v0 = vsel %vm1968_vm5, %v1963_v24, %v9189_v40  ;;  %v5352_v24 = vld [vmem:[#allocation2 + $0x198] sm:$0xff]  ;;  %v9211_v40 = vld [vmem:[#allocation114_spill] sm:$0xff] }
 0x2c8   : > { %v2037_v42 = vsel %vm2005_vm6, %v2000_v0, %v9191_v17  ;;  %v1929_v4 = vsel %vm253_vm0, %v5352_v24, %v9210_v20  ;;  %v1967_v0 = vsel %vm1931_vm4, %v1930_v27, %v9211_v40  ;;  %v9214_v17 = vld [vmem:[#allocation139_spill] sm:$0xff] }
 0x2c9   : > { %v1841_v14 = vpop.permute.xlu1 %1840  ;;  %v1839_v3 = vpop.permute.xlu0 %1838  ;;  %v2074_v21 = vsel %vm2042_vm7, %v2037_v42, %v9193_v30  ;;  %v1966_v36 = vsel %vm1931_vm4, %v1929_v4, %v9212_v52  ;;  %v9215_v30 = vld [vmem:[#allocation62_spill] sm:$0xff] }
 0x2ca   : > { %v2181_v32 = vsel %vm2153_vm10, %v2144_v9, %v1841_v14  ;;  %v2180_v56 = vsel %vm2153_vm10, %v2143_v53, %v1839_v3  ;;  %v9195_v9 = vld [vmem:[#allocation172_spill] sm:$0xff]  ;;  %v9196_v14 = vld [vmem:[#allocation173_spill] sm:$0xff]  ;;  %v2003_v42 = vsel %vm1968_vm5, %v1966_v36, %v9214_v17 }
 0x2cb   : > { %5197 = vmatprep.mubr.msk.f32.mxu0 %vm2202_vm11, %v2180_v56  ;;  %v2111_v53 = vsel %vm2079_vm8, %v2074_v21, %v9195_v9  ;;  %v2110_v3 = vsel %vm2079_vm8, %v2073_v60, %v9196_v14  ;;  %v2040_v60 = vsel %vm2005_vm6, %v2003_v42, %v9216_v57  ;;  %v9217_v9 = vld [vmem:[#allocation150_spill] sm:$0xff]  ;;  %v9218_v14 = vld [vmem:[#allocation151_spill] sm:$0xff] }
 0x2cc   : > { %5198 = vmatmul.mubr.msk.f32.gmra.mrb[26].mxu0 %vm2202_vm11, %v2181_v32 }
 0x2cd   : > { %v1701_v2 = vpop.permute.xlu1 %1700  ;;  %v1699_v50 = vpop.permute.xlu0 %1698 }
 0x2ce   : > { %v2146_v55 = vsel %vm2116_vm9, %v2109_v8, %v1701_v2  ;;  %v2145_v58 = vsel %vm2116_vm9, %v2108_v11, %v1699_v50  ;;  %v9201_v2 = vld [vmem:[#allocation136_spill] sm:$0xff]  ;;  %v2075_v11 = vsel %vm2042_vm7, %v2038_v5, %v9206_v19 }
 0x2cf   : > { %v2002_v50 = vsel %vm1968_vm5, %v1965_v38, %v9201_v2 }
 0x2d0   : > { %v2039_v35 = vsel %vm2005_vm6, %v2002_v50, %v9203_v49 }
 0x2d1   : > { %v1845_v23 = vpop.permute.xlu1 %1844  ;;  %v1843_v16 = vpop.permute.xlu0 %1842  ;;  %v2076_v8 = vsel %vm2042_vm7, %v2039_v35, %v9205_v28 }
 0x2d2   : > { %v2183_v63 = vsel %vm2153_vm10, %v2146_v55, %v1845_v23  ;;  %v2182_v41 = vsel %vm2153_vm10, %v2145_v58, %v1843_v16  ;;  %v9207_v55 = vld [vmem:[#allocation174_spill] sm:$0xff]  ;;  %v9208_v23 = vld [vmem:[#allocation175_spill] sm:$0xff] }
 0x2d3   : > { %5200 = vmatprep.mubr.msk.f32.mxu0 %vm2202_vm11, %v2182_v41  ;;  %v2113_v58 = vsel %vm2079_vm8, %v2076_v8, %v9207_v55  ;;  %v2112_v16 = vsel %vm2079_vm8, %v2075_v11, %v9208_v23 }
 0x2d4   : > { %5201 = vmatmul.mubr.msk.f32.gmra.mrb[28].mxu0 %vm2202_vm11, %v2183_v63 }
 0x2d5   : > { %v1705_v10 = vpop.permute.xlu1 %1704  ;;  %v1703_v13 = vpop.permute.xlu0 %1702 }
 0x2d6   : > { %v2148_v32 = vsel %vm2116_vm9, %v2111_v53, %v1705_v10  ;;  %v2147_v56 = vsel %vm2116_vm9, %v2110_v3, %v1703_v13  ;;  %v9213_v10 = vld [vmem:[#allocation138_spill] sm:$0xff]  ;;  %v2077_v3 = vsel %vm2042_vm7, %v2040_v60, %v9218_v14 }
 0x2d7   : > { %v2004_v13 = vsel %vm1968_vm5, %v1967_v0, %v9213_v10 }
 0x2d8   : > { %v2041_v21 = vsel %vm2005_vm6, %v2004_v13, %v9215_v30 }
 0x2d9   : > { %v1849_v29 = vpop.permute.xlu1 %1848  ;;  %v1847_v46 = vpop.permute.xlu0 %1846  ;;  %v2078_v53 = vsel %vm2042_vm7, %v2041_v21, %v9217_v9 }
 0x2da   : > { %v2185_v51 = vsel %vm2153_vm10, %v2148_v32, %v1849_v29  ;;  %v2184_v45 = vsel %vm2153_vm10, %v2147_v56, %v1847_v46  ;;  %v9219_v32 = vld [vmem:[#allocation176_spill] sm:$0xff]  ;;  %v9220_v29 = vld [vmem:[#allocation177_spill] sm:$0xff] }
 0x2db   : > { %5203 = vmatprep.mubr.msk.f32.mxu0 %vm2202_vm11, %v2184_v45  ;;  %v2115_v56 = vsel %vm2079_vm8, %v2078_v53, %v9219_v32  ;;  %v2114_v46 = vsel %vm2079_vm8, %v2077_v3, %v9220_v29 }
 0x2dc   : > { %5204 = vmatmul.mubr.msk.f32.gmra.mrb[30].mxu0 %vm2202_vm11, %v2185_v51 }
 0x2dd   : > { %v1709_v31 = vpop.permute.xlu1 %1708  ;;  %v1707_v25 = vpop.permute.xlu0 %1706 }
 0x2de   : > { %v2150_v63 = vsel %vm2116_vm9, %v2113_v58, %v1709_v31  ;;  %v2149_v41 = vsel %vm2116_vm9, %v2112_v16, %v1707_v25  ;;  %v9221_v31 = vmov 0.0  }
 0x2e1   : > { %v1853_v26 = vpop.permute.xlu1 %1852  ;;  %v1851_v61 = vpop.permute.xlu0 %1850 }
 0x2e2   : > { %v2187_v43 = vsel %vm2153_vm10, %v2150_v63, %v1853_v26  ;;  %v2186_v62 = vsel %vm2153_vm10, %v2149_v41, %v1851_v61 }
 0x2e3   : > { %5206 = vmatprep.mubr.msk.f32.mxu0 %vm2202_vm11, %v2186_v62 }
 0x2e4   : > { %5207 = vmatmul.mubr.msk.f32.gmra.mrb[32].mxu0 %vm2202_vm11, %v2187_v43 }
 0x2e5   : > { %v1713_v33 = vpop.permute.xlu1 %1712  ;;  %v1711_v6 = vpop.permute.xlu0 %1710 }
 0x2e6   : > { %v2152_v51 = vsel %vm2116_vm9, %v2115_v56, %v1713_v33  ;;  %v2151_v45 = vsel %vm2116_vm9, %v2114_v46, %v1711_v6 }
 0x2e9   : > { %v1857_v47 = vpop.permute.xlu1 %1856  ;;  %v1855_v7 = vpop.permute.xlu0 %1854 }
 0x2ea   : > { %v2189_v1 = vsel %vm2153_vm10, %v2152_v51, %v1857_v47  ;;  %v2188_v34 = vsel %vm2153_vm10, %v2151_v45, %v1855_v7 }
 0x2eb   : > { %5209 = vmatprep.mubr.msk.f32.mxu0 %vm2202_vm11, %v2188_v34 }
 0x2ec   : > { %5210 = vmatmul.mubr.msk.f32.gmra.mrb[34].mxu0 %vm2202_vm11, %v2189_v1 }
 0x34b   : > { %v5160_v15 = vpop.f32.mrb[0].mxu0 }
 0x34c   : > { %v2387_v48 = vadd.f32 %v5160_v15, %v7401_v37  ;;  %v2381_v38 = vpop.f32.mrb[1].mxu0 }
 0x34d   : > { %v2382_v54 = vadd.f32 %v7401_v37, %v2381_v38 }
 0x34e   : > { %v2561_v59 = vmax.f32 %v2387_v48, 0.0 }
 0x34f   : > { %v2560_v2 = vmax.f32 %v2382_v54, 0.0  ;;  %v5163_v50 = vpop.f32.mrb[2].mxu0 }
 0x350   : > { %2597 = vst.msk [vmem:[#allocation3 + $0x9] sm:$0xff] %vm253_vm0, %v2561_v59  ;;  %v2397_v39 = vadd.f32 %v5163_v50, %v7401_v37  ;;  %v2391_v18 = vpop.f32.mrb[3].mxu0 }
 0x351   : > { %2636 = vst.msk [vmem:[#allocation3 + $0x9] sm:$0xff] %vm253_vm0, %v9221_v31  ;;  %2596 = vst.msk [vmem:[#allocation3 + $0x1] sm:$0xff] %vm253_vm0, %v2560_v2  ;;  %v2392_v25 = vadd.f32 %v7401_v37, %v2391_v18 }
 0x352   : > { %2635 = vst.msk [vmem:[#allocation3 + $0x1] sm:$0xff] %vm253_vm0, %v9221_v31  ;;  %v2563_v49 = vmax.f32 %v2397_v39, 0.0 }
 0x353   : > { %v2562_v35 = vmax.f32 %v2392_v25, 0.0  ;;  %v5166_v22 = vpop.f32.mrb[4].mxu0 }
 0x354   : > { %2599 = vst.msk [vmem:[#allocation3 + $0x21] sm:$0xff] %vm253_vm0, %v2563_v49  ;;  %v2407_v5 = vadd.f32 %v5166_v22, %v7401_v37  ;;  %v2401_v28 = vpop.f32.mrb[5].mxu0 }
 0x355   : > { %2598 = vst.msk [vmem:[#allocation3 + $0x19] sm:$0xff] %vm253_vm0, %v2562_v35  ;;  %v2402_v8 = vadd.f32 %v7401_v37, %v2401_v28 }
 0x356   : > { %v2565_v19 = vmax.f32 %v2407_v5, 0.0 }
 0x357   : > { %v2564_v11 = vmax.f32 %v2402_v8, 0.0  ;;  %v5169_v55 = vpop.f32.mrb[6].mxu0 }
 0x358   : > { %2601 = vst.msk [vmem:[#allocation3 + $0x39] sm:$0xff] %vm253_vm0, %v2565_v19  ;;  %v2417_v58 = vadd.f32 %v5169_v55, %v7401_v37  ;;  %v2411_v23 = vpop.f32.mrb[7].mxu0  ;;  %v2673_v16 = vld [vmem:[#allocation3 + $0x9] sm:$0xff] }
 0x359   : > { %2600 = vst.msk [vmem:[#allocation3 + $0x31] sm:$0xff] %vm253_vm0, %v2564_v11  ;;  %v2412_v63 = vadd.f32 %v7401_v37, %v2411_v23  ;;  %2964 = vrot.lane.b32.xlu1 %v2673_v16, %s5383_s26  ;;  %v2672_v41 = vld [vmem:[#allocation3 + $0x1] sm:$0xff] }
 0x35a   : > { %v2567_v26 = vmax.f32 %v2417_v58, 0.0  ;;  %2962 = vrot.lane.b32.xlu0 %v2672_v41, %s5383_s26 }
 0x35b   : > { %v2566_v61 = vmax.f32 %v2412_v63, 0.0  ;;  %v5172_v43 = vpop.f32.mrb[8].mxu0  ;;  %v7423_v62 = vld [vmem:[#allocation3 + $0x21] sm:$0xff] }
 0x35c   : > { %2603 = vst.msk [vmem:[#allocation3 + $0x51] sm:$0xff] %vm253_vm0, %v2567_v26  ;;  %v2427_v44 = vadd.f32 %v5172_v43, %v7401_v37  ;;  %v2421_v12 = vpop.f32.mrb[9].mxu0  ;;  %v7427_v27 = vld [vmem:[#allocation3 + $0x19] sm:$0xff] }
 0x35d   : > { %2602 = vst.msk [vmem:[#allocation3 + $0x49] sm:$0xff] %vm253_vm0, %v2566_v61  ;;  %v2422_v24 = vadd.f32 %v7401_v37, %v2421_v12  ;;  %2968 = vrot.lane.b32.xlu1 %v7423_v62, %s5383_s26 }
 0x35e   : > { %v2569_v20 = vmax.f32 %v2427_v44, 0.0  ;;  %2966 = vrot.lane.b32.xlu0 %v7427_v27, %s5383_s26 }
 0x35f   : > { %v2568_v4 = vmax.f32 %v2422_v24, 0.0  ;;  %v5175_v40 = vpop.f32.mrb[10].mxu0  ;;  %v7435_v0 = vld [vmem:[#allocation3 + $0x39] sm:$0xff] }
 0x360   : > { %2605 = vst.msk [vmem:[#allocation3 + $0x69] sm:$0xff] %vm253_vm0, %v2569_v20  ;;  %v2437_v52 = vadd.f32 %v5175_v40, %v7401_v37  ;;  %v2431_v36 = vpop.f32.mrb[11].mxu0  ;;  %v7439_v10 = vld [vmem:[#allocation3 + $0x31] sm:$0xff] }
 0x361   : > { %2604 = vst.msk [vmem:[#allocation3 + $0x61] sm:$0xff] %vm253_vm0, %v2568_v4  ;;  %2972 = vrot.lane.b32.xlu1 %v7435_v0, %s5383_s26  ;;  %v2432_v13 = vadd.f32 %v7401_v37, %v2431_v36 }
 0x362   : > { %v2571_v17 = vmax.f32 %v2437_v52, 0.0  ;;  %2970 = vrot.lane.b32.xlu0 %v7439_v10, %s5383_s26 }
 0x363   : > { %v2570_v42 = vmax.f32 %v2432_v13, 0.0  ;;  %v7447_v33 = vld [vmem:[#allocation3 + $0x51] sm:$0xff] }
 0x364   : > { %2607 = vst.msk [vmem:[#allocation3 + $0x81] sm:$0xff] %vm253_vm0, %v2571_v17  ;;  %v7450_v6 = vld [vmem:[#allocation3 + $0x49] sm:$0xff] }
 0x365   : > { %2606 = vst.msk [vmem:[#allocation3 + $0x79] sm:$0xff] %vm253_vm0, %v2570_v42  ;;  %2976 = vrot.lane.b32.xlu1 %v7447_v33, %s5383_s26 }
 0x366   : > { %2974 = vrot.lane.b32.xlu0 %v7450_v6, %s5383_s26 }
 0x367   : > { %v5178_v30 = vpop.f32.mrb[12].mxu0  ;;  %v7457_v21 = vld [vmem:[#allocation3 + $0x69] sm:$0xff] }
 0x368   : > { %v2447_v57 = vadd.f32 %v5178_v30, %v7401_v37  ;;  %v2441_v60 = vpop.f32.mrb[13].mxu0  ;;  %v7460_v9 = vld [vmem:[#allocation3 + $0x61] sm:$0xff] }
 0x369   : > { %2980 = vrot.lane.b32.xlu1 %v7457_v21, %s5383_s26  ;;  %v2442_v53 = vadd.f32 %v7401_v37, %v2441_v60 }
 0x36a   : > { %v2573_v14 = vmax.f32 %v2447_v57, 0.0  ;;  %2978 = vrot.lane.b32.xlu0 %v7460_v9, %s5383_s26 }
 0x36b   : > { %v2572_v3 = vmax.f32 %v2442_v53, 0.0  ;;  %v7467_v32 = vld [vmem:[#allocation3 + $0x81] sm:$0xff] }
 0x36c   : > { %2609 = vst.msk [vmem:[#allocation3 + $0x99] sm:$0xff] %vm253_vm0, %v2573_v14  ;;  %v7470_v56 = vld [vmem:[#allocation3 + $0x79] sm:$0xff] }
 0x36d   : > { %2608 = vst.msk [vmem:[#allocation3 + $0x91] sm:$0xff] %vm253_vm0, %v2572_v3  ;;  %2984 = vrot.lane.b32.xlu1 %v7467_v32, %s5383_s26 }
 0x36e   : > { %2982 = vrot.lane.b32.xlu0 %v7470_v56, %s5383_s26 }
 0x36f   : > { %v5181_v29 = vpop.f32.mrb[14].mxu0 }
 0x370   : > { %v2457_v46 = vadd.f32 %v5181_v29, %v7401_v37  ;;  %v2451_v51 = vpop.f32.mrb[15].mxu0 }
 0x371   : > { %v2452_v45 = vadd.f32 %v7401_v37, %v2451_v51 }
 0x372   : > { %v2575_v47 = vmax.f32 %v2457_v46, 0.0 }
 0x373   : > { %v2574_v7 = vmax.f32 %v2452_v45, 0.0  ;;  %v7479_v1 = vld [vmem:[#allocation3 + $0x99] sm:$0xff] }
 0x374   : > { %2611 = vst.msk [vmem:[#allocation3 + $0xb1] sm:$0xff] %vm253_vm0, %v2575_v47  ;;  %2988 = vrot.lane.b32.xlu1 %v7479_v1, %s5383_s26  ;;  %v7484_v34 = vld [vmem:[#allocation3 + $0x91] sm:$0xff] }
 0x375   : > { %2610 = vst.msk [vmem:[#allocation3 + $0xa9] sm:$0xff] %vm253_vm0, %v2574_v7  ;;  %2986 = vrot.lane.b32.xlu0 %v7484_v34, %s5383_s26 }
 0x377   : > { %v5184_v15 = vpop.f32.mrb[16].mxu0 }
 0x378   : > { %v2467_v48 = vadd.f32 %v5184_v15, %v7401_v37  ;;  %v2461_v38 = vpop.f32.mrb[17].mxu0 }
 0x379   : > { %v2462_v54 = vadd.f32 %v7401_v37, %v2461_v38 }
 0x37a   : > { %v2577_v59 = vmax.f32 %v2467_v48, 0.0 }
 0x37b   : > { %v2576_v2 = vmax.f32 %v2462_v54, 0.0  ;;  %v2687_v50 = vld [vmem:[#allocation3 + $0xb1] sm:$0xff] }
 0x37c   : > { %2613 = vst.msk [vmem:[#allocation3 + $0xc9] sm:$0xff] %vm253_vm0, %v2577_v59  ;;  %2992 = vrot.lane.b32.xlu1 %v2687_v50, %s5383_s26  ;;  %v2686_v39 = vld [vmem:[#allocation3 + $0xa9] sm:$0xff] }
 0x37d   : > { %2612 = vst.msk [vmem:[#allocation3 + $0xc1] sm:$0xff] %vm253_vm0, %v2576_v2  ;;  %2990 = vrot.lane.b32.xlu0 %v2686_v39, %s5383_s26 }
 0x37f   : > { %v5187_v18 = vpop.f32.mrb[18].mxu0 }
 0x380   : > { %v2477_v25 = vadd.f32 %v5187_v18, %v7401_v37  ;;  %v2471_v49 = vpop.f32.mrb[19].mxu0 }
 0x381   : > { %v2472_v35 = vadd.f32 %v7401_v37, %v2471_v49 }
 0x382   : > { %v2579_v22 = vmax.f32 %v2477_v25, 0.0 }
 0x383   : > { %v2578_v5 = vmax.f32 %v2472_v35, 0.0  ;;  %v2689_v28 = vld [vmem:[#allocation3 + $0xc9] sm:$0xff] }
 0x384   : > { %2615 = vst.msk [vmem:[#allocation3 + $0xe1] sm:$0xff] %vm253_vm0, %v2579_v22  ;;  %2996 = vrot.lane.b32.xlu1 %v2689_v28, %s5383_s26  ;;  %v2688_v8 = vld [vmem:[#allocation3 + $0xc1] sm:$0xff] }
 0x385   : > { %2614 = vst.msk [vmem:[#allocation3 + $0xd9] sm:$0xff] %vm253_vm0, %v2578_v5  ;;  %2994 = vrot.lane.b32.xlu0 %v2688_v8, %s5383_s26 }
 0x387   : > { %v5190_v19 = vpop.f32.mrb[20].mxu0 }
 0x388   : > { %v2487_v11 = vadd.f32 %v5190_v19, %v7401_v37  ;;  %v2481_v55 = vpop.f32.mrb[21].mxu0 }
 0x389   : > { %v2482_v58 = vadd.f32 %v7401_v37, %v2481_v55 }
 0x38a   : > { %v2581_v23 = vmax.f32 %v2487_v11, 0.0 }
 0x38b   : > { %v2580_v16 = vmax.f32 %v2482_v58, 0.0  ;;  %v2691_v63 = vld [vmem:[#allocation3 + $0xe1] sm:$0xff] }
 0x38c   : > { %2617 = vst.msk [vmem:[#allocation3 + $0xf9] sm:$0xff] %vm253_vm0, %v2581_v23  ;;  %3000 = vrot.lane.b32.xlu1 %v2691_v63, %s5383_s26  ;;  %v2690_v41 = vld [vmem:[#allocation3 + $0xd9] sm:$0xff]  ;;  %v2705_v63 = vld [vmem:[#allocation3 + $0xa] sm:$0xff] }
 0x38d   : > { %2616 = vst.msk [vmem:[#allocation3 + $0xf1] sm:$0xff] %vm253_vm0, %v2580_v16  ;;  %2998 = vrot.lane.b32.xlu0 %v2690_v41, %s5383_s26  ;;  %v2704_v41 = vld [vmem:[#allocation3 + $0x2] sm:$0xff] }
 0x38f   : > { %v5193_v26 = vpop.f32.mrb[22].mxu0 }
 0x390   : > { %v2497_v61 = vadd.f32 %v5193_v26, %v7401_v37  ;;  %v2491_v43 = vpop.f32.mrb[23].mxu0 }
 0x391   : > { %v2492_v44 = vadd.f32 %v7401_v37, %v2491_v43 }
 0x392   : > { %v2583_v12 = vmax.f32 %v2497_v61, 0.0 }
 0x393   : > { %v2582_v24 = vmax.f32 %v2492_v44, 0.0  ;;  %v2693_v20 = vld [vmem:[#allocation3 + $0xf9] sm:$0xff] }
 0x394   : > { %2619 = vst.msk [vmem:[#allocation3 + $0x111] sm:$0xff] %vm253_vm0, %v2583_v12  ;;  %3004 = vrot.lane.b32.xlu1 %v2693_v20, %s5383_s26  ;;  %v2692_v4 = vld [vmem:[#allocation3 + $0xf1] sm:$0xff]  ;;  %v7547_v20 = vld [vmem:[#allocation3 + $0x22] sm:$0xff] }
 0x395   : > { %2618 = vst.msk [vmem:[#allocation3 + $0x109] sm:$0xff] %vm253_vm0, %v2582_v24  ;;  %3002 = vrot.lane.b32.xlu0 %v2692_v4, %s5383_s26  ;;  %v7552_v4 = vld [vmem:[#allocation3 + $0x1a] sm:$0xff] }
 0x397   : > { %v5196_v40 = vpop.f32.mrb[24].mxu0 }
 0x398   : > { %v2507_v52 = vadd.f32 %v5196_v40, %v7401_v37  ;;  %v2501_v36 = vpop.f32.mrb[25].mxu0  ;;  %v7565_v40 = vld [vmem:[#allocation3 + $0x32] sm:$0xff] }
 0x399   : > { %v2502_v13 = vadd.f32 %v7401_v37, %v2501_v36  ;;  %v7573_v36 = vld [vmem:[#allocation3 + $0x4a] sm:$0xff] }
 0x39a   : > { %v2585_v17 = vmax.f32 %v2507_v52, 0.0  ;;  %v7569_v52 = vld [vmem:[#allocation3 + $0x52] sm:$0xff] }
 0x39b   : > { %v2584_v42 = vmax.f32 %v2502_v13, 0.0  ;;  %v2695_v30 = vld [vmem:[#allocation3 + $0x111] sm:$0xff]  ;;  %v7581_v13 = vld [vmem:[#allocation3 + $0x62] sm:$0xff] }
 0x39c   : > { %2621 = vst.msk [vmem:[#allocation3 + $0x129] sm:$0xff] %vm253_vm0, %v2585_v17  ;;  %3008 = vrot.lane.b32.xlu1 %v2695_v30, %s5383_s26  ;;  %v2694_v57 = vld [vmem:[#allocation3 + $0x109] sm:$0xff]  ;;  %v7593_v30 = vld [vmem:[#allocation3 + $0x9a] sm:$0xff] }
 0x39d   : > { %2620 = vst.msk [vmem:[#allocation3 + $0x121] sm:$0xff] %vm253_vm0, %v2584_v42  ;;  %3006 = vrot.lane.b32.xlu0 %v2694_v57, %s5383_s26  ;;  %v7585_v17 = vld [vmem:[#allocation3 + $0x82] sm:$0xff]  ;;  %v7589_v42 = vld [vmem:[#allocation3 + $0x7a] sm:$0xff]  ;;  %v7597_v57 = vld [vmem:[#allocation3 + $0x92] sm:$0xff] }
 0x39f   : > { %v5199_v60 = vpop.f32.mrb[26].mxu0 }
 0x3a0   : > { %v2517_v53 = vadd.f32 %v5199_v60, %v7401_v37  ;;  %v2511_v14 = vpop.f32.mrb[27].mxu0  ;;  %v7601_v60 = vld [vmem:[#allocation3 + $0xb2] sm:$0xff] }
 0x3a1   : > { %v2512_v3 = vadd.f32 %v7401_v37, %v2511_v14  ;;  %v7609_v14 = vld [vmem:[#allocation3 + $0xca] sm:$0xff] }
 0x3a2   : > { %v2587_v29 = vmax.f32 %v2517_v53, 0.0  ;;  %v7605_v53 = vld [vmem:[#allocation3 + $0xaa] sm:$0xff] }
 0x3a3   : > { %v2586_v46 = vmax.f32 %v2512_v3, 0.0  ;;  %v2697_v51 = vld [vmem:[#allocation3 + $0x129] sm:$0xff] }
 0x3a4   : > { %2623 = vst.msk [vmem:[#allocation3 + $0x141] sm:$0xff] %vm253_vm0, %v2587_v29  ;;  %3012 = vrot.lane.b32.xlu1 %v2697_v51, %s5383_s26  ;;  %v2696_v45 = vld [vmem:[#allocation3 + $0x121] sm:$0xff] }
 0x3a5   : > { %2622 = vst.msk [vmem:[#allocation3 + $0x139] sm:$0xff] %vm253_vm0, %v2586_v46  ;;  %3010 = vrot.lane.b32.xlu0 %v2696_v45, %s5383_s26  ;;  %v7613_v3 = vld [vmem:[#allocation3 + $0xc2] sm:$0xff]  ;;  %v7621_v46 = vld [vmem:[#allocation3 + $0xda] sm:$0xff] }
 0x3a6   : > { %v7617_v29 = vld [vmem:[#allocation3 + $0xe2] sm:$0xff]  ;;  %v7625_v51 = vld [vmem:[#allocation3 + $0xfa] sm:$0xff] }
 0x3a7   : > { %v5202_v47 = vpop.f32.mrb[28].mxu0 }
 0x3a8   : > { %v2527_v7 = vadd.f32 %v5202_v47, %v7401_v37  ;;  %v2521_v15 = vpop.f32.mrb[29].mxu0  ;;  %v7631_v47 = vld [vmem:[#allocation3 + $0xf2] sm:$0xff] }
 0x3a9   : > { %v2522_v48 = vadd.f32 %v7401_v37, %v2521_v15  ;;  %v2727_v15 = vld [vmem:[#allocation3 + $0x112] sm:$0xff] }
 0x3aa   : > { %v2589_v38 = vmax.f32 %v2527_v7, 0.0 }
 0x3ab   : > { %v2588_v54 = vmax.f32 %v2522_v48, 0.0  ;;  %v2699_v59 = vld [vmem:[#allocation3 + $0x141] sm:$0xff]  ;;  %v2726_v48 = vld [vmem:[#allocation3 + $0x10a] sm:$0xff] }
 0x3ac   : > { %2625 = vst.msk [vmem:[#allocation3 + $0x159] sm:$0xff] %vm253_vm0, %v2589_v38  ;;  %3016 = vrot.lane.b32.xlu1 %v2699_v59, %s5383_s26  ;;  %v2698_v2 = vld [vmem:[#allocation3 + $0x139] sm:$0xff]  ;;  %v2729_v59 = vld [vmem:[#allocation3 + $0x12a] sm:$0xff] }
 0x3ad   : > { %2624 = vst.msk [vmem:[#allocation3 + $0x151] sm:$0xff] %vm253_vm0, %v2588_v54  ;;  %3014 = vrot.lane.b32.xlu0 %v2698_v2, %s5383_s26  ;;  %v2728_v2 = vld [vmem:[#allocation3 + $0x122] sm:$0xff] }
 0x3af   : > { %v5205_v50 = vpop.f32.mrb[30].mxu0 }
 0x3b0   : > { %v2537_v39 = vadd.f32 %v5205_v50, %v7401_v37  ;;  %v2531_v18 = vpop.f32.mrb[31].mxu0  ;;  %v2731_v50 = vld [vmem:[#allocation3 + $0x142] sm:$0xff] }
 0x3b1   : > { %v2532_v25 = vadd.f32 %v7401_v37, %v2531_v18  ;;  %v2730_v18 = vld [vmem:[#allocation3 + $0x13a] sm:$0xff] }
 0x3b2   : > { %v2591_v49 = vmax.f32 %v2537_v39, 0.0 }
 0x3b3   : > { %v2590_v35 = vmax.f32 %v2532_v25, 0.0  ;;  %v2701_v22 = vld [vmem:[#allocation3 + $0x159] sm:$0xff] }
 0x3b4   : > { %2627 = vst.msk [vmem:[#allocation3 + $0x171] sm:$0xff] %vm253_vm0, %v2591_v49  ;;  %3020 = vrot.lane.b32.xlu1 %v2701_v22, %s5383_s26  ;;  %v2700_v5 = vld [vmem:[#allocation3 + $0x151] sm:$0xff]  ;;  %v2733_v49 = vld [vmem:[#allocation3 + $0x15a] sm:$0xff] }
 0x3b5   : > { %2626 = vst.msk [vmem:[#allocation3 + $0x169] sm:$0xff] %vm253_vm0, %v2590_v35  ;;  %3018 = vrot.lane.b32.xlu0 %v2700_v5, %s5383_s26  ;;  %v2732_v35 = vld [vmem:[#allocation3 + $0x152] sm:$0xff] }
 0x3b7   : > { %v5208_v28 = vpop.f32.mrb[32].mxu0 }
 0x3b8   : > { %v2547_v8 = vadd.f32 %v5208_v28, %v7401_v37  ;;  %v2541_v19 = vpop.f32.mrb[33].mxu0 }
 0x3b9   : > { %v2542_v11 = vadd.f32 %v7401_v37, %v2541_v19  ;;  %v7659_v19 = vld [vmem:[#allocation3 + $0x20] sm:$0xff] }
 0x3ba   : > { %v2593_v55 = vmax.f32 %v2547_v8, 0.0 }
 0x3bb   : > { %v2592_v58 = vmax.f32 %v2542_v11, 0.0  ;;  %v2703_v23 = vld [vmem:[#allocation3 + $0x171] sm:$0xff] }
 0x3bc   : > { %2629 = vst.msk [vmem:[#allocation3 + $0x189] sm:$0xff] %vm253_vm0, %v2593_v55  ;;  %3024 = vrot.lane.b32.xlu1 %v2703_v23, %s5383_s26  ;;  %v2702_v16 = vld [vmem:[#allocation3 + $0x169] sm:$0xff]  ;;  %v2735_v28 = vld [vmem:[#allocation3 + $0x172] sm:$0xff] }
 0x3bd   : > { %2628 = vst.msk [vmem:[#allocation3 + $0x181] sm:$0xff] %vm253_vm0, %v2592_v58  ;;  %3022 = vrot.lane.b32.xlu0 %v2702_v16, %s5383_s26  ;;  %v2734_v8 = vld [vmem:[#allocation3 + $0x16a] sm:$0xff]  ;;  %v7661_v11 = vld [vmem:[#allocation3 + $0x18] sm:$0xff] }
 0x3be   : > { %v7671_v23 = vld [vmem:[#allocation3 + $0x38] sm:$0xff]  ;;  %v7673_v16 = vld [vmem:[#allocation3 + $0x30] sm:$0xff] }
 0x3bf   : > { %v5211_v26 = vpop.f32.mrb[34].mxu0 }
 0x3c0   : > { %v2557_v61 = vadd.f32 %v5211_v26, %v7401_v37  ;;  %3092 = vrot.lane.b32.xlu1 %v2705_v63, %s5384_s27  ;;  %v2551_v43 = vpop.f32.mrb[35].mxu0 }
 0x3c1   : > { %v2552_v44 = vadd.f32 %v7401_v37, %v2551_v43  ;;  %3090 = vrot.lane.b32.xlu0 %v2704_v41, %s5384_s27  ;;  %v7561_v37 = vld [vmem:[#allocation3 + $0x3a] sm:$0xff]  ;;  %v7681_v41 = vld [vmem:[#allocation3 + $0x50] sm:$0xff] }
 0x3c2   : > { %v2595_v12 = vmax.f32 %v2557_v61, 0.0  ;;  %v7685_v61 = vld [vmem:[#allocation3 + $0x48] sm:$0xff] }
 0x3c3   : > { %v2594_v24 = vmax.f32 %v2552_v44, 0.0  ;;  %v7693_v44 = vld [vmem:[#allocation3 + $0x68] sm:$0xff] }
 0x3c4   : > { %2631 = vst.msk [vmem:[#allocation3 + $0x1a1] sm:$0xff] %vm253_vm0, %v2595_v12  ;;  %3096 = vrot.lane.b32.xlu1 %v7547_v20, %s5384_s27 }
 0x3c5   : > { %2639 = vst.msk [vmem:[#allocation3 + $0x1a1] sm:$0xff] %vm253_vm0, %v9221_v31  ;;  %2630 = vst.msk [vmem:[#allocation3 + $0x199] sm:$0xff] %vm253_vm0, %v2594_v24  ;;  %3094 = vrot.lane.b32.xlu0 %v7552_v4, %s5384_s27  ;;  %v7697_v24 = vld [vmem:[#allocation3 + $0x60] sm:$0xff] }
 0x3c6   : > { %2638 = vst.msk [vmem:[#allocation3 + $0x199] sm:$0xff] %vm253_vm0, %v9221_v31  ;;  %v7577_v31 = vld [vmem:[#allocation3 + $0x6a] sm:$0xff] }
 0x3c8   : > { %3100 = vrot.lane.b32.xlu1 %v7561_v37, %s5384_s27 }
 0x3c9   : > { %3098 = vrot.lane.b32.xlu0 %v7565_v40, %s5384_s27 }
 0x3cb   : > { %v7627_v45 = vpop.permute.xlu1 %2964 }
 0x3cc   : > { %3104 = vrot.lane.b32.xlu1 %v7569_v52, %s5384_s27  ;;  %v7633_v7 = vpop.permute.xlu0 %2962 }
 0x3cd   : > { %3102 = vrot.lane.b32.xlu0 %v7573_v36, %s5384_s27 }
 0x3cf   : > { %v7639_v38 = vpop.permute.xlu1 %2968 }
 0x3d0   : > { %3108 = vrot.lane.b32.xlu1 %v7577_v31, %s5384_s27  ;;  %v7641_v54 = vpop.permute.xlu0 %2966 }
 0x3d1   : > { %3106 = vrot.lane.b32.xlu0 %v7581_v13, %s5384_s27 }
 0x3d3   : > { %v7645_v39 = vpop.permute.xlu1 %2972 }
 0x3d4   : > { %3112 = vrot.lane.b32.xlu1 %v7585_v17, %s5384_s27  ;;  %v7648_v25 = vpop.permute.xlu0 %2970 }
 0x3d5   : > { %3110 = vrot.lane.b32.xlu0 %v7589_v42, %s5384_s27 }
 0x3d7   : > { %v7653_v22 = vpop.permute.xlu1 %2976 }
 0x3d8   : > { %3116 = vrot.lane.b32.xlu1 %v7593_v30, %s5384_s27  ;;  %9222 = vst [vmem:[#allocation69_spill] sm:$0xff] %v7653_v22  ;;  %v7655_v5 = vpop.permute.xlu0 %2974  ;;  %v7779_v22 = vld [vmem:[#allocation3 + $0x108] sm:$0xff] }
 0x3d9   : > { %3114 = vrot.lane.b32.xlu0 %v7597_v57, %s5384_s27  ;;  %9223 = vst [vmem:[#allocation5_spill] sm:$0xff] %v7655_v5  ;;  %9250 = vst [vmem:[#allocation152_spill] sm:$0xff] %v7779_v22 }
 0x3db   : > { %v7663_v55 = vpop.permute.xlu1 %2980 }
 0x3dc   : > { %3120 = vrot.lane.b32.xlu1 %v7601_v60, %s5384_s27  ;;  %9224 = vst [vmem:[#allocation10_spill] sm:$0xff] %v7663_v55  ;;  %v7667_v58 = vpop.permute.xlu0 %2978 }
 0x3dd   : > { %3118 = vrot.lane.b32.xlu0 %v7605_v53, %s5384_s27  ;;  %9225 = vst [vmem:[#allocation9_spill] sm:$0xff] %v7667_v58  ;;  %v7769_v58 = vld [vmem:[#allocation3 + $0xf0] sm:$0xff] }
 0x3df   : > { %v7679_v63 = vpop.permute.xlu1 %2984 }
 0x3e0   : > { %3124 = vrot.lane.b32.xlu1 %v7609_v14, %s5384_s27  ;;  %9226 = vst [vmem:[#allocation68_spill] sm:$0xff] %v7679_v63  ;;  %v7683_v26 = vpop.permute.xlu0 %2982 }
 0x3e1   : > { %3122 = vrot.lane.b32.xlu0 %v7613_v3, %s5384_s27  ;;  %9227 = vst [vmem:[#allocation73_spill] sm:$0xff] %v7683_v26  ;;  %v7757_v26 = vld [vmem:[#allocation3 + $0xd8] sm:$0xff] }
 0x3e4   : > { %3128 = vrot.lane.b32.xlu1 %v7617_v29, %s5384_s27 }
 0x3e5   : > { %3126 = vrot.lane.b32.xlu0 %v7621_v46, %s5384_s27 }
 0x3e6   : > { %v7691_v43 = vpop.permute.xlu1 %2988 }
 0x3e7   : > { %9228 = vst [vmem:[#allocation13_spill] sm:$0xff] %v7691_v43  ;;  %v7695_v12 = vpop.permute.xlu0 %2986 }
 0x3e8   : > { %3132 = vrot.lane.b32.xlu1 %v7625_v51, %s5384_s27  ;;  %9229 = vst [vmem:[#allocation14_spill] sm:$0xff] %v7695_v12  ;;  %v7745_v12 = vld [vmem:[#allocation3 + $0xc0] sm:$0xff] }
 0x3e9   : > { %3130 = vrot.lane.b32.xlu0 %v7631_v47, %s5384_s27  ;;  %9243 = vst [vmem:[#allocation88_spill] sm:$0xff] %v7745_v12 }
 0x3ec   : > { %3136 = vrot.lane.b32.xlu1 %v2727_v15, %s5384_s27 }
 0x3ed   : > { %3134 = vrot.lane.b32.xlu0 %v2726_v48, %s5384_s27  ;;  %v7705_v48 = vld [vmem:[#allocation3 + $0x80] sm:$0xff] }
 0x3ee   : > { %v7703_v15 = vpop.permute.xlu1 %2992  ;;  %9231 = vst [vmem:[#allocation77_spill] sm:$0xff] %v7705_v48 }
 0x3ef   : > { %9230 = vst [vmem:[#allocation72_spill] sm:$0xff] %v7703_v15 }
 0x3f0   : > { %3140 = vrot.lane.b32.xlu1 %v2729_v59, %s5384_s27  ;;  %v7707_v59 = vpop.permute.xlu0 %2990 }
 0x3f1   : > { %3138 = vrot.lane.b32.xlu0 %v2728_v2, %s5384_s27  ;;  %9232 = vst [vmem:[#allocation18_spill] sm:$0xff] %v7707_v59  ;;  %v7709_v2 = vld [vmem:[#allocation3 + $0x78] sm:$0xff]  ;;  %v7733_v59 = vld [vmem:[#allocation3 + $0xa8] sm:$0xff] }
 0x3f2   : > { %9240 = vst [vmem:[#allocation84_spill] sm:$0xff] %v7733_v59 }
 0x3f4   : > { %3144 = vrot.lane.b32.xlu1 %v2731_v50, %s5384_s27 }
 0x3f5   : > { %3142 = vrot.lane.b32.xlu0 %v2730_v18, %s5384_s27  ;;  %v7717_v18 = vld [vmem:[#allocation3 + $0x98] sm:$0xff] }
 0x3f6   : > { %v7715_v50 = vpop.permute.xlu1 %2996  ;;  %9234 = vst [vmem:[#allocation81_spill] sm:$0xff] %v7717_v18 }
 0x3f7   : > { %9233 = vst [vmem:[#allocation76_spill] sm:$0xff] %v7715_v50 }
 0x3f8   : > { %3148 = vrot.lane.b32.xlu1 %v2733_v49, %s5384_s27  ;;  %v7719_v49 = vpop.permute.xlu0 %2994 }
 0x3f9   : > { %3146 = vrot.lane.b32.xlu0 %v2732_v35, %s5384_s27  ;;  %9235 = vst [vmem:[#allocation17_spill] sm:$0xff] %v7719_v49  ;;  %v7721_v35 = vld [vmem:[#allocation3 + $0x90] sm:$0xff]  ;;  %v7741_v49 = vld [vmem:[#allocation3 + $0xc8] sm:$0xff] }
 0x3fa   : > { %9236 = vst [vmem:[#allocation22_spill] sm:$0xff] %v7721_v35 }
 0x3fc   : > { %3152 = vrot.lane.b32.xlu1 %v2735_v28, %s5384_s27 }
 0x3fd   : > { %3150 = vrot.lane.b32.xlu0 %v2734_v8, %s5384_s27  ;;  %v7729_v8 = vld [vmem:[#allocation3 + $0xb0] sm:$0xff] }
 0x3fe   : > { %v7727_v28 = vpop.permute.xlu1 %3000  ;;  %9238 = vst [vmem:[#allocation85_spill] sm:$0xff] %v7729_v8 }
 0x3ff   : > { %9237 = vst [vmem:[#allocation80_spill] sm:$0xff] %v7727_v28  ;;  %v7731_v15 = vpop.permute.xlu0 %2998 }
 0x400   : > { %3220 = vrot.lane.b32.xlu1 %v7659_v19, %s5385_s28  ;;  %9239 = vst [vmem:[#allocation21_spill] sm:$0xff] %v7731_v15  ;;  %v7753_v15 = vld [vmem:[#allocation3 + $0xe0] sm:$0xff] }
 0x401   : > { %3218 = vrot.lane.b32.xlu0 %v7661_v11, %s5385_s28 }
 0x404   : > { %3224 = vrot.lane.b32.xlu1 %v7671_v23, %s5385_s28 }
 0x405   : > { %3222 = vrot.lane.b32.xlu0 %v7673_v16, %s5385_s28 }
 0x406   : > { %v7739_v50 = vpop.permute.xlu1 %3004 }
 0x407   : > { %9241 = vst [vmem:[#allocation25_spill] sm:$0xff] %v7739_v50  ;;  %v7743_v43 = vpop.permute.xlu0 %3002 }
 0x408   : > { %3228 = vrot.lane.b32.xlu1 %v7681_v41, %s5385_s28  ;;  %9242 = vst [vmem:[#allocation26_spill] sm:$0xff] %v7743_v43  ;;  %v7765_v43 = vld [vmem:[#allocation3 + $0xf8] sm:$0xff] }
 0x409   : > { %3226 = vrot.lane.b32.xlu0 %v7685_v61, %s5385_s28 }
 0x40c   : > { %3232 = vrot.lane.b32.xlu1 %v7693_v44, %s5385_s28 }
 0x40d   : > { %3230 = vrot.lane.b32.xlu0 %v7697_v24, %s5385_s28 }
 0x40e   : > { %v7751_v28 = vpop.permute.xlu1 %3008 }
 0x40f   : > { %9244 = vst [vmem:[#allocation89_spill] sm:$0xff] %v7751_v28  ;;  %v7755_v63 = vpop.permute.xlu0 %3006 }
 0x410   : > { %3236 = vrot.lane.b32.xlu1 %v7705_v48, %s5385_s28  ;;  %9245 = vst [vmem:[#allocation6_spill] sm:$0xff] %v7755_v63 }
 0x411   : > { %3234 = vrot.lane.b32.xlu0 %v7709_v2, %s5385_s28 }
 0x414   : > { %3240 = vrot.lane.b32.xlu1 %v7717_v18, %s5385_s28 }
 0x415   : > { %3238 = vrot.lane.b32.xlu0 %v7721_v35, %s5385_s28 }
 0x416   : > { %v7763_v50 = vpop.permute.xlu1 %3012 }
 0x417   : > { %9246 = vst [vmem:[#allocation4_spill] sm:$0xff] %v7763_v50  ;;  %v7767_v55 = vpop.permute.xlu0 %3010  ;;  %v4210_v50 = vld [vmem:[%s8739_s3] sm:$0xff] }
 0x418   : > { %3244 = vrot.lane.b32.xlu1 %v7729_v8, %s5385_s28  ;;  %9247 = vst [vmem:[#allocation7_spill] sm:$0xff] %v7767_v55  ;;  %v4211_v55 = vld [vmem:[%s8739_s3 + $0x8] sm:$0xff] }
 0x419   : > { %3242 = vrot.lane.b32.xlu0 %v7733_v59, %s5385_s28 }
 0x41c   : > { %3248 = vrot.lane.b32.xlu1 %v7741_v49, %s5385_s28 }
 0x41d   : > { %3246 = vrot.lane.b32.xlu0 %v7745_v12, %s5385_s28 }
 0x41e   : > { %v7775_v28 = vpop.permute.xlu1 %3016 }
 0x41f   : > { %9248 = vst [vmem:[#allocation66_spill] sm:$0xff] %v7775_v28  ;;  %v7777_v63 = vpop.permute.xlu0 %3014  ;;  %v5278_v28 = vpack.c.bf16 %v4211_v55, %v4210_v50 }
 0x420   : > { %3252 = vrot.lane.b32.xlu1 %v7753_v15, %s5385_s28  ;;  %9249 = vst [vmem:[#allocation67_spill] sm:$0xff] %v7777_v63 }
 0x421   : > { %3250 = vrot.lane.b32.xlu0 %v7757_v26, %s5385_s28  ;;  %5279 = vmatprep.subr.bf16.mxu1 %v5278_v28 }
 0x422   : > { %5281 = vmatpush3.bf16.msra.mxu1 %v5278_v28 }
 0x424   : > { %3256 = vrot.lane.b32.xlu1 %v7765_v43, %s5385_s28 }
 0x425   : > { %3254 = vrot.lane.b32.xlu0 %v7769_v58, %s5385_s28 }
 0x426   : > { %v7791_v5 = vpop.permute.xlu1 %3020 }
 0x427   : > { %9251 = vst [vmem:[#allocation153_spill] sm:$0xff] %v7791_v5  ;;  %v7793_v63 = vpop.permute.xlu0 %3018 }
 0x428   : > { %3346 = vrot.lane.b32.xlu1 %v7427_v27, %s5386_s29  ;;  %9252 = vst [vmem:[#allocation29_spill] sm:$0xff] %v7793_v63  ;;  %v4212_v27 = vld [vmem:[%s8739_s3 + $0x10] sm:$0xff] }
 0x429   : > { %3258 = vrot.lane.b32.xlu0 %v7779_v22, %s5385_s28  ;;  %v4213_v22 = vld [vmem:[%s8739_s3 + $0x18] sm:$0xff] }
 0x42a   : > { %v5282_v55 = vpack.c.bf16 %v4213_v22, %v4212_v27 }
 0x42c   : > { %3474 = vrot.lane.b32.xlu1 %v7552_v4, %s5387_s30  ;;  %5283 = vmatprep.subr.bf16.mxu1 %v5282_v55 }
 0x42d   : > { %3348 = vrot.lane.b32.xlu0 %v7423_v62, %s5386_s29  ;;  %5285 = vmatpush3.bf16.msra.mxu1 %v5282_v55  ;;  %v4214_v62 = vld [vmem:[%s8739_s3 + $0x20] sm:$0xf] }
 0x42e   : > { %v7805_v5 = vpop.permute.xlu1 %3024  ;;  %5220 = vmatprep.subr.msk.mxu1 %vm2311_vm3, %v4214_v62 }
 0x42f   : > { %9253 = vst [vmem:[#allocation30_spill] sm:$0xff] %v7805_v5  ;;  %v7807_v50 = vpop.permute.xlu0 %3022 }
 0x430   : > { %9254 = vst [vmem:[#allocation92_spill] sm:$0xff] %v7807_v50  ;;  %3602 = vrot.lane.b32.xlu1 %v7673_v16, %s5388_s6 }
 0x431   : > { %3476 = vrot.lane.b32.xlu0 %v7547_v20, %s5387_s30  ;;  %5221 = vmatpush3.msk.msra.mxu1 %vm2311_vm3, %v4214_v62 }
 0x432   : > { %v7816_v4 = vpop.permute.xlu1 %3092 }
 0x433   : > { %v7819_v28 = vpop.permute.xlu0 %3090 }
 0x434   : > { %3730 = vrot.lane.b32.xlu1 %v7439_v10, %s5389_s9 }
 0x435   : > { %3604 = vrot.lane.b32.xlu0 %v7671_v23, %s5388_s6 }
 0x436   : > { %v7826_v20 = vpop.permute.xlu1 %3096 }
 0x437   : > { %v7828_v22 = vpop.permute.xlu0 %3094 }
 0x438   : > { %3732 = vrot.lane.b32.xlu1 %v7435_v0, %s5389_s9 }
 0x439   : > { %3350 = vrot.lane.b32.xlu0 %v7439_v10, %s5386_s29 }
 0x43a   : > { %v7834_v27 = vpop.permute.xlu1 %3100 }
 0x43b   : > { %v7836_v55 = vpop.permute.xlu0 %3098 }
 0x43c   : > { %3352 = vrot.lane.b32.xlu1 %v7435_v0, %s5386_s29 }
 0x43d   : > { %3858 = vrot.lane.b32.xlu0 %v7565_v40, %s5390_s23 }
 0x43e   : > { %v7842_v62 = vpop.permute.xlu1 %3104 }
 0x43f   : > { %v7844_v5 = vpop.permute.xlu0 %3102 }
 0x440   : > { %3860 = vrot.lane.b32.xlu1 %v7561_v37, %s5390_s23 }
 0x441   : > { %3478 = vrot.lane.b32.xlu0 %v7565_v40, %s5387_s30 }
 0x442   : > { %v7850_v10 = vpop.permute.xlu1 %3108 }
 0x443   : > { %9255 = vst [vmem:[#allocation93_spill] sm:$0xff] %v7850_v10  ;;  %v7852_v50 = vpop.permute.xlu0 %3106 }
 0x444   : > { %3606 = vrot.lane.b32.xlu1 %v7685_v61, %s5388_s6 }
 0x445   : > { %3480 = vrot.lane.b32.xlu0 %v7561_v37, %s5387_s30 }
 0x446   : > { %v7858_v0 = vpop.permute.xlu1 %3112 }
 0x447   : > { %9256 = vst [vmem:[#allocation116_spill] sm:$0xff] %v7858_v0  ;;  %v7860_v63 = vpop.permute.xlu0 %3110 }
 0x448   : > { %9257 = vst [vmem:[#allocation117_spill] sm:$0xff] %v7860_v63  ;;  %3734 = vrot.lane.b32.xlu1 %v7450_v6, %s5389_s9 }
 0x449   : > { %3608 = vrot.lane.b32.xlu0 %v7681_v41, %s5388_s6 }
 0x44a   : > { %v7866_v40 = vpop.permute.xlu1 %3116 }
 0x44b   : > { %9258 = vst [vmem:[#allocation8_spill] sm:$0xff] %v7866_v40  ;;  %v7868_v10 = vpop.permute.xlu0 %3114 }
 0x44c   : > { %9259 = vst [vmem:[#allocation11_spill] sm:$0xff] %v7868_v10  ;;  %3736 = vrot.lane.b32.xlu1 %v7447_v33, %s5389_s9 }
 0x44d   : > { %3354 = vrot.lane.b32.xlu0 %v7450_v6, %s5386_s29 }
 0x44e   : > { %v7874_v37 = vpop.permute.xlu1 %3120 }
 0x44f   : > { %9260 = vst [vmem:[#allocation70_spill] sm:$0xff] %v7874_v37  ;;  %v7876_v0 = vpop.permute.xlu0 %3118 }
 0x450   : > { %9261 = vst [vmem:[#allocation71_spill] sm:$0xff] %v7876_v0  ;;  %3356 = vrot.lane.b32.xlu1 %v7447_v33, %s5386_s29 }
 0x451   : > { %3862 = vrot.lane.b32.xlu0 %v7573_v36, %s5390_s23 }
 0x452   : > { %v7882_v63 = vpop.permute.xlu1 %3124 }
 0x453   : > { %9262 = vst [vmem:[#allocation154_spill] sm:$0xff] %v7882_v63  ;;  %v7884_v40 = vpop.permute.xlu0 %3122 }
 0x454   : > { %9263 = vst [vmem:[#allocation155_spill] sm:$0xff] %v7884_v40  ;;  %3864 = vrot.lane.b32.xlu1 %v7569_v52, %s5390_s23  ;;  %v2780_v40 = vld [vmem:[#allocation3 + $0x99] sm:$0xff] }
 0x455   : > { %3482 = vrot.lane.b32.xlu0 %v7573_v36, %s5387_s30 }
 0x456   : > { %v7890_v6 = vpop.permute.xlu1 %3128 }
 0x457   : > { %9264 = vst [vmem:[#allocation31_spill] sm:$0xff] %v7890_v6  ;;  %v7892_v37 = vpop.permute.xlu0 %3126 }
 0x458   : > { %9265 = vst [vmem:[#allocation32_spill] sm:$0xff] %v7892_v37  ;;  %3610 = vrot.lane.b32.xlu1 %v7697_v24, %s5388_s6 }
 0x459   : > { %3484 = vrot.lane.b32.xlu0 %v7569_v52, %s5387_s30 }
 0x45a   : > { %v7898_v33 = vpop.permute.xlu1 %3132 }
 0x45b   : > { %9266 = vst [vmem:[#allocation94_spill] sm:$0xff] %v7898_v33  ;;  %v7900_v63 = vpop.permute.xlu0 %3130 }
 0x45c   : > { %9267 = vst [vmem:[#allocation95_spill] sm:$0xff] %v7900_v63  ;;  %3738 = vrot.lane.b32.xlu1 %v7460_v9, %s5389_s9 }
 0x45d   : > { %3612 = vrot.lane.b32.xlu0 %v7693_v44, %s5388_s6 }
 0x45e   : > { %v7906_v36 = vpop.permute.xlu1 %3136 }
 0x45f   : > { %9268 = vst [vmem:[#allocation118_spill] sm:$0xff] %v7906_v36  ;;  %v7908_v6 = vpop.permute.xlu0 %3134 }
 0x460   : > { %9269 = vst [vmem:[#allocation119_spill] sm:$0xff] %v7908_v6  ;;  %3740 = vrot.lane.b32.xlu1 %v7457_v21, %s5389_s9 }
 0x461   : > { %3358 = vrot.lane.b32.xlu0 %v7460_v9, %s5386_s29 }
 0x462   : > { %v7914_v52 = vpop.permute.xlu1 %3140 }
 0x463   : > { %9270 = vst [vmem:[#allocation12_spill] sm:$0xff] %v7914_v52  ;;  %v7916_v33 = vpop.permute.xlu0 %3138 }
 0x464   : > { %9271 = vst [vmem:[#allocation15_spill] sm:$0xff] %v7916_v33  ;;  %3360 = vrot.lane.b32.xlu1 %v7457_v21, %s5386_s29 }
 0x465   : > { %3866 = vrot.lane.b32.xlu0 %v7581_v13, %s5390_s23 }
 0x466   : > { %v7922_v63 = vpop.permute.xlu1 %3144 }
 0x467   : > { %9272 = vst [vmem:[#allocation74_spill] sm:$0xff] %v7922_v63  ;;  %v7924_v36 = vpop.permute.xlu0 %3142 }
 0x468   : > { %9273 = vst [vmem:[#allocation75_spill] sm:$0xff] %v7924_v36  ;;  %3868 = vrot.lane.b32.xlu1 %v7577_v31, %s5390_s23 }
 0x469   : > { %3486 = vrot.lane.b32.xlu0 %v7581_v13, %s5387_s30 }
 0x46a   : > { %v7930_v9 = vpop.permute.xlu1 %3148 }
 0x46b   : > { %9274 = vst [vmem:[#allocation156_spill] sm:$0xff] %v7930_v9  ;;  %v7932_v52 = vpop.permute.xlu0 %3146 }
 0x46c   : > { %9275 = vst [vmem:[#allocation157_spill] sm:$0xff] %v7932_v52  ;;  %3614 = vrot.lane.b32.xlu1 %v7709_v2, %s5388_s6 }
 0x46d   : > { %3488 = vrot.lane.b32.xlu0 %v7577_v31, %s5387_s30 }
 0x46e   : > { %v7938_v21 = vpop.permute.xlu1 %3152 }
 0x46f   : > { %9276 = vst [vmem:[#allocation33_spill] sm:$0xff] %v7938_v21  ;;  %v7940_v63 = vpop.permute.xlu0 %3150 }
 0x470   : > { %9277 = vst [vmem:[#allocation34_spill] sm:$0xff] %v7940_v63  ;;  %3742 = vrot.lane.b32.xlu1 %v7470_v56, %s5389_s9 }
 0x471   : > { %3616 = vrot.lane.b32.xlu0 %v7705_v48, %s5388_s6 }
 0x472   : > { %v7946_v13 = vpop.permute.xlu1 %3220 }
 0x473   : > { %v7948_v9 = vpop.permute.xlu0 %3218 }
 0x474   : > { %3744 = vrot.lane.b32.xlu1 %v7467_v32, %s5389_s9 }
 0x475   : > { %3362 = vrot.lane.b32.xlu0 %v7470_v56, %s5386_s29 }
 0x476   : > { %v7954_v31 = vpop.permute.xlu1 %3224 }
 0x477   : > { %v7956_v21 = vpop.permute.xlu0 %3222 }
 0x478   : > { %3364 = vrot.lane.b32.xlu1 %v7467_v32, %s5386_s29 }
 0x479   : > { %3870 = vrot.lane.b32.xlu0 %v7589_v42, %s5390_s23 }
 0x47a   : > { %v7962_v63 = vpop.permute.xlu1 %3228 }
 0x47b   : > { %v7964_v52 = vpop.permute.xlu0 %3226 }
 0x47c   : > { %3872 = vrot.lane.b32.xlu1 %v7585_v17, %s5390_s23 }
 0x47d   : > { %3490 = vrot.lane.b32.xlu0 %v7589_v42, %s5387_s30 }
 0x47e   : > { %v7970_v56 = vpop.permute.xlu1 %3232 }
 0x47f   : > { %v7972_v36 = vpop.permute.xlu0 %3230 }
 0x480   : > { %3618 = vrot.lane.b32.xlu1 %v7721_v35, %s5388_s6 }
 0x481   : > { %3492 = vrot.lane.b32.xlu0 %v7585_v17, %s5387_s30 }
 0x482   : > { %v7978_v32 = vpop.permute.xlu1 %3236 }
 0x483   : > { %v7980_v33 = vpop.permute.xlu0 %3234 }
 0x484   : > { %3746 = vrot.lane.b32.xlu1 %v7484_v34, %s5389_s9 }
 0x485   : > { %3620 = vrot.lane.b32.xlu0 %v7717_v18, %s5388_s6 }
 0x486   : > { %v7986_v42 = vpop.permute.xlu1 %3240 }
 0x487   : > { %9278 = vst [vmem:[#allocation96_spill] sm:$0xff] %v7986_v42  ;;  %v7988_v6 = vpop.permute.xlu0 %3238  ;;  %v2878_v42 = vld [vmem:[#allocation3 + $0xc1] sm:$0xff] }
 0x488   : > { %3748 = vrot.lane.b32.xlu1 %v7479_v1, %s5389_s9 }
 0x489   : > { %3366 = vrot.lane.b32.xlu0 %v7484_v34, %s5386_s29 }
 0x48a   : > { %v7994_v17 = vpop.permute.xlu1 %3244 }
 0x48b   : > { %9279 = vst [vmem:[#allocation97_spill] sm:$0xff] %v7994_v17  ;;  %v7996_v37 = vpop.permute.xlu0 %3242 }
 0x48c   : > { %9280 = vst [vmem:[#allocation120_spill] sm:$0xff] %v7996_v37  ;;  %3368 = vrot.lane.b32.xlu1 %v2780_v40, %s5386_s29 }
 0x48d   : > { %3874 = vrot.lane.b32.xlu0 %v7597_v57, %s5390_s23 }
 0x48e   : > { %v8001_v0 = vpop.permute.xlu1 %3248 }
 0x48f   : > { %9281 = vst [vmem:[#allocation121_spill] sm:$0xff] %v8001_v0  ;;  %v8003_v18 = vpop.permute.xlu0 %3246 }
 0x490   : > { %9282 = vst [vmem:[#allocation16_spill] sm:$0xff] %v8003_v18  ;;  %3876 = vrot.lane.b32.xlu1 %v7593_v30, %s5390_s23  ;;  %v2876_v18 = vld [vmem:[#allocation3 + $0xa9] sm:$0xff] }
 0x491   : > { %3494 = vrot.lane.b32.xlu0 %v7597_v57, %s5387_s30 }
 0x492   : > { %v8009_v1 = vpop.permute.xlu1 %3252 }
 0x493   : > { %9283 = vst [vmem:[#allocation19_spill] sm:$0xff] %v8009_v1  ;;  %v8011_v34 = vpop.permute.xlu0 %3250 }
 0x494   : > { %9284 = vst [vmem:[#allocation78_spill] sm:$0xff] %v8011_v34  ;;  %3622 = vrot.lane.b32.xlu1 %v7733_v59, %s5388_s6  ;;  %v2877_v34 = vld [vmem:[#allocation3 + $0xb1] sm:$0xff] }
 0x495   : > { %3496 = vrot.lane.b32.xlu0 %v7593_v30, %s5387_s30 }
 0x496   : > { %v8017_v40 = vpop.permute.xlu1 %3256 }
 0x497   : > { %9285 = vst [vmem:[#allocation79_spill] sm:$0xff] %v8017_v40  ;;  %v8019_v0 = vpop.permute.xlu0 %3254 }
 0x498   : > { %9286 = vst [vmem:[#allocation158_spill] sm:$0xff] %v8019_v0  ;;  %3750 = vrot.lane.b32.xlu1 %v2876_v18, %s5389_s9 }
 0x499   : > { %3624 = vrot.lane.b32.xlu0 %v7729_v8, %s5388_s6 }
 0x49a   : > { %v3347_v57 = vpop.permute.xlu1 %3346 }
 0x49b   : > { %v8024_v1 = vpop.permute.xlu0 %3258 }
 0x49c   : > { %9287 = vst [vmem:[#allocation159_spill] sm:$0xff] %v8024_v1  ;;  %3752 = vrot.lane.b32.xlu1 %v2877_v34, %s5389_s9  ;;  %v2640_v1 = vld [vmem:[#allocation3] sm:$0xff] }
 0x49d   : > { %3370 = vrot.lane.b32.xlu0 %v2876_v18, %s5386_s29  ;;  %v2641_v18 = vld [vmem:[#allocation3 + $0x8] sm:$0xff] }
 0x49e   : > { %v3475_v59 = vpop.permute.xlu1 %3474  ;;  %v3955_v48 = vsel %vm253_vm0, %v2641_v18, %v7627_v45  ;;  %v2879_v18 = vld [vmem:[#allocation3 + $0xc9] sm:$0xff] }
 0x49f   : > { %v3349_v30 = vpop.permute.xlu0 %3348 }
 0x4a0   : > { %3372 = vrot.lane.b32.xlu1 %v2877_v34, %s5386_s29  ;;  %v3954_v34 = vsel %vm253_vm0, %v2640_v1, %v7633_v7  ;;  %v3987_v7 = vsel %vm1931_vm4, %v3955_v48, %v7816_v4 }
 0x4a1   : > { %3878 = vrot.lane.b32.xlu0 %v7605_v53, %s5390_s23  ;;  %v3986_v37 = vsel %vm1931_vm4, %v3954_v34, %v7819_v28  ;;  %v4019_v28 = vsel %vm1968_vm5, %v3987_v7, %v7946_v13 }
 0x4a2   : > { %v3603_v40 = vpop.permute.xlu1 %3602  ;;  %v4051_v45 = vsel %vm2005_vm6, %v4019_v28, %v3349_v30 }
 0x4a3   : > { %v3477_v0 = vpop.permute.xlu0 %3476 }
 0x4a4   : > { %3880 = vrot.lane.b32.xlu1 %v7601_v60, %s5390_s23  ;;  %v4083_v34 = vsel %vm2042_vm7, %v4051_v45, %v3477_v0 }
 0x4a5   : > { %3498 = vrot.lane.b32.xlu0 %v7605_v53, %s5387_s30  ;;  %v4018_v53 = vsel %vm1968_vm5, %v3986_v37, %v7948_v9 }
 0x4a6   : > { %v3731_v8 = vpop.permute.xlu1 %3730 }
 0x4a7   : > { %v3605_v17 = vpop.permute.xlu0 %3604 }
 0x4a8   : > { %3626 = vrot.lane.b32.xlu1 %v7745_v12, %s5388_s6  ;;  %v4050_v12 = vsel %vm2005_vm6, %v4018_v53, %v3347_v57  ;;  %v4115_v48 = vsel %vm2079_vm8, %v4083_v34, %v3605_v17  ;;  %v3956_v17 = vsel %vm253_vm0, %v7661_v11, %v7641_v54 }
 0x4a9   : > { %3500 = vrot.lane.b32.xlu0 %v7601_v60, %s5387_s30  ;;  %v4082_v60 = vsel %vm2042_vm7, %v4050_v12, %v3475_v59  ;;  %v3988_v30 = vsel %vm1931_vm4, %v3956_v17, %v7828_v22 }
 0x4aa   : > { %v3733_v10 = vpop.permute.xlu1 %3732  ;;  %v4114_v37 = vsel %vm2079_vm8, %v4082_v60, %v3603_v40  ;;  %v4020_v7 = vsel %vm1968_vm5, %v3988_v30, %v7956_v21  ;;  %v2880_v60 = vld [vmem:[#allocation3 + $0xd9] sm:$0xff] }
 0x4ab   : > { %v3351_v35 = vpop.permute.xlu0 %3350  ;;  %v4146_v1 = vsel %vm2116_vm9, %v4114_v37, %v3731_v8  ;;  %v4147_v59 = vsel %vm2116_vm9, %v4115_v48, %v3733_v10  ;;  %v2881_v37 = vld [vmem:[#allocation3 + $0xe1] sm:$0xff] }
 0x4ac   : > { %3754 = vrot.lane.b32.xlu1 %v2878_v42, %s5389_s9  ;;  %v4052_v28 = vsel %vm2005_vm6, %v4020_v7, %v3351_v35 }
 0x4ad   : > { %3628 = vrot.lane.b32.xlu0 %v7741_v49, %s5388_s6 }
 0x4ae   : > { %v3353_v9 = vpop.permute.xlu1 %3352 }
 0x4af   : > { %v3859_v57 = vpop.permute.xlu0 %3858 }
 0x4b0   : > { %3756 = vrot.lane.b32.xlu1 %v2879_v18, %s5389_s9  ;;  %v4178_v12 = vsel %vm2153_vm10, %v4146_v1, %v3859_v57 }
 0x4b1   : > { %3374 = vrot.lane.b32.xlu0 %v2878_v42, %s5386_s29  ;;  %5222 = vmatprep.mubr.msk.f32.mxu1 %vm2202_vm11, %v4178_v12 }
 0x4b2   : > { %v3861_v4 = vpop.permute.xlu1 %3860 }
 0x4b3   : > { %v4179_v13 = vsel %vm2153_vm10, %v4147_v59, %v3861_v4  ;;  %v3479_v8 = vpop.permute.xlu0 %3478  ;;  %v3958_v59 = vsel %vm253_vm0, %v7673_v16, %v7648_v25 }
 0x4b4   : > { %3376 = vrot.lane.b32.xlu1 %v2879_v18, %s5386_s29  ;;  %5223 = vmatmul.mubr.msk.f32.vlgmr.msra.gmra.mrb[0].mxu1 %vm2202_vm11, %v4179_v13  ;;  %v4084_v54 = vsel %vm2042_vm7, %v4052_v28, %v3479_v8  ;;  %v3990_v4 = vsel %vm1931_vm4, %v3958_v59, %v7836_v55  ;;  %v2885_v59 = vld [vmem:[#allocation3 + $0x111] sm:$0xff] }
 0x4b5   : > { %3882 = vrot.lane.b32.xlu0 %v7613_v3, %s5390_s23  ;;  %v4022_v8 = vsel %vm1968_vm5, %v3990_v4, %v7964_v52 }
 0x4b6   : > { %v3607_v0 = vpop.permute.xlu1 %3606 }
 0x4b7   : > { %v3481_v40 = vpop.permute.xlu0 %3480  ;;  %v4116_v22 = vsel %vm2079_vm8, %v4084_v54, %v3607_v0  ;;  %v2882_v0 = vld [vmem:[#allocation3 + $0xf1] sm:$0xff] }
 0x4b8   : > { %3884 = vrot.lane.b32.xlu1 %v7609_v14, %s5390_s23  ;;  %v9289_v54 = vld [vmem:[#allocation5_spill] sm:$0xff] }
 0x4b9   : > { %3502 = vrot.lane.b32.xlu0 %v7613_v3, %s5387_s30 }
 0x4ba   : > { %v3735_v10 = vpop.permute.xlu1 %3734 }
 0x4bb   : > { %v3609_v42 = vpop.permute.xlu0 %3608 }
 0x4bc   : > { %3630 = vrot.lane.b32.xlu1 %v7757_v26, %s5388_s6  ;;  %v3957_v26 = vsel %vm253_vm0, %v7659_v19, %v7639_v38  ;;  %v4148_v19 = vsel %vm2116_vm9, %v4116_v22, %v3735_v10 }
 0x4bd   : > { %3504 = vrot.lane.b32.xlu0 %v7609_v14, %s5387_s30  ;;  %v3989_v14 = vsel %vm1931_vm4, %v3957_v26, %v7826_v20 }
 0x4be   : > { %v3737_v53 = vpop.permute.xlu1 %3736  ;;  %v4021_v11 = vsel %vm1968_vm5, %v3989_v14, %v7954_v31  ;;  %v9288_v14 = vld [vmem:[#allocation152_spill] sm:$0xff] }
 0x4bf   : > { %v3355_v3 = vpop.permute.xlu0 %3354  ;;  %v4053_v38 = vsel %vm2005_vm6, %v4021_v11, %v3353_v9  ;;  %v3960_v11 = vsel %vm253_vm0, %v7685_v61, %v9289_v54 }
 0x4c0   : > { %3758 = vrot.lane.b32.xlu1 %v2880_v60, %s5389_s9  ;;  %v4085_v45 = vsel %vm2042_vm7, %v4053_v38, %v3481_v40  ;;  %v4054_v40 = vsel %vm2005_vm6, %v4022_v8, %v3355_v3  ;;  %v3992_v22 = vsel %vm1931_vm4, %v3960_v11, %v7844_v5 }
 0x4c1   : > { %3632 = vrot.lane.b32.xlu0 %v7753_v15, %s5388_s6  ;;  %v4117_v15 = vsel %vm2079_vm8, %v4085_v45, %v3609_v42  ;;  %v2883_v42 = vld [vmem:[#allocation3 + $0xf9] sm:$0xff]  ;;  %v4024_v38 = vsel %vm1968_vm5, %v3992_v22, %v7972_v36  ;;  %v8173_v45 = vld [vmem:[#allocation3 + $0x110] sm:$0xff]  ;;  %v2918_v22 = vld [vmem:[#allocation3 + $0x122] sm:$0xff] }
 0x4c2   : > { %v3357_v21 = vpop.permute.xlu1 %3356  ;;  %v4149_v31 = vsel %vm2116_vm9, %v4117_v15, %v3737_v53 }
 0x4c3   : > { %v3863_v35 = vpop.permute.xlu0 %3862 }
 0x4c4   : > { %v4180_v20 = vsel %vm2153_vm10, %v4148_v19, %v3863_v35  ;;  %3760 = vrot.lane.b32.xlu1 %v2881_v37, %s5389_s9  ;;  %v2884_v19 = vld [vmem:[#allocation3 + $0x109] sm:$0xff]  ;;  %v9290_v35 = vld [vmem:[#allocation69_spill] sm:$0xff] }
 0x4c5   : > { %3378 = vrot.lane.b32.xlu0 %v2880_v60, %s5386_s29  ;;  %5225 = vmatprep.mubr.msk.f32.mxu1 %vm2202_vm11, %v4180_v20 }
 0x4c6   : > { %v3865_v1 = vpop.permute.xlu1 %3864 }
 0x4c7   : > { %v4181_v9 = vsel %vm2153_vm10, %v4149_v31, %v3865_v1  ;;  %v3483_v57 = vpop.permute.xlu0 %3482 }
 0x4c8   : > { %3380 = vrot.lane.b32.xlu1 %v2881_v37, %s5386_s29  ;;  %5226 = vmatmul.mubr.msk.f32.gmra.mrb[2].mxu1 %vm2202_vm11, %v4181_v9  ;;  %v4086_v25 = vsel %vm2042_vm7, %v4054_v40, %v3483_v57  ;;  %v3961_v37 = vsel %vm253_vm0, %v7681_v41, %v9290_v35 }
 0x4c9   : > { %3886 = vrot.lane.b32.xlu0 %v7621_v46, %s5390_s23 }
 0x4ca   : > { %v3611_v18 = vpop.permute.xlu1 %3610 }
 0x4cb   : > { %v3485_v34 = vpop.permute.xlu0 %3484  ;;  %v4118_v55 = vsel %vm2079_vm8, %v4086_v25, %v3611_v18 }
 0x4cc   : > { %3888 = vrot.lane.b32.xlu1 %v7617_v29, %s5390_s23 }
 0x4cd   : > { %3506 = vrot.lane.b32.xlu0 %v7621_v46, %s5387_s30 }
 0x4ce   : > { %v3739_v12 = vpop.permute.xlu1 %3738 }
 0x4cf   : > { %v3613_v48 = vpop.permute.xlu0 %3612 }
 0x4d0   : > { %3634 = vrot.lane.b32.xlu1 %v7769_v58, %s5388_s6  ;;  %v3959_v58 = vsel %vm253_vm0, %v7671_v23, %v7645_v39  ;;  %v4150_v23 = vsel %vm2116_vm9, %v4118_v55, %v3739_v12 }
 0x4d1   : > { %3508 = vrot.lane.b32.xlu0 %v7617_v29, %s5387_s30  ;;  %v3991_v29 = vsel %vm1931_vm4, %v3959_v58, %v7834_v27  ;;  %v9291_v58 = vld [vmem:[#allocation9_spill] sm:$0xff] }
 0x4d2   : > { %v3741_v13 = vpop.permute.xlu1 %3740  ;;  %v4023_v16 = vsel %vm1968_vm5, %v3991_v29, %v7962_v63  ;;  %v3962_v40 = vsel %vm253_vm0, %v7697_v24, %v9291_v58  ;;  %v9293_v24 = vld [vmem:[#allocation93_spill] sm:$0xff] }
 0x4d3   : > { %v3359_v46 = vpop.permute.xlu0 %3358  ;;  %v4055_v39 = vsel %vm2005_vm6, %v4023_v16, %v3357_v21  ;;  %v3994_v29 = vsel %vm1931_vm4, %v3962_v40, %v7852_v50  ;;  %v8208_v16 = vld [vmem:[#allocation3 + $0x120] sm:$0xff] }
 0x4d4   : > { %3762 = vrot.lane.b32.xlu1 %v2882_v0, %s5389_s9  ;;  %v4087_v17 = vsel %vm2042_vm7, %v4055_v39, %v3485_v34  ;;  %v4056_v61 = vsel %vm2005_vm6, %v4024_v38, %v3359_v46  ;;  %v4026_v55 = vsel %vm1968_vm5, %v3994_v29, %v7980_v33  ;;  %v9292_v39 = vld [vmem:[#allocation10_spill] sm:$0xff] }
 0x4d5   : > { %3636 = vrot.lane.b32.xlu0 %v7765_v43, %s5388_s6  ;;  %v4119_v43 = vsel %vm2079_vm8, %v4087_v17, %v3613_v48  ;;  %v2916_v48 = vld [vmem:[#allocation3 + $0x10a] sm:$0xff]  ;;  %v2888_v29 = vld [vmem:[#allocation3 + $0x139] sm:$0xff] }
 0x4d6   : > { %v3361_v52 = vpop.permute.xlu1 %3360  ;;  %v4151_v63 = vsel %vm2116_vm9, %v4119_v43, %v3741_v13 }
 0x4d7   : > { %v3867_v10 = vpop.permute.xlu0 %3866 }
 0x4d8   : > { %v4182_v27 = vsel %vm2153_vm10, %v4150_v23, %v3867_v10  ;;  %3764 = vrot.lane.b32.xlu1 %v2883_v42, %s5389_s9  ;;  %v3963_v23 = vsel %vm253_vm0, %v7693_v44, %v9292_v39 }
 0x4d9   : > { %3382 = vrot.lane.b32.xlu0 %v2882_v0, %s5386_s29  ;;  %5228 = vmatprep.mubr.msk.f32.mxu1 %vm2202_vm11, %v4182_v27  ;;  %v2822_v0 = vld [vmem:[#allocation3 + $0x112] sm:$0xff] }
 0x4da   : > { %v3869_v30 = vpop.permute.xlu1 %3868 }
 0x4db   : > { %v4183_v53 = vsel %vm2153_vm10, %v4151_v63, %v3869_v30  ;;  %v3487_v7 = vpop.permute.xlu0 %3486  ;;  %v2886_v30 = vld [vmem:[#allocation3 + $0x121] sm:$0xff] }
 0x4dc   : > { %3384 = vrot.lane.b32.xlu1 %v2883_v42, %s5386_s29  ;;  %5229 = vmatmul.mubr.msk.f32.gmra.mrb[4].mxu1 %vm2202_vm11, %v4183_v53  ;;  %v4088_v5 = vsel %vm2042_vm7, %v4056_v61, %v3487_v7  ;;  %v3995_v42 = vsel %vm1931_vm4, %v3963_v23, %v9293_v24  ;;  %v8228_v53 = vld [vmem:[#allocation3 + $0x128] sm:$0xff] }
 0x4dd   : > { %3890 = vrot.lane.b32.xlu0 %v7631_v47, %s5390_s23  ;;  %v4027_v33 = vsel %vm1968_vm5, %v3995_v42, %v7978_v32  ;;  %v2889_v24 = vld [vmem:[#allocation3 + $0x141] sm:$0xff] }
 0x4de   : > { %v3615_v3 = vpop.permute.xlu1 %3614  ;;  %v9300_v42 = vld [vmem:[#allocation14_spill] sm:$0xff] }
 0x4df   : > { %v3489_v60 = vpop.permute.xlu0 %3488  ;;  %v4120_v20 = vsel %vm2079_vm8, %v4088_v5, %v3615_v3 }
 0x4e0   : > { %3892 = vrot.lane.b32.xlu1 %v7625_v51, %s5390_s23 }
 0x4e1   : > { %3510 = vrot.lane.b32.xlu0 %v7631_v47, %s5387_s30 }
 0x4e2   : > { %v3743_v26 = vpop.permute.xlu1 %3742 }
 0x4e3   : > { %v3617_v28 = vpop.permute.xlu0 %3616  ;;  %v4152_v31 = vsel %vm2116_vm9, %v4120_v20, %v3743_v26  ;;  %v2824_v20 = vld [vmem:[#allocation3 + $0x12a] sm:$0xff] }
 0x4e4   : > { %3638 = vrot.lane.b32.xlu1 %v9288_v14, %s5388_s6 }
 0x4e5   : > { %3512 = vrot.lane.b32.xlu0 %v7625_v51, %s5387_s30  ;;  %v3993_v51 = vsel %vm1931_vm4, %v3961_v37, %v7842_v62  ;;  %v9295_v37 = vld [vmem:[#allocation117_spill] sm:$0xff] }
 0x4e6   : > { %v3745_v21 = vpop.permute.xlu1 %3744  ;;  %v4025_v36 = vsel %vm1968_vm5, %v3993_v51, %v7970_v56 }
 0x4e7   : > { %v3363_v47 = vpop.permute.xlu0 %3362  ;;  %v4057_v15 = vsel %vm2005_vm6, %v4025_v36, %v3361_v52 }
 0x4e8   : > { %3766 = vrot.lane.b32.xlu1 %v2884_v19, %s5389_s9  ;;  %v4089_v9 = vsel %vm2042_vm7, %v4057_v15, %v3489_v60  ;;  %v4058_v10 = vsel %vm2005_vm6, %v4026_v55, %v3363_v47  ;;  %v9297_v15 = vld [vmem:[#allocation77_spill] sm:$0xff] }
 0x4e9   : > { %3640 = vrot.lane.b32.xlu0 %v8173_v45, %s5388_s6  ;;  %v4121_v57 = vsel %vm2079_vm8, %v4089_v9, %v3617_v28 }
 0x4ea   : > { %v3365_v41 = vpop.permute.xlu1 %3364  ;;  %v4153_v56 = vsel %vm2116_vm9, %v4121_v57, %v3745_v21  ;;  %v2887_v21 = vld [vmem:[#allocation3 + $0x129] sm:$0xff] }
 0x4eb   : > { %v3871_v1 = vpop.permute.xlu0 %3870  ;;  %v4059_v44 = vsel %vm2005_vm6, %v4027_v33, %v3365_v41  ;;  %v9296_v41 = vld [vmem:[#allocation68_spill] sm:$0xff] }
 0x4ec   : > { %v4184_v62 = vsel %vm2153_vm10, %v4152_v31, %v3871_v1  ;;  %3386 = vrot.lane.b32.xlu1 %v2884_v19, %s5386_s29  ;;  %v9294_v19 = vld [vmem:[#allocation73_spill] sm:$0xff]  ;;  %v3965_v31 = vsel %vm253_vm0, %v9297_v15, %v9296_v41  ;;  %v9299_v57 = vld [vmem:[#allocation96_spill] sm:$0xff] }
 0x4ed   : > { %3260 = vrot.lane.b32.xlu0 %v8173_v45, %s5385_s28  ;;  %5231 = vmatprep.mubr.msk.f32.mxu1 %vm2202_vm11, %v4184_v62  ;;  %v3964_v35 = vsel %vm253_vm0, %v7709_v2, %v9294_v19  ;;  %v9298_v2 = vld [vmem:[#allocation116_spill] sm:$0xff] }
 0x4ee   : > { %v3873_v18 = vpop.permute.xlu1 %3872  ;;  %v3996_v61 = vsel %vm1931_vm4, %v3964_v35, %v9295_v37  ;;  %v3997_v9 = vsel %vm1931_vm4, %v3965_v31, %v9298_v2  ;;  %v2826_v35 = vld [vmem:[#allocation3 + $0x142] sm:$0xff]  ;;  %v2763_v15 = vld [vmem:[#allocation3 + $0x150] sm:$0xff] }
 0x4ef   : > { %v4185_v34 = vsel %vm2153_vm10, %v4153_v56, %v3873_v18  ;;  %v3491_v12 = vpop.permute.xlu0 %3490  ;;  %v4028_v5 = vsel %vm1968_vm5, %v3996_v61, %v7988_v6  ;;  %v4029_v6 = vsel %vm1968_vm5, %v3997_v9, %v9299_v57  ;;  %v2890_v2 = vld [vmem:[#allocation3 + $0x151] sm:$0xff] }
 0x4f0   : > { %3894 = vrot.lane.b32.xlu1 %v2916_v48, %s5390_s23  ;;  %5232 = vmatmul.mubr.msk.f32.gmra.mrb[6].mxu1 %vm2202_vm11, %v4185_v34  ;;  %v4090_v50 = vsel %vm2042_vm7, %v4058_v10, %v3491_v12  ;;  %v8266_v34 = vld [vmem:[#allocation3 + $0x138] sm:$0xff] }
 0x4f1   : > { %3768 = vrot.lane.b32.xlu0 %v2885_v59, %s5389_s9  ;;  %v2920_v10 = vld [vmem:[#allocation3 + $0x13a] sm:$0xff] }
 0x4f2   : > { %v3619_v4 = vpop.permute.xlu1 %3618  ;;  %v2859_v9 = vld [vmem:[#allocation3 + $0x158] sm:$0xff] }
 0x4f3   : > { %v3493_v13 = vpop.permute.xlu0 %3492  ;;  %v4122_v17 = vsel %vm2079_vm8, %v4090_v50, %v3619_v4  ;;  %v9301_v50 = vld [vmem:[#allocation22_spill] sm:$0xff] }
 0x4f4   : > { %3514 = vrot.lane.b32.xlu1 %v2916_v48, %s5387_s30  ;;  %v4091_v7 = vsel %vm2042_vm7, %v4059_v44, %v3493_v13  ;;  %v3966_v33 = vsel %vm253_vm0, %v9301_v50, %v9300_v42 }
 0x4f5   : > { %3388 = vrot.lane.b32.xlu0 %v2885_v59, %s5386_s29 }
 0x4f6   : > { %v3747_v8 = vpop.permute.xlu1 %3746 }
 0x4f7   : > { %v3621_v46 = vpop.permute.xlu0 %3620  ;;  %v4154_v43 = vsel %vm2116_vm9, %v4122_v17, %v3747_v8  ;;  %v9302_v17 = vld [vmem:[#allocation11_spill] sm:$0xff] }
 0x4f8   : > { %3516 = vrot.lane.b32.xlu1 %v2822_v0, %s5387_s30  ;;  %v4123_v60 = vsel %vm2079_vm8, %v4091_v7, %v3621_v46  ;;  %v9304_v7 = vld [vmem:[#allocation13_spill] sm:$0xff] }
 0x4f9   : > { %3896 = vrot.lane.b32.xlu0 %v2822_v0, %s5390_s23 }
 0x4fa   : > { %v3749_v25 = vpop.permute.xlu1 %3748 }
 0x4fb   : > { %v3367_v52 = vpop.permute.xlu0 %3366  ;;  %v4155_v32 = vsel %vm2116_vm9, %v4123_v60, %v3749_v25  ;;  %v2857_v25 = vld [vmem:[#allocation3 + $0x140] sm:$0xff] }
 0x4fc   : > { %3262 = vrot.lane.b32.xlu1 %v8208_v16, %s5385_s28  ;;  %v4060_v1 = vsel %vm2005_vm6, %v4028_v5, %v3367_v52 }
 0x4fd   : > { %3642 = vrot.lane.b32.xlu0 %v8208_v16, %s5388_s6 }
 0x4fe   : > { %v3369_v27 = vpop.permute.xlu1 %3368 }
 0x4ff   : > { %v3875_v63 = vpop.permute.xlu0 %3874  ;;  %v4061_v12 = vsel %vm2005_vm6, %v4029_v6, %v3369_v27  ;;  %v3998_v27 = vsel %vm1931_vm4, %v3966_v33, %v9302_v17  ;;  %v9308_v6 = vld [vmem:[#allocation18_spill] sm:$0xff] }
 0x500   : > { %v4186_v3 = vsel %vm2153_vm10, %v4154_v43, %v3875_v63  ;;  %3770 = vrot.lane.b32.xlu1 %v2886_v30, %s5389_s9  ;;  %v9303_v43 = vld [vmem:[#allocation120_spill] sm:$0xff] }
 0x501   : > { %3644 = vrot.lane.b32.xlu0 %v8228_v53, %s5388_s6  ;;  %5234 = vmatprep.mubr.msk.f32.mxu1 %vm2202_vm11, %v4186_v3  ;;  %v4030_v63 = vsel %vm1968_vm5, %v3998_v27, %v9303_v43  ;;  %v9305_v3 = vld [vmem:[#allocation81_spill] sm:$0xff] }
 0x502   : > { %v3877_v26 = vpop.permute.xlu1 %3876  ;;  %v3967_v60 = vsel %vm253_vm0, %v9305_v3, %v9304_v7 }
 0x503   : > { %v4187_v28 = vsel %vm2153_vm10, %v4155_v32, %v3877_v26  ;;  %v3495_v14 = vpop.permute.xlu0 %3494  ;;  %v9306_v26 = vld [vmem:[#allocation8_spill] sm:$0xff] }
 0x504   : > { %3390 = vrot.lane.b32.xlu1 %v2886_v30, %s5386_s29  ;;  %5235 = vmatmul.mubr.msk.f32.gmra.mrb[8].mxu1 %vm2202_vm11, %v4187_v28  ;;  %v4092_v62 = vsel %vm2042_vm7, %v4060_v1, %v3495_v14  ;;  %v3999_v28 = vsel %vm1931_vm4, %v3967_v60, %v9306_v26  ;;  %v2828_v60 = vld [vmem:[#allocation3 + $0x15a] sm:$0xff] }
 0x505   : > { %3264 = vrot.lane.b32.xlu0 %v8228_v53, %s5385_s28 }
 0x506   : > { %v3623_v54 = vpop.permute.xlu1 %3622 }
 0x507   : > { %v3497_v11 = vpop.permute.xlu0 %3496  ;;  %v4124_v56 = vsel %vm2079_vm8, %v4092_v62, %v3623_v54  ;;  %v9307_v54 = vld [vmem:[#allocation97_spill] sm:$0xff] }
 0x508   : > { %3898 = vrot.lane.b32.xlu1 %v2918_v22, %s5390_s23  ;;  %v4093_v4 = vsel %vm2042_vm7, %v4061_v12, %v3497_v11  ;;  %v4031_v11 = vsel %vm1968_vm5, %v3999_v28, %v9307_v54  ;;  %v9310_v12 = vld [vmem:[#allocation71_spill] sm:$0xff] }
 0x509   : > { %3772 = vrot.lane.b32.xlu0 %v2887_v21, %s5389_s9  ;;  %v2765_v28 = vld [vmem:[#allocation3 + $0x168] sm:$0xff] }
 0x50a   : > { %v3751_v38 = vpop.permute.xlu1 %3750 }
 0x50b   : > { %v3625_v47 = vpop.permute.xlu0 %3624  ;;  %v4156_v48 = vsel %vm2116_vm9, %v4124_v56, %v3751_v38  ;;  %v9309_v56 = vld [vmem:[#allocation84_spill] sm:$0xff] }
 0x50c   : > { %3518 = vrot.lane.b32.xlu1 %v2918_v22, %s5387_s30  ;;  %v4125_v8 = vsel %vm2079_vm8, %v4093_v4, %v3625_v47  ;;  %v9311_v4 = vld [vmem:[#allocation16_spill] sm:$0xff] }
 0x50d   : > { %3392 = vrot.lane.b32.xlu0 %v2887_v21, %s5386_s29 }
 0x50e   : > { %v3753_v51 = vpop.permute.xlu1 %3752 }
 0x50f   : > { %v3371_v36 = vpop.permute.xlu0 %3370  ;;  %v4157_v46 = vsel %vm2116_vm9, %v4125_v8, %v3753_v51 }
 0x510   : > { %3520 = vrot.lane.b32.xlu1 %v2824_v20, %s5387_s30  ;;  %v4062_v32 = vsel %vm2005_vm6, %v4030_v63, %v3371_v36 }
 0x511   : > { %3900 = vrot.lane.b32.xlu0 %v2824_v20, %s5390_s23 }
 0x512   : > { %v3373_v18 = vpop.permute.xlu1 %3372 }
 0x513   : > { %v3879_v59 = vpop.permute.xlu0 %3878  ;;  %v4063_v38 = vsel %vm2005_vm6, %v4031_v11, %v3373_v18  ;;  %v3968_v18 = vsel %vm253_vm0, %v9309_v56, %v9308_v6  ;;  %v2892_v11 = vld [vmem:[#allocation3 + $0x169] sm:$0xff] }
 0x514   : > { %v4188_v13 = vsel %vm2153_vm10, %v4156_v48, %v3879_v59  ;;  %3266 = vrot.lane.b32.xlu1 %v8266_v34, %s5385_s28  ;;  %v4000_v48 = vsel %vm1931_vm4, %v3968_v18, %v9310_v12  ;;  %v2924_v18 = vld [vmem:[#allocation3 + $0x16a] sm:$0xff] }
 0x515   : > { %3646 = vrot.lane.b32.xlu0 %v8266_v34, %s5388_s6  ;;  %5237 = vmatprep.mubr.msk.f32.mxu1 %vm2202_vm11, %v4188_v13  ;;  %v4032_v13 = vsel %vm1968_vm5, %v4000_v48, %v9311_v4 }
 0x516   : > { %v3881_v0 = vpop.permute.xlu1 %3880 }
 0x517   : > { %v4189_v58 = vsel %vm2153_vm10, %v4157_v46, %v3881_v0  ;;  %v3499_v40 = vpop.permute.xlu0 %3498  ;;  %v2922_v46 = vld [vmem:[#allocation3 + $0x152] sm:$0xff] }
 0x518   : > { %3774 = vrot.lane.b32.xlu1 %v2888_v29, %s5389_s9  ;;  %5238 = vmatmul.mubr.msk.f32.gmra.mrb[10].mxu1 %vm2202_vm11, %v4189_v58  ;;  %v4094_v14 = vsel %vm2042_vm7, %v4062_v32, %v3499_v40  ;;  %v9312_v0 = vld [vmem:[#allocation72_spill] sm:$0xff]  ;;  %v9313_v58 = vld [vmem:[#allocation85_spill] sm:$0xff] }
 0x519   : > { %3648 = vrot.lane.b32.xlu0 %v2857_v25, %s5388_s6  ;;  %v3969_v40 = vsel %vm253_vm0, %v9313_v58, %v9312_v0 }
 0x51a   : > { %v3627_v55 = vpop.permute.xlu1 %3626 }
 0x51b   : > { %v3501_v52 = vpop.permute.xlu0 %3500  ;;  %v4126_v22 = vsel %vm2079_vm8, %v4094_v14, %v3627_v55  ;;  %v9314_v55 = vld [vmem:[#allocation70_spill] sm:$0xff] }
 0x51c   : > { %3394 = vrot.lane.b32.xlu1 %v2888_v29, %s5386_s29  ;;  %v4095_v37 = vsel %vm2042_vm7, %v4063_v38, %v3501_v52  ;;  %v4001_v52 = vsel %vm1931_vm4, %v3969_v40, %v9314_v55  ;;  %v9317_v38 = vld [vmem:[#allocation88_spill] sm:$0xff] }
 0x51d   : > { %3268 = vrot.lane.b32.xlu0 %v2857_v25, %s5385_s28  ;;  %v2891_v25 = vld [vmem:[#allocation3 + $0x159] sm:$0xff] }
 0x51e   : > { %v3755_v39 = vpop.permute.xlu1 %3754 }
 0x51f   : > { %v3629_v23 = vpop.permute.xlu0 %3628  ;;  %v4158_v47 = vsel %vm2116_vm9, %v4126_v22, %v3755_v39  ;;  %v2861_v22 = vld [vmem:[#allocation3 + $0x170] sm:$0xff] }
 0x520   : > { %3902 = vrot.lane.b32.xlu1 %v2920_v10, %s5390_s23  ;;  %v4127_v51 = vsel %vm2079_vm8, %v4095_v37, %v3629_v23  ;;  %v9315_v23 = vld [vmem:[#allocation121_spill] sm:$0xff] }
 0x521   : > { %3776 = vrot.lane.b32.xlu0 %v2889_v24, %s5389_s9 }
 0x522   : > { %v3757_v44 = vpop.permute.xlu1 %3756 }
 0x523   : > { %v3375_v30 = vpop.permute.xlu0 %3374  ;;  %v4159_v5 = vsel %vm2116_vm9, %v4127_v51, %v3757_v44 }
 0x524   : > { %3522 = vrot.lane.b32.xlu1 %v2920_v10, %s5387_s30  ;;  %v4064_v29 = vsel %vm2005_vm6, %v4032_v13, %v3375_v30  ;;  %v4033_v10 = vsel %vm1968_vm5, %v4001_v52, %v9315_v23  ;;  %v2767_v52 = vld [vmem:[#allocation3 + $0x180] sm:$0xff]  ;;  %v9323_v23 = vld [vmem:[#allocation21_spill] sm:$0xff] }
 0x525   : > { %3396 = vrot.lane.b32.xlu0 %v2889_v24, %s5386_s29 }
 0x526   : > { %v3377_v21 = vpop.permute.xlu1 %3376 }
 0x527   : > { %v3883_v19 = vpop.permute.xlu0 %3882  ;;  %v4065_v50 = vsel %vm2005_vm6, %v4033_v10, %v3377_v21  ;;  %v9316_v21 = vld [vmem:[#allocation17_spill] sm:$0xff] }
 0x528   : > { %v4190_v61 = vsel %vm2153_vm10, %v4158_v47, %v3883_v19  ;;  %3524 = vrot.lane.b32.xlu1 %v2826_v35, %s5387_s30  ;;  %v3970_v47 = vsel %vm253_vm0, %v9317_v38, %v9316_v21  ;;  %v9318_v19 = vld [vmem:[#allocation155_spill] sm:$0xff] }
 0x529   : > { %3904 = vrot.lane.b32.xlu0 %v2826_v35, %s5390_s23  ;;  %5240 = vmatprep.mubr.msk.f32.mxu1 %vm2202_vm11, %v4190_v61  ;;  %v4002_v35 = vsel %vm1931_vm4, %v3970_v47, %v9318_v19  ;;  %v9319_v61 = vld [vmem:[#allocation78_spill] sm:$0xff]  ;;  %v9328_v38 = vld [vmem:[#allocation79_spill] sm:$0xff] }
 0x52a   : > { %v3885_v36 = vpop.permute.xlu1 %3884  ;;  %v4034_v51 = vsel %vm1968_vm5, %v4002_v35, %v9319_v61  ;;  %v2926_v35 = vld [vmem:[#allocation3 + $0x182] sm:$0xff] }
 0x52b   : > { %v4191_v20 = vsel %vm2153_vm10, %v4159_v5, %v3885_v36  ;;  %v3503_v41 = vpop.permute.xlu0 %3502  ;;  %v9320_v36 = vld [vmem:[#allocation76_spill] sm:$0xff] }
 0x52c   : > { %3270 = vrot.lane.b32.xlu1 %v2763_v15, %s5385_s28  ;;  %5241 = vmatmul.mubr.msk.f32.gmra.mrb[12].mxu1 %vm2202_vm11, %v4191_v20  ;;  %v4096_v39 = vsel %vm2042_vm7, %v4064_v29, %v3503_v41  ;;  %v3971_v20 = vsel %vm253_vm0, %v7741_v49, %v9320_v36  ;;  %v2830_v29 = vld [vmem:[#allocation3 + $0x172] sm:$0xff]  ;;  %v2895_v61 = vld [vmem:[#allocation3 + $0x189] sm:$0xff] }
 0x52d   : > { %3650 = vrot.lane.b32.xlu0 %v2763_v15, %s5388_s6  ;;  %v9321_v15 = vld [vmem:[#allocation154_spill] sm:$0xff] }
 0x52e   : > { %v3631_v31 = vpop.permute.xlu1 %3630 }
 0x52f   : > { %v3505_v1 = vpop.permute.xlu0 %3504  ;;  %v4128_v24 = vsel %vm2079_vm8, %v4096_v39, %v3631_v31  ;;  %v4003_v31 = vsel %vm1931_vm4, %v3971_v20, %v9321_v15  ;;  %v5353_v39 = vld [vmem:[#allocation3 + $0xd8] sm:$0xff] }
 0x530   : > { %3778 = vrot.lane.b32.xlu1 %v2890_v2, %s5389_s9  ;;  %v4097_v27 = vsel %vm2042_vm7, %v4065_v50, %v3505_v1  ;;  %v3972_v10 = vsel %vm253_vm0, %v5353_v39, %v9323_v23  ;;  %v9325_v50 = vld [vmem:[#allocation158_spill] sm:$0xff] }
 0x531   : > { %3652 = vrot.lane.b32.xlu0 %v2859_v9, %s5388_s6  ;;  %v2928_v39 = vld [vmem:[#allocation3 + $0x19a] sm:$0xff] }
 0x532   : > { %v3759_v62 = vpop.permute.xlu1 %3758 }
 0x533   : > { %v3633_v57 = vpop.permute.xlu0 %3632  ;;  %v4160_v33 = vsel %vm2116_vm9, %v4128_v24, %v3759_v62  ;;  %v9324_v24 = vld [vmem:[#allocation32_spill] sm:$0xff] }
 0x534   : > { %3398 = vrot.lane.b32.xlu1 %v2890_v2, %s5386_s29  ;;  %v4129_v43 = vsel %vm2079_vm8, %v4097_v27, %v3633_v57  ;;  %v9322_v2 = vld [vmem:[#allocation19_spill] sm:$0xff] }
 0x535   : > { %3272 = vrot.lane.b32.xlu0 %v2859_v9, %s5385_s28  ;;  %v4035_v9 = vsel %vm1968_vm5, %v4003_v31, %v9322_v2  ;;  %v2832_v2 = vld [vmem:[#allocation3 + $0x18a] sm:$0xff] }
 0x536   : > { %v3761_v59 = vpop.permute.xlu1 %3760 }
 0x537   : > { %v3379_v8 = vpop.permute.xlu0 %3378  ;;  %v4161_v63 = vsel %vm2116_vm9, %v4129_v43, %v3761_v59  ;;  %v2893_v59 = vld [vmem:[#allocation3 + $0x171] sm:$0xff]  ;;  %v2894_v43 = vld [vmem:[#allocation3 + $0x181] sm:$0xff] }
 0x538   : > { %3906 = vrot.lane.b32.xlu1 %v2922_v46, %s5390_s23  ;;  %v4066_v41 = vsel %vm2005_vm6, %v4034_v51, %v3379_v8 }
 0x539   : > { %3780 = vrot.lane.b32.xlu0 %v2891_v25, %s5389_s9 }
 0x53a   : > { %v3381_v42 = vpop.permute.xlu1 %3380 }
 0x53b   : > { %v3887_v17 = vpop.permute.xlu0 %3886  ;;  %v4067_v6 = vsel %vm2005_vm6, %v4035_v9, %v3381_v42  ;;  %v4004_v42 = vsel %vm1931_vm4, %v3972_v10, %v9324_v24  ;;  %v2865_v9 = vld [vmem:[#allocation3 + $0x1a0] sm:$0xff]  ;;  %v5356_v24 = vld [vmem:[#allocation3 + $0xf8] sm:$0xff] }
 0x53c   : > { %v4192_v44 = vsel %vm2153_vm10, %v4160_v33, %v3887_v17  ;;  %3526 = vrot.lane.b32.xlu1 %v2922_v46, %s5387_s30  ;;  %v4036_v33 = vsel %vm1968_vm5, %v4004_v42, %v9325_v50  ;;  %v9332_v42 = vld [vmem:[#allocation25_spill] sm:$0xff] }
 0x53d   : > { %3400 = vrot.lane.b32.xlu0 %v2891_v25, %s5386_s29  ;;  %5243 = vmatprep.mubr.msk.f32.mxu1 %vm2202_vm11, %v4192_v44  ;;  %v3975_v50 = vsel %vm253_vm0, %v5356_v24, %v9332_v42  ;;  %v4583_v42 = vld [vmem:[%s5625_s25 + $0x18] sm:$0xff] }
 0x53e   : > { %v3889_v30 = vpop.permute.xlu1 %3888 }
 0x53f   : > { %v4193_v7 = vsel %vm2153_vm10, %v4161_v63, %v3889_v30  ;;  %v3507_v3 = vpop.permute.xlu0 %3506  ;;  %v2863_v30 = vld [vmem:[#allocation3 + $0x188] sm:$0xff] }
 0x540   : > { %3528 = vrot.lane.b32.xlu1 %v2828_v60, %s5387_s30  ;;  %5244 = vmatmul.mubr.msk.f32.gmra.mrb[14].mxu1 %vm2202_vm11, %v4193_v7  ;;  %v4098_v1 = vsel %vm2042_vm7, %v4066_v41, %v3507_v3 }
 0x541   : > { %3908 = vrot.lane.b32.xlu0 %v2828_v60, %s5390_s23 }
 0x542   : > { %v3635_v32 = vpop.permute.xlu1 %3634 }
 0x543   : > { %v3509_v26 = vpop.permute.xlu0 %3508  ;;  %v4130_v62 = vsel %vm2079_vm8, %v4098_v1, %v3635_v32 }
 0x544   : > { %3274 = vrot.lane.b32.xlu1 %v2765_v28, %s5385_s28  ;;  %v4099_v12 = vsel %vm2042_vm7, %v4067_v6, %v3509_v26 }
 0x545   : > { %3654 = vrot.lane.b32.xlu0 %v2765_v28, %s5388_s6  ;;  %v5354_v28 = vld [vmem:[#allocation3 + $0xe0] sm:$0xff] }
 0x546   : > { %v3763_v14 = vpop.permute.xlu1 %3762 }
 0x547   : > { %v3637_v54 = vpop.permute.xlu0 %3636  ;;  %v4162_v49 = vsel %vm2116_vm9, %v4130_v62, %v3763_v14  ;;  %v9326_v14 = vld [vmem:[#allocation80_spill] sm:$0xff] }
 0x548   : > { %3782 = vrot.lane.b32.xlu1 %v2892_v11, %s5389_s9  ;;  %v4131_v4 = vsel %vm2079_vm8, %v4099_v12, %v3637_v54  ;;  %v3973_v54 = vsel %vm253_vm0, %v5354_v28, %v9326_v14  ;;  %v9330_v12 = vld [vmem:[#allocation95_spill] sm:$0xff] }
 0x549   : > { %3656 = vrot.lane.b32.xlu0 %v2861_v22, %s5388_s6 }
 0x54a   : > { %v3765_v37 = vpop.permute.xlu1 %3764 }
 0x54b   : > { %v3383_v5 = vpop.permute.xlu0 %3382  ;;  %v4163_v13 = vsel %vm2116_vm9, %v4131_v4, %v3765_v37  ;;  %v9331_v4 = vld [vmem:[#allocation159_spill] sm:$0xff] }
 0x54c   : > { %3402 = vrot.lane.b32.xlu1 %v2892_v11, %s5386_s29  ;;  %v4068_v27 = vsel %vm2005_vm6, %v4036_v33, %v3383_v5  ;;  %v9327_v11 = vld [vmem:[#allocation31_spill] sm:$0xff]  ;;  %v9333_v33 = vld [vmem:[#allocation94_spill] sm:$0xff] }
 0x54d   : > { %3276 = vrot.lane.b32.xlu0 %v2861_v22, %s5385_s28  ;;  %v4005_v22 = vsel %vm1931_vm4, %v3973_v54, %v9327_v11 }
 0x54e   : > { %v3385_v57 = vpop.permute.xlu1 %3384  ;;  %v4037_v47 = vsel %vm1968_vm5, %v4005_v22, %v9328_v38  ;;  %v4581_v38 = vld [vmem:[%s5625_s25 + $0x8] sm:$0xff] }
 0x54f   : > { %v3891_v56 = vpop.permute.xlu0 %3890  ;;  %v4069_v37 = vsel %vm2005_vm6, %v4037_v47, %v3385_v57  ;;  %v2864_v57 = vld [vmem:[#allocation3 + $0x198] sm:$0xff] }
 0x550   : > { %v4194_v48 = vsel %vm2153_vm10, %v4162_v49, %v3891_v56  ;;  %3910 = vrot.lane.b32.xlu1 %v2924_v18, %s5390_s23  ;;  %v5355_v49 = vld [vmem:[#allocation3 + $0xf0] sm:$0xff]  ;;  %v9329_v56 = vld [vmem:[#allocation26_spill] sm:$0xff] }
 0x551   : > { %3784 = vrot.lane.b32.xlu0 %v2893_v59, %s5389_s9  ;;  %5246 = vmatprep.mubr.msk.f32.mxu1 %vm2202_vm11, %v4194_v48 }
 0x552   : > { %v3893_v8 = vpop.permute.xlu1 %3892 }
 0x553   : > { %v4195_v46 = vsel %vm2153_vm10, %v4163_v13, %v3893_v8  ;;  %v3511_v0 = vpop.permute.xlu0 %3510 }
 0x554   : > { %3530 = vrot.lane.b32.xlu1 %v2924_v18, %s5387_s30  ;;  %5247 = vmatmul.mubr.msk.f32.gmra.mrb[16].mxu1 %vm2202_vm11, %v4195_v46  ;;  %v4100_v63 = vsel %vm2042_vm7, %v4068_v27, %v3511_v0  ;;  %v3974_v18 = vsel %vm253_vm0, %v5355_v49, %v9329_v56  ;;  %v2896_v46 = vld [vmem:[#allocation3 + $0x199] sm:$0xff] }
 0x555   : > { %3404 = vrot.lane.b32.xlu0 %v2893_v59, %s5386_s29  ;;  %v4006_v48 = vsel %vm1931_vm4, %v3974_v18, %v9330_v12  ;;  %v2897_v59 = vld [vmem:[#allocation3 + $0x1a1] sm:$0xff] }
 0x556   : > { %v3639_v58 = vpop.permute.xlu1 %3638  ;;  %v4038_v13 = vsel %vm1968_vm5, %v4006_v48, %v9331_v4 }
 0x557   : > { %v3513_v40 = vpop.permute.xlu0 %3512  ;;  %v4132_v7 = vsel %vm2079_vm8, %v4100_v63, %v3639_v58 }
 0x558   : > { %3532 = vrot.lane.b32.xlu1 %v2830_v29, %s5387_s30  ;;  %v4101_v51 = vsel %vm2042_vm7, %v4069_v37, %v3513_v40 }
 0x559   : > { %3912 = vrot.lane.b32.xlu0 %v2830_v29, %s5390_s23 }
 0x55a   : > { %v3767_v25 = vpop.permute.xlu1 %3766 }
 0x55b   : > { %v3641_v55 = vpop.permute.xlu0 %3640  ;;  %v4164_v3 = vsel %vm2116_vm9, %v4132_v7, %v3767_v25  ;;  %v2929_v25 = vld [vmem:[#allocation3 + $0x1a2] sm:$0xff] }
 0x55c   : > { %3278 = vrot.lane.b32.xlu1 %v2767_v52, %s5385_s28  ;;  %v4133_v5 = vsel %vm2079_vm8, %v4101_v51, %v3641_v55 }
 0x55d   : > { %3658 = vrot.lane.b32.xlu0 %v2767_v52, %s5388_s6 }
 0x55e   : > { %v3387_v17 = vpop.permute.xlu1 %3386 }
 0x55f   : > { %v8402_v44 = vpop.permute.xlu0 %3260  ;;  %v4070_v0 = vsel %vm2005_vm6, %v4038_v13, %v3387_v17  ;;  %v4007_v17 = vsel %vm1931_vm4, %v3975_v50, %v9333_v33  ;;  %v9337_v13 = vld [vmem:[#allocation118_spill] sm:$0xff] }
 0x560   : > { %3786 = vrot.lane.b32.xlu1 %v2894_v43, %s5389_s9 }
 0x561   : > { %3660 = vrot.lane.b32.xlu0 %v2863_v30, %s5388_s6 }
 0x562   : > { %v3895_v60 = vpop.permute.xlu1 %3894 }
 0x563   : > { %v4196_v32 = vsel %vm2153_vm10, %v4164_v3, %v3895_v60  ;;  %v3769_v26 = vpop.permute.xlu0 %3768 }
 0x564   : > { %3406 = vrot.lane.b32.xlu1 %v2894_v43, %s5386_s29  ;;  %5249 = vmatprep.mubr.msk.f32.mxu1 %vm2202_vm11, %v4196_v32  ;;  %v4165_v20 = vsel %vm2116_vm9, %v4133_v5, %v3769_v26  ;;  %v4039_v43 = vsel %vm1968_vm5, %v4007_v17, %v8402_v44  ;;  %v8468_v44 = vld [vmem:[%s8740_s4] ss:$0 sm:$0xff]  ;;  %v5357_v5 = vld [vmem:[#allocation3 + $0x108] sm:$0xff]  ;;  %v4582_v17 = vld [vmem:[%s5625_s25 + $0x10] sm:$0xff] }
 0x565   : > { %3280 = vrot.lane.b32.xlu0 %v2863_v30, %s5385_s28 }
 0x566   : > { %v3515_v21 = vpop.permute.xlu1 %3514 }
 0x567   : > { %v3389_v19 = vpop.permute.xlu0 %3388  ;;  %v4102_v40 = vsel %vm2042_vm7, %v4070_v0, %v3515_v21 }
 0x568   : > { %3914 = vrot.lane.b32.xlu1 %v2926_v35, %s5390_s23  ;;  %v4071_v30 = vsel %vm2005_vm6, %v4039_v43, %v3389_v19 }
 0x569   : > { %3788 = vrot.lane.b32.xlu0 %v2895_v61, %s5389_s9 }
 0x56a   : > { %v3517_v36 = vpop.permute.xlu1 %3516 }
 0x56b   : > { %v3897_v41 = vpop.permute.xlu0 %3896  ;;  %v4103_v7 = vsel %vm2042_vm7, %v4071_v30, %v3517_v36  ;;  %v9334_v36 = vld [vmem:[#allocation6_spill] sm:$0xff] }
 0x56c   : > { %v4197_v15 = vsel %vm2153_vm10, %v4165_v20, %v3897_v41  ;;  %3534 = vrot.lane.b32.xlu1 %v2926_v35, %s5387_s30  ;;  %v4580_v35 = vld [vmem:[%s5625_s25] sm:$0xff]  ;;  %v3976_v20 = vsel %vm253_vm0, %v5357_v5, %v9334_v36  ;;  %v9341_v5 = vld [vmem:[#allocation12_spill] sm:$0xff] }
 0x56d   : > { %3408 = vrot.lane.b32.xlu0 %v2895_v61, %s5386_s29  ;;  %5250 = vmatmul.mubr.msk.f32.gmra.mrb[18].mxu1 %vm2202_vm11, %v4197_v15  ;;  %v9335_v15 = vld [vmem:[#allocation119_spill] sm:$0xff] }
 0x56e   : > { %v8429_v31 = vpop.permute.xlu1 %3262 }
 0x56f   : > { %v3643_v1 = vpop.permute.xlu0 %3642 }
 0x570   : > { %3536 = vrot.lane.b32.xlu1 %v2832_v2, %s5387_s30  ;;  %v4134_v29 = vsel %vm2079_vm8, %v4102_v40, %v3643_v1  ;;  %v4008_v1 = vsel %vm1931_vm4, %v3976_v20, %v9335_v15 }
 0x571   : > { %3916 = vrot.lane.b32.xlu0 %v2832_v2, %s5390_s23 }
 0x572   : > { %v3771_v62 = vpop.permute.xlu1 %3770 }
 0x573   : > { %v3645_v6 = vpop.permute.xlu0 %3644  ;;  %v4166_v55 = vsel %vm2116_vm9, %v4134_v29, %v3771_v62 }
 0x574   : > { %3664 = vrot.lane.b32.xlu1 %v2865_v9, %s5388_s6  ;;  %v4135_v3 = vsel %vm2079_vm8, %v4103_v7, %v3645_v6  ;;  %v4040_v9 = vsel %vm1968_vm5, %v4008_v1, %v8429_v31  ;;  %v9336_v31 = vld [vmem:[#allocation89_spill] sm:$0xff] }
 0x575   : > { %3662 = vrot.lane.b32.xlu0 %v2864_v57, %s5388_s6  ;;  %v3977_v4 = vsel %vm253_vm0, %v8173_v45, %v9336_v31 }
 0x576   : > { %v3391_v8 = vpop.permute.xlu1 %3390 }
 0x577   : > { %v8442_v58 = vpop.permute.xlu0 %3264  ;;  %v4072_v57 = vsel %vm2005_vm6, %v4040_v9, %v3391_v8  ;;  %v4009_v8 = vsel %vm1931_vm4, %v3977_v4, %v9337_v13 }
 0x578   : > { %3792 = vrot.lane.b32.xlu1 %v2897_v59, %s5389_s9  ;;  %v4041_v0 = vsel %vm1968_vm5, %v4009_v8, %v8442_v58 }
 0x579   : > { %3790 = vrot.lane.b32.xlu0 %v2896_v46, %s5389_s9  ;;  %s8481_s9 = scalar_lea.vmem %s8741_s5, %s5068_s22 }
 0x57a   : > { %v3899_v52 = vpop.permute.xlu1 %3898 }
 0x57b   : > { %v4198_v23 = vsel %vm2153_vm10, %v4166_v55, %v3899_v52  ;;  %v3773_v10 = vpop.permute.xlu0 %3772 }
 0x57c   : > { %3920 = vrot.lane.b32.xlu1 %v2929_v25, %s5390_s23  ;;  %5252 = vmatprep.mubr.msk.f32.mxu1 %vm2202_vm11, %v4198_v23  ;;  %v4167_v32 = vsel %vm2116_vm9, %v4135_v3, %v3773_v10 }
 0x57d   : > { %3918 = vrot.lane.b32.xlu0 %v2928_v39, %s5390_s23 }
 0x57e   : > { %v3519_v27 = vpop.permute.xlu1 %3518 }
 0x57f   : > { %v3393_v63 = vpop.permute.xlu0 %3392  ;;  %v4104_v49 = vsel %vm2042_vm7, %v4072_v57, %v3519_v27 }
 0x580   : > { %v4073_v29 = vsel %vm2005_vm6, %v4041_v0, %v3393_v63 }
 0x582   : > { %v3521_v60 = vpop.permute.xlu1 %3520 }
 0x583   : > { %v3901_v26 = vpop.permute.xlu0 %3900  ;;  %v4105_v25 = vsel %vm2042_vm7, %v4073_v29, %v3521_v60 }
 0x584   : > { %v4199_v28 = vsel %vm2153_vm10, %v4167_v32, %v3901_v26  ;;  %v9338_v32 = vld [vmem:[#allocation7_spill] sm:$0xff] }
 0x585   : > { %5253 = vmatmul.mubr.msk.f32.gmra.mrb[20].mxu1 %vm2202_vm11, %v4199_v28  ;;  %v3978_v26 = vsel %vm253_vm0, %v8208_v16, %v9338_v32  ;;  %v9339_v28 = vld [vmem:[#allocation15_spill] sm:$0xff] }
 0x586   : > { %v8470_v14 = vpop.permute.xlu1 %3266 }
 0x587   : > { %v5224_v54 = vpop.f32.mrb[0].mxu1  ;;  %v3647_v11 = vpop.permute.xlu0 %3646 }
 0x588   : > { %v4393_v22 = vadd.f32 %v5224_v54, %v8468_v44  ;;  %v4387_v21 = vpop.f32.mrb[1].mxu1  ;;  %v4136_v56 = vsel %vm2079_vm8, %v4104_v49, %v3647_v11  ;;  %v4010_v54 = vsel %vm1931_vm4, %v3978_v26, %v9339_v28  ;;  %v4585_v49 = vld [vmem:[%s5625_s25 + $0x28] sm:$0xff]  ;;  %v9345_v26 = vld [vmem:[#allocation74_spill] sm:$0xff] }
 0x589   : > { %v4388_v47 = vadd.f32 %v8468_v44, %v4387_v21  ;;  %v4042_v11 = vsel %vm1968_vm5, %v4010_v54, %v8470_v14 }
 0x58a   : > { %v4547_v19 = vmax.f32 %v4393_v22, 0.0  ;;  %v3775_v37 = vpop.permute.xlu1 %3774 }
 0x58b   : > { %v4546_v61 = vmax.f32 %v4388_v47, 0.0  ;;  %v3649_v51 = vpop.permute.xlu0 %3648  ;;  %v4168_v18 = vsel %vm2116_vm9, %v4136_v56, %v3775_v37 }
 0x58c   : > { %v4613_v41 = vadd.f32 %v4581_v38, %v4547_v19  ;;  %v4137_v55 = vsel %vm2079_vm8, %v4105_v25, %v3649_v51  ;;  %v9340_v51 = vld [vmem:[#allocation4_spill] sm:$0xff]  ;;  %v9342_v25 = vld [vmem:[#allocation67_spill] sm:$0xff] }
 0x58d   : > { %v4612_v2 = vadd.f32 %v4580_v35, %v4546_v61  ;;  %v3979_v14 = vsel %vm253_vm0, %v8228_v53, %v9340_v51 }
 0x58e   : > { %4645 = vst.msk [vmem:[%s8481_s9 + $0x8] sm:$0xff] %vm253_vm0, %v4613_v41  ;;  %v3395_v62 = vpop.permute.xlu1 %3394  ;;  %v4011_v36 = vsel %vm1931_vm4, %v3979_v14, %v9341_v5 }
 0x58f   : > { %4644 = vst.msk [vmem:[%s8481_s9] sm:$0xff] %vm253_vm0, %v4612_v2  ;;  %v3269_v6 = vpop.permute.xlu0 %3268  ;;  %v4074_v21 = vsel %vm2005_vm6, %v4042_v11, %v3395_v62  ;;  %v4586_v11 = vld [vmem:[%s5625_s25 + $0x30] sm:$0xff] }
 0x590   : > { %v4043_v41 = vsel %vm1968_vm5, %v4011_v36, %v3269_v6 }
 0x592   : > { %v3903_v12 = vpop.permute.xlu1 %3902 }
 0x593   : > { %v4200_v48 = vsel %vm2153_vm10, %v4168_v18, %v3903_v12  ;;  %v3777_v59 = vpop.permute.xlu0 %3776  ;;  %v4584_v12 = vld [vmem:[%s5625_s25 + $0x20] sm:$0xff] }
 0x594   : > { %5255 = vmatprep.mubr.msk.f32.mxu1 %vm2202_vm11, %v4200_v48  ;;  %v4169_v39 = vsel %vm2116_vm9, %v4137_v55, %v3777_v59  ;;  %v3980_v55 = vsel %vm253_vm0, %v8266_v34, %v9342_v25 }
 0x596   : > { %v3523_v46 = vpop.permute.xlu1 %3522 }
 0x597   : > { %v3397_v40 = vpop.permute.xlu0 %3396  ;;  %v4106_v47 = vsel %vm2042_vm7, %v4074_v21, %v3523_v46 }
 0x598   : > { %v4075_v2 = vsel %vm2005_vm6, %v4043_v41, %v3397_v40 }
 0x59a   : > { %v3525_v52 = vpop.permute.xlu1 %3524 }
 0x59b   : > { %v5227_v45 = vpop.f32.mrb[2].mxu1  ;;  %v3905_v23 = vpop.permute.xlu0 %3904  ;;  %v4107_v57 = vsel %vm2042_vm7, %v4075_v2, %v3525_v52  ;;  %v9343_v52 = vld [vmem:[#allocation75_spill] sm:$0xff] }
 0x59c   : > { %v4403_v10 = vadd.f32 %v5227_v45, %v8468_v44  ;;  %v4201_v24 = vsel %vm2153_vm10, %v4169_v39, %v3905_v23  ;;  %v4397_v58 = vpop.f32.mrb[3].mxu1  ;;  %v4012_v39 = vsel %vm1931_vm4, %v3980_v55, %v9343_v52 }
 0x59d   : > { %v4398_v50 = vadd.f32 %v8468_v44, %v4397_v58  ;;  %5256 = vmatmul.mubr.msk.f32.gmra.mrb[22].mxu1 %vm2202_vm11, %v4201_v24 }
 0x59e   : > { %v4549_v33 = vmax.f32 %v4403_v10, 0.0  ;;  %v3271_v27 = vpop.permute.xlu1 %3270 }
 0x59f   : > { %v4548_v43 = vmax.f32 %v4398_v50, 0.0  ;;  %v3651_v63 = vpop.permute.xlu0 %3650  ;;  %v4044_v45 = vsel %vm1968_vm5, %v4012_v39, %v3271_v27  ;;  %v2669_v39 = vld [vmem:[#allocation3 + $0x158] sm:$0xff] }
 0x5a0   : > { %v4615_v30 = vadd.f32 %v4583_v42, %v4549_v33  ;;  %v4138_v19 = vsel %vm2079_vm8, %v4106_v47, %v3651_v63  ;;  %v2667_v63 = vld [vmem:[#allocation3 + $0x140] sm:$0xff] }
 0x5a1   : > { %v4614_v7 = vadd.f32 %v4582_v17, %v4548_v43 }
 0x5a2   : > { %4647 = vst.msk [vmem:[%s8481_s9 + $0x18] sm:$0xff] %vm253_vm0, %v4615_v30  ;;  %v3779_v3 = vpop.permute.xlu1 %3778 }
 0x5a3   : > { %4646 = vst.msk [vmem:[%s8481_s9 + $0x10] sm:$0xff] %vm253_vm0, %v4614_v7  ;;  %v3653_v60 = vpop.permute.xlu0 %3652  ;;  %v4170_v35 = vsel %vm2116_vm9, %v4138_v19, %v3779_v3  ;;  %v9344_v7 = vld [vmem:[#allocation66_spill] sm:$0xff] }
 0x5a4   : > { %v4139_v56 = vsel %vm2079_vm8, %v4107_v57, %v3653_v60  ;;  %v3981_v3 = vsel %vm253_vm0, %v2667_v63, %v9344_v7  ;;  %v4587_v60 = vld [vmem:[%s5625_s25 + $0x38] sm:$0xff] }
 0x5a5   : > { %v4013_v28 = vsel %vm1931_vm4, %v3981_v3, %v9345_v26  ;;  %v9347_v57 = vld [vmem:[#allocation157_spill] sm:$0xff] }
 0x5a6   : > { %v3399_v22 = vpop.permute.xlu1 %3398 }
 0x5a7   : > { %v3273_v38 = vpop.permute.xlu0 %3272  ;;  %v4076_v10 = vsel %vm2005_vm6, %v4044_v45, %v3399_v22 }
 0x5a8   : > { %v4045_v21 = vsel %vm1968_vm5, %v4013_v28, %v3273_v38  ;;  %v2671_v28 = vld [vmem:[#allocation3 + $0x170] sm:$0xff] }
 0x5aa   : > { %v3907_v37 = vpop.permute.xlu1 %3906 }
 0x5ab   : > { %v4202_v16 = vsel %vm2153_vm10, %v4170_v35, %v3907_v37  ;;  %v3781_v61 = vpop.permute.xlu0 %3780 }
 0x5ac   : > { %5258 = vmatprep.mubr.msk.f32.mxu1 %vm2202_vm11, %v4202_v16  ;;  %v4171_v6 = vsel %vm2116_vm9, %v4139_v56, %v3781_v61 }
 0x5ae   : > { %v3527_v20 = vpop.permute.xlu1 %3526 }
 0x5af   : > { %v3401_v15 = vpop.permute.xlu0 %3400  ;;  %v5230_v1 = vpop.f32.mrb[4].mxu1  ;;  %v4108_v58 = vsel %vm2042_vm7, %v4076_v10, %v3527_v20 }
 0x5b0   : > { %v4413_v9 = vadd.f32 %v5230_v1, %v8468_v44  ;;  %v4407_v62 = vpop.f32.mrb[5].mxu1  ;;  %v4077_v35 = vsel %vm2005_vm6, %v4045_v21, %v3401_v15  ;;  %v2668_v1 = vld [vmem:[#allocation3 + $0x150] sm:$0xff] }
 0x5b1   : > { %v4408_v53 = vadd.f32 %v8468_v44, %v4407_v62 }
 0x5b2   : > { %v4551_v18 = vmax.f32 %v4413_v9, 0.0  ;;  %v3529_v48 = vpop.permute.xlu1 %3528  ;;  %v9346_v9 = vld [vmem:[#allocation29_spill] sm:$0xff] }
 0x5b3   : > { %v4550_v59 = vmax.f32 %v4408_v53, 0.0  ;;  %v3909_v31 = vpop.permute.xlu0 %3908  ;;  %v4109_v16 = vsel %vm2042_vm7, %v4077_v35, %v3529_v48  ;;  %v3982_v62 = vsel %vm253_vm0, %v2668_v1, %v9346_v9 }
 0x5b4   : > { %v4617_v4 = vadd.f32 %v4585_v49, %v4551_v18  ;;  %v4203_v13 = vsel %vm2153_vm10, %v4171_v6, %v3909_v31  ;;  %v4014_v49 = vsel %vm1931_vm4, %v3982_v62, %v9347_v57 }
 0x5b5   : > { %v4616_v8 = vadd.f32 %v4584_v12, %v4550_v59  ;;  %5259 = vmatmul.mubr.msk.f32.gmra.mrb[24].mxu1 %vm2202_vm11, %v4203_v13  ;;  %v4589_v13 = vld [vmem:[%s5625_s25 + $0x48] sm:$0xff] }
 0x5b6   : > { %4649 = vst.msk [vmem:[%s8481_s9 + $0x28] sm:$0xff] %vm253_vm0, %v4617_v4  ;;  %v3275_v46 = vpop.permute.xlu1 %3274 }
 0x5b7   : > { %4648 = vst.msk [vmem:[%s8481_s9 + $0x20] sm:$0xff] %vm253_vm0, %v4616_v8  ;;  %v3655_v0 = vpop.permute.xlu0 %3654  ;;  %v4046_v53 = vsel %vm1968_vm5, %v4014_v49, %v3275_v46  ;;  %v4590_v49 = vld [vmem:[%s5625_s25 + $0x50] sm:$0xff] }
 0x5b8   : > { %v4140_v42 = vsel %vm2079_vm8, %v4108_v58, %v3655_v0 }
 0x5ba   : > { %v3783_v40 = vpop.permute.xlu1 %3782 }
 0x5bb   : > { %v3657_v29 = vpop.permute.xlu0 %3656  ;;  %v4172_v50 = vsel %vm2116_vm9, %v4140_v42, %v3783_v40  ;;  %v4588_v40 = vld [vmem:[%s5625_s25 + $0x40] sm:$0xff]  ;;  %v9349_v42 = vld [vmem:[#allocation156_spill] sm:$0xff] }
 0x5bc   : > { %v4141_v51 = vsel %vm2079_vm8, %v4109_v16, %v3657_v29 }
 0x5be   : > { %v3403_v23 = vpop.permute.xlu1 %3402 }
 0x5bf   : > { %v8560_v24 = vpop.permute.xlu0 %3276  ;;  %v4078_v18 = vsel %vm2005_vm6, %v4046_v53, %v3403_v23  ;;  %v9348_v23 = vld [vmem:[#allocation153_spill] sm:$0xff] }
 0x5c0   : > { %v3983_v10 = vsel %vm253_vm0, %v2669_v39, %v9348_v23 }
 0x5c2   : > { %v3911_v33 = vpop.permute.xlu1 %3910 }
 0x5c3   : > { %v4204_v34 = vsel %vm2153_vm10, %v4172_v50, %v3911_v33  ;;  %v3785_v17 = vpop.permute.xlu0 %3784  ;;  %v5233_v43 = vpop.f32.mrb[6].mxu1  ;;  %v4015_v50 = vsel %vm1931_vm4, %v3983_v10, %v9349_v42  ;;  %v4595_v42 = vld [vmem:[%s5625_s25 + $0x78] sm:$0xff] }
 0x5c4   : > { %v4423_v27 = vadd.f32 %v5233_v43, %v8468_v44  ;;  %v4417_v30 = vpop.f32.mrb[7].mxu1  ;;  %5261 = vmatprep.mubr.msk.f32.mxu1 %vm2202_vm11, %v4204_v34  ;;  %v4173_v5 = vsel %vm2116_vm9, %v4141_v51, %v3785_v17  ;;  %v4047_v34 = vsel %vm1968_vm5, %v4015_v50, %v8560_v24  ;;  %v2670_v24 = vld [vmem:[#allocation3 + $0x168] sm:$0xff] }
 0x5c5   : > { %v4418_v32 = vadd.f32 %v8468_v44, %v4417_v30 }
 0x5c6   : > { %v4553_v54 = vmax.f32 %v4423_v27, 0.0  ;;  %v3531_v22 = vpop.permute.xlu1 %3530 }
 0x5c7   : > { %v4552_v47 = vmax.f32 %v4418_v32, 0.0  ;;  %v3405_v19 = vpop.permute.xlu0 %3404  ;;  %v4110_v6 = vsel %vm2042_vm7, %v4078_v18, %v3531_v22  ;;  %v9351_v22 = vld [vmem:[#allocation30_spill] sm:$0xff] }
 0x5c8   : > { %v4619_v37 = vadd.f32 %v4587_v60, %v4553_v54  ;;  %v4079_v43 = vsel %vm2005_vm6, %v4047_v34, %v3405_v19  ;;  %v9350_v54 = vld [vmem:[#allocation92_spill] sm:$0xff]  ;;  %v3985_v21 = vsel %vm253_vm0, %v2671_v28, %v9351_v22 }
 0x5c9   : > { %v4618_v61 = vadd.f32 %v4586_v11, %v4552_v47  ;;  %v3984_v11 = vsel %vm253_vm0, %v2670_v24, %v9350_v54  ;;  %v9352_v47 = vld [vmem:[#allocation34_spill] sm:$0xff]  ;;  %v4594_v34 = vld [vmem:[%s5625_s25 + $0x70] sm:$0xff] }
 0x5ca   : > { %4651 = vst.msk [vmem:[%s8481_s9 + $0x38] sm:$0xff] %vm253_vm0, %v4619_v37  ;;  %v3533_v14 = vpop.permute.xlu1 %3532  ;;  %v4016_v19 = vsel %vm1931_vm4, %v3984_v11, %v9352_v47  ;;  %v9353_v37 = vld [vmem:[#allocation33_spill] sm:$0xff] }
 0x5cb   : > { %4650 = vst.msk [vmem:[%s8481_s9 + $0x30] sm:$0xff] %vm253_vm0, %v4618_v61  ;;  %v3913_v36 = vpop.permute.xlu0 %3912  ;;  %v4111_v63 = vsel %vm2042_vm7, %v4079_v43, %v3533_v14  ;;  %v4017_v16 = vsel %vm1931_vm4, %v3985_v21, %v9353_v37  ;;  %v4599_v47 = vld [vmem:[%s5625_s25 + $0x98] sm:$0xff]  ;;  %v4598_v37 = vld [vmem:[%s5625_s25 + $0x90] sm:$0xff] }
 0x5cc   : > { %v4205_v38 = vsel %vm2153_vm10, %v4173_v5, %v3913_v36 }
 0x5cd   : > { %5262 = vmatmul.mubr.msk.f32.gmra.mrb[26].mxu1 %vm2202_vm11, %v4205_v38 }
 0x5ce   : > { %v3279_v20 = vpop.permute.xlu1 %3278 }
 0x5cf   : > { %v3659_v41 = vpop.permute.xlu0 %3658  ;;  %v4048_v61 = vsel %vm1968_vm5, %v4016_v19, %v3279_v20 }
 0x5d0   : > { %v4142_v4 = vsel %vm2079_vm8, %v4110_v6, %v3659_v41 }
 0x5d2   : > { %v3787_v15 = vpop.permute.xlu1 %3786 }
 0x5d3   : > { %v3661_v2 = vpop.permute.xlu0 %3660  ;;  %v4174_v0 = vsel %vm2116_vm9, %v4142_v4, %v3787_v15 }
 0x5d4   : > { %v4143_v27 = vsel %vm2079_vm8, %v4111_v63, %v3661_v2  ;;  %v4591_v2 = vld [vmem:[%s5625_s25 + $0x58] sm:$0xff] }
 0x5d6   : > { %v3407_v56 = vpop.permute.xlu1 %3406 }
 0x5d7   : > { %v3281_v12 = vpop.permute.xlu0 %3280  ;;  %v5236_v48 = vpop.f32.mrb[8].mxu1  ;;  %v4080_v5 = vsel %vm2005_vm6, %v4048_v61, %v3407_v56 }
 0x5d8   : > { %v4433_v59 = vadd.f32 %v5236_v48, %v8468_v44  ;;  %v4427_v31 = vpop.f32.mrb[9].mxu1  ;;  %v4049_v36 = vsel %vm1968_vm5, %v4017_v16, %v3281_v12 }
 0x5d9   : > { %v4428_v8 = vadd.f32 %v8468_v44, %v4427_v31 }
 0x5da   : > { %v4555_v46 = vmax.f32 %v4433_v59, 0.0  ;;  %v3915_v29 = vpop.permute.xlu1 %3914 }
 0x5db   : > { %v4554_v25 = vmax.f32 %v4428_v8, 0.0  ;;  %v4206_v55 = vsel %vm2153_vm10, %v4174_v0, %v3915_v29  ;;  %v3789_v52 = vpop.permute.xlu0 %3788 }
 0x5dc   : > { %v4621_v45 = vadd.f32 %v4589_v13, %v4555_v46  ;;  %5264 = vmatprep.mubr.msk.f32.mxu1 %vm2202_vm11, %v4206_v55  ;;  %v4175_v7 = vsel %vm2116_vm9, %v4143_v27, %v3789_v52  ;;  %v4592_v55 = vld [vmem:[%s5625_s25 + $0x60] sm:$0xff] }
 0x5dd   : > { %v4620_v58 = vadd.f32 %v4588_v40, %v4554_v25  ;;  %v4593_v40 = vld [vmem:[%s5625_s25 + $0x68] sm:$0xff] }
 0x5de   : > { %4653 = vst.msk [vmem:[%s8481_s9 + $0x48] sm:$0xff] %vm253_vm0, %v4621_v45  ;;  %v3535_v33 = vpop.permute.xlu1 %3534 }
 0x5df   : > { %4652 = vst.msk [vmem:[%s8481_s9 + $0x40] sm:$0xff] %vm253_vm0, %v4620_v58  ;;  %v3409_v17 = vpop.permute.xlu0 %3408  ;;  %v4112_v15 = vsel %vm2042_vm7, %v4080_v5, %v3535_v33 }
 0x5e0   : > { %v4081_v1 = vsel %vm2005_vm6, %v4049_v36, %v3409_v17 }
 0x5e2   : > { %v3537_v30 = vpop.permute.xlu1 %3536 }
 0x5e3   : > { %v3917_v3 = vpop.permute.xlu0 %3916  ;;  %v4113_v62 = vsel %vm2042_vm7, %v4081_v1, %v3537_v30  ;;  %v4600_v1 = vld [vmem:[%s5625_s25 + $0xa0] sm:$0xff] }
 0x5e4   : > { %v4207_v60 = vsel %vm2153_vm10, %v4175_v7, %v3917_v3  ;;  %v4597_v3 = vld [vmem:[%s5625_s25 + $0x88] sm:$0xff] }
 0x5e5   : > { %5265 = vmatmul.mubr.msk.f32.gmra.mrb[28].mxu1 %vm2202_vm11, %v4207_v60 }
 0x5e6   : > { %v3665_v32 = vpop.permute.xlu1 %3664 }
 0x5e7   : > { %v3663_v26 = vpop.permute.xlu0 %3662  ;;  %v4145_v56 = vsel %vm2079_vm8, %v4113_v62, %v3665_v32 }
 0x5e8   : > { %v4144_v20 = vsel %vm2079_vm8, %v4112_v15, %v3663_v26  ;;  %v4596_v26 = vld [vmem:[%s5625_s25 + $0x80] sm:$0xff] }
 0x5ea   : > { %v3793_v35 = vpop.permute.xlu1 %3792 }
 0x5eb   : > { %v3791_v51 = vpop.permute.xlu0 %3790  ;;  %v5239_v14 = vpop.f32.mrb[10].mxu1  ;;  %v4177_v6 = vsel %vm2116_vm9, %v4145_v56, %v3793_v35 }
 0x5ec   : > { %v4443_v38 = vadd.f32 %v5239_v14, %v8468_v44  ;;  %v4437_v41 = vpop.f32.mrb[11].mxu1  ;;  %v4176_v18 = vsel %vm2116_vm9, %v4144_v20, %v3791_v51 }
 0x5ed   : > { %v4438_v9 = vadd.f32 %v8468_v44, %v4437_v41 }
 0x5ee   : > { %v4557_v57 = vmax.f32 %v4443_v38, 0.0  ;;  %v3921_v53 = vpop.permute.xlu1 %3920  ;;  %v4601_v38 = vld [vmem:[%s5625_s25 + $0xa8] sm:$0xff] }
 0x5ef   : > { %v4556_v12 = vmax.f32 %v4438_v9, 0.0  ;;  %v3919_v48 = vpop.permute.xlu0 %3918  ;;  %v4209_v13 = vsel %vm2153_vm10, %v4177_v6, %v3921_v53  ;;  %v4603_v53 = vld [vmem:[%s5625_s25 + $0xb8] sm:$0xff] }
 0x5f0   : > { %v4623_v59 = vadd.f32 %v4591_v2, %v4557_v57  ;;  %v4208_v31 = vsel %vm2153_vm10, %v4176_v18, %v3919_v48 }
 0x5f1   : > { %v4622_v4 = vadd.f32 %v4590_v49, %v4556_v12  ;;  %5267 = vmatprep.mubr.msk.f32.mxu1 %vm2202_vm11, %v4208_v31  ;;  %v4602_v12 = vld [vmem:[%s5625_s25 + $0xb0] sm:$0xff] }
 0x5f2   : > { %4655 = vst.msk [vmem:[%s8481_s9 + $0x58] sm:$0xff] %vm253_vm0, %v4623_v59  ;;  %5268 = vmatmul.mubr.msk.f32.gmra.mrb[30].mxu1 %vm2202_vm11, %v4209_v13 }
 0x5f3   : > { %4654 = vst.msk [vmem:[%s8481_s9 + $0x50] sm:$0xff] %vm253_vm0, %v4622_v4 }
 0x5ff   : > { %v5242_v8 = vpop.f32.mrb[12].mxu1 }
 0x600   : > { %v4453_v0 = vadd.f32 %v5242_v8, %v8468_v44  ;;  %v4447_v46 = vpop.f32.mrb[13].mxu1  ;;  %v4605_v8 = vld [vmem:[%s5625_s25 + $0xc8] sm:$0xff] }
 0x601   : > { %v4448_v29 = vadd.f32 %v8468_v44, %v4447_v46 }
 0x602   : > { %v4559_v25 = vmax.f32 %v4453_v0, 0.0 }
 0x603   : > { %v4558_v52 = vmax.f32 %v4448_v29, 0.0 }
 0x604   : > { %v4625_v39 = vadd.f32 %v4593_v40, %v4559_v25  ;;  %v4604_v40 = vld [vmem:[%s5625_s25 + $0xc0] sm:$0xff] }
 0x605   : > { %v4624_v45 = vadd.f32 %v4592_v55, %v4558_v52 }
 0x606   : > { %4657 = vst.msk [vmem:[%s8481_s9 + $0x68] sm:$0xff] %vm253_vm0, %v4625_v39 }
 0x607   : > { %4656 = vst.msk [vmem:[%s8481_s9 + $0x60] sm:$0xff] %vm253_vm0, %v4624_v45 }
 0x613   : > { %v5245_v23 = vpop.f32.mrb[14].mxu1 }
 0x614   : > { %v4463_v10 = vadd.f32 %v5245_v23, %v8468_v44  ;;  %v4457_v58 = vpop.f32.mrb[15].mxu1  ;;  %v4607_v23 = vld [vmem:[%s5625_s25 + $0xd8] sm:$0xff] }
 0x615   : > { %v4458_v50 = vadd.f32 %v8468_v44, %v4457_v58 }
 0x616   : > { %v4561_v33 = vmax.f32 %v4463_v10, 0.0 }
 0x617   : > { %v4560_v17 = vmax.f32 %v4458_v50, 0.0 }
 0x618   : > { %v4627_v43 = vadd.f32 %v4595_v42, %v4561_v33  ;;  %v4606_v42 = vld [vmem:[%s5625_s25 + $0xd0] sm:$0xff] }
 0x619   : > { %v4626_v63 = vadd.f32 %v4594_v34, %v4560_v17 }
 0x61a   : > { %4659 = vst.msk [vmem:[%s8481_s9 + $0x78] sm:$0xff] %vm253_vm0, %v4627_v43 }
 0x61b   : > { %4658 = vst.msk [vmem:[%s8481_s9 + $0x70] sm:$0xff] %vm253_vm0, %v4626_v63 }
 0x627   : > { %v5248_v27 = vpop.f32.mrb[16].mxu1 }
 0x628   : > { %v4473_v30 = vadd.f32 %v5248_v27, %v8468_v44  ;;  %v4467_v7 = vpop.f32.mrb[17].mxu1  ;;  %v4609_v27 = vld [vmem:[%s5625_s25 + $0xe8] sm:$0xff] }
 0x629   : > { %v4468_v60 = vadd.f32 %v8468_v44, %v4467_v7 }
 0x62a   : > { %v4563_v32 = vmax.f32 %v4473_v30, 0.0 }
 0x62b   : > { %v4562_v24 = vmax.f32 %v4468_v60, 0.0 }
 0x62c   : > { %v4629_v28 = vadd.f32 %v4597_v3, %v4563_v32  ;;  %v4608_v3 = vld [vmem:[%s5625_s25 + $0xe0] sm:$0xff] }
 0x62d   : > { %v4628_v54 = vadd.f32 %v4596_v26, %v4562_v24 }
 0x62e   : > { %4661 = vst.msk [vmem:[%s8481_s9 + $0x88] sm:$0xff] %vm253_vm0, %v4629_v28 }
 0x62f   : > { %4660 = vst.msk [vmem:[%s8481_s9 + $0x80] sm:$0xff] %vm253_vm0, %v4628_v54 }
 0x640   : > { %v5251_v11 = vpop.f32.mrb[18].mxu1 }
 0x641   : > { %v4483_v22 = vadd.f32 %v5251_v11, %v8468_v44  ;;  %v4477_v21 = vpop.f32.mrb[19].mxu1  ;;  %v4611_v11 = vld [vmem:[%s5625_s25 + $0xf8] sm:$0xff] }
 0x642   : > { %v4478_v19 = vadd.f32 %v8468_v44, %v4477_v21 }
 0x643   : > { %v4565_v35 = vmax.f32 %v4483_v22, 0.0 }
 0x644   : > { %v4564_v16 = vmax.f32 %v4478_v19, 0.0 }
 0x645   : > { %v4631_v61 = vadd.f32 %v4599_v47, %v4565_v35  ;;  %v4610_v47 = vld [vmem:[%s5625_s25 + $0xf0] sm:$0xff] }
 0x646   : > { %v4630_v51 = vadd.f32 %v4598_v37, %v4564_v16 }
 0x647   : > { %4663 = vst.msk [vmem:[%s8481_s9 + $0x98] sm:$0xff] %vm253_vm0, %v4631_v61 }
 0x648   : > { %4662 = vst.msk [vmem:[%s8481_s9 + $0x90] sm:$0xff] %vm253_vm0, %v4630_v51 }
 0x658   : > { %v5254_v14 = vpop.f32.mrb[20].mxu1 }
 0x659   : > { %v4493_v5 = vadd.f32 %v5254_v14, %v8468_v44  ;;  %v4487_v36 = vpop.f32.mrb[21].mxu1 }
 0x65a   : > { %v4488_v41 = vadd.f32 %v8468_v44, %v4487_v36 }
 0x65b   : > { %v4567_v15 = vmax.f32 %v4493_v5, 0.0 }
 0x65c   : > { %v4566_v2 = vmax.f32 %v4488_v41, 0.0 }
 0x65d   : > { %v4633_v9 = vadd.f32 %v4601_v38, %v4567_v15 }
 0x65e   : > { %v4632_v62 = vadd.f32 %v4600_v1, %v4566_v2 }
 0x65f   : > { %4665 = vst.msk [vmem:[%s8481_s9 + $0xa8] sm:$0xff] %vm253_vm0, %v4633_v9 }
 0x660   : > { %4664 = vst.msk [vmem:[%s8481_s9 + $0xa0] sm:$0xff] %vm253_vm0, %v4632_v62 }
 0x670   : > { %v5257_v20 = vpop.f32.mrb[22].mxu1 }
 0x671   : > { %v4503_v57 = vadd.f32 %v5257_v20, %v8468_v44  ;;  %v4497_v49 = vpop.f32.mrb[23].mxu1 }
 0x672   : > { %v4498_v56 = vadd.f32 %v8468_v44, %v4497_v49 }
 0x673   : > { %v4569_v18 = vmax.f32 %v4503_v57, 0.0 }
 0x674   : > { %v4568_v48 = vmax.f32 %v4498_v56, 0.0 }
 0x675   : > { %v4635_v6 = vadd.f32 %v4603_v53, %v4569_v18 }
 0x676   : > { %v4634_v59 = vadd.f32 %v4602_v12, %v4568_v48 }
 0x677   : > { %4667 = vst.msk [vmem:[%s8481_s9 + $0xb8] sm:$0xff] %vm253_vm0, %v4635_v6 }
 0x678   : > { %4666 = vst.msk [vmem:[%s8481_s9 + $0xb0] sm:$0xff] %vm253_vm0, %v4634_v59 }
 0x688   : > { %v5260_v31 = vpop.f32.mrb[24].mxu1 }
 0x689   : > { %v4513_v4 = vadd.f32 %v5260_v31, %v8468_v44  ;;  %v4507_v13 = vpop.f32.mrb[25].mxu1 }
 0x68a   : > { %v4508_v0 = vadd.f32 %v8468_v44, %v4507_v13 }
 0x68b   : > { %v4571_v46 = vmax.f32 %v4513_v4, 0.0 }
 0x68c   : > { %v4570_v29 = vmax.f32 %v4508_v0, 0.0 }
 0x68d   : > { %v4637_v25 = vadd.f32 %v4605_v8, %v4571_v46 }
 0x68e   : > { %v4636_v55 = vadd.f32 %v4604_v40, %v4570_v29 }
 0x68f   : > { %4669 = vst.msk [vmem:[%s8481_s9 + $0xc8] sm:$0xff] %vm253_vm0, %v4637_v25 }
 0x690   : > { %4668 = vst.msk [vmem:[%s8481_s9 + $0xc0] sm:$0xff] %vm253_vm0, %v4636_v55 }
 0x6a0   : > { %v5263_v52 = vpop.f32.mrb[26].mxu1 }
 0x6a1   : > { %v4523_v39 = vadd.f32 %v5263_v52, %v8468_v44  ;;  %v4517_v45 = vpop.f32.mrb[27].mxu1 }
 0x6a2   : > { %v4518_v10 = vadd.f32 %v8468_v44, %v4517_v45 }
 0x6a3   : > { %v4573_v58 = vmax.f32 %v4523_v39, 0.0 }
 0x6a4   : > { %v4572_v50 = vmax.f32 %v4518_v10, 0.0 }
 0x6a5   : > { %v4639_v33 = vadd.f32 %v4607_v23, %v4573_v58 }
 0x6a6   : > { %v4638_v34 = vadd.f32 %v4606_v42, %v4572_v50 }
 0x6a7   : > { %4671 = vst.msk [vmem:[%s8481_s9 + $0xd8] sm:$0xff] %vm253_vm0, %v4639_v33 }
 0x6a8   : > { %4670 = vst.msk [vmem:[%s8481_s9 + $0xd0] sm:$0xff] %vm253_vm0, %v4638_v34 }
 0x6b8   : > { %v5266_v17 = vpop.f32.mrb[28].mxu1 }
 0x6b9   : > { %v4533_v43 = vadd.f32 %v5266_v17, %v8468_v44  ;;  %v4527_v63 = vpop.f32.mrb[29].mxu1 }
 0x6ba   : > { %v4528_v30 = vadd.f32 %v8468_v44, %v4527_v63 }
 0x6bb   : > { %v4575_v7 = vmax.f32 %v4533_v43, 0.0 }
 0x6bc   : > { %v4574_v60 = vmax.f32 %v4528_v30, 0.0 }
 0x6bd   : > { %v4641_v32 = vadd.f32 %v4609_v27, %v4575_v7 }
 0x6be   : > { %v4640_v26 = vadd.f32 %v4608_v3, %v4574_v60 }
 0x6bf   : > { %4673 = vst.msk [vmem:[%s8481_s9 + $0xe8] sm:$0xff] %vm253_vm0, %v4641_v32 }
 0x6c0   : > { %4672 = vst.msk [vmem:[%s8481_s9 + $0xe0] sm:$0xff] %vm253_vm0, %v4640_v26 }
 0x6c5   : > { %v5269_v24 = vpop.f32.mrb[30].mxu1 }
 0x6c6   : > { %v4543_v28 = vadd.f32 %v5269_v24, %v8468_v44  ;;  %v4537_v54 = vpop.f32.mrb[31].mxu1 }
 0x6c7   : > { %v4538_v22 = vadd.f32 %v8468_v44, %v4537_v54 }
 0x6c8   : > { %v4577_v21 = vmax.f32 %v4543_v28, 0.0 }
 0x6c9   : > { %v4576_v19 = vmax.f32 %v4538_v22, 0.0 }
 0x6ca   : > { %v4643_v35 = vadd.f32 %v4611_v11, %v4577_v21 }
 0x6cb   : > { %v4642_v37 = vadd.f32 %v4610_v47, %v4576_v19 }
 0x6cc   : > { %4675 = vst.msk [vmem:[%s8481_s9 + $0xf8] sm:$0xff] %vm253_vm0, %v4643_v35 }
 0x6cd   : > { %4674 = vst.msk [vmem:[%s8481_s9 + $0xf0] sm:$0xff] %vm253_vm0, %v4642_v37 }
 0x6ce PF: > { %s15_s20 = sadd.s32 1, %s5380_s20   ;;  %s9354_s18 = smov %s5376_s19 }
 0x6cf   : > { %p12_p5 = scmp.ge.s32.totalorder %s15_s20, 4   ;;  %s9355_s19 = smov %s9357_s21 }
 0x6d1   :  { %14 = sbr.rel (!%p12_p5) target bundleno = 2 (0x2), region = 87 }

</bundles_post_ra>
